<compile_context>
chip_gen: v7x
topology: tpu7x:2x2x1
jax: 0.10.0
libtpu: 0.0.40
codegen_flags: <defaults>
</compile_context>

<pallas_src>
import functools
import math

import jax
import jax.numpy as jnp
from jax.experimental import pallas as pl
from jax.experimental.pallas import tpu as pltpu


# ----------------------------------------------------------------------------
# Kernel: the whole encoder stack for one batch block.
# x_ref is (batch_block * S, D)  (batch fused into the matmul M dimension).
# ----------------------------------------------------------------------------
def _encoder_stack_kernel(
    x_ref, mask_ref,
    wqkv_ref, bqkv_ref, wo_ref, bo_ref,
    ln1w_ref, ln1b_ref, w1_ref, b1_ref, w2_ref, b2_ref, ln2w_ref, ln2b_ref,
    out_ref,
    *, nhead, head_dim, seq_len, num_layers, approx_recip,
):
    M, D = x_ref.shape
    S = seq_len
    bb = M // S                       # batch elements in this block (static)
    cdt = wqkv_ref.dtype              # matmul input dtype (f32 or bf16)

    # Shared layer weights: loaded once, resident for every layer iteration.
    wqkv = wqkv_ref[...]; bqkv = bqkv_ref[...]
    wo = wo_ref[...]; bo = bo_ref[...]
    ln1w = ln1w_ref[...]; ln1b = ln1b_ref[...]
    w1 = w1_ref[...]; b1 = b1_ref[...]
    w2 = w2_ref[...]; b2 = b2_ref[...]
    ln2w = ln2w_ref[...]; ln2b = ln2b_ref[...]

    # Additive key-padding mask: loaded once, pre-broadcast per batch element
    # to (nhead, S, S) OUTSIDE the layer loop (hoisted; reused by every layer).
    mask_rows = mask_ref[...]                                   # (bb, 1, S)
    masks = [jnp.broadcast_to(mask_rows[b], (nhead, S, S)).astype(jnp.float32)
             for b in range(bb)]

    scale = 1.0 / math.sqrt(head_dim)

    def layer_norm(y, w, b):
        mu = jnp.mean(y, axis=-1, keepdims=True)
        var = jnp.mean((y - mu) ** 2, axis=-1, keepdims=True)
        return (y - mu) * jax.lax.rsqrt(var + 1e-5) * w + b

    def split_heads(t, b):
        # (M, D') -> (nhead, S, head_dim) for batch element b of this block,
        # using only static row/lane slices + a leading-axis stack.
        rows = t[b * S:(b + 1) * S, :]
        return jnp.stack(
            [rows[:, h * head_dim:(h + 1) * head_dim] for h in range(nhead)],
            axis=0)

    x2d = x_ref[...].astype(jnp.float32)                        # (M, D)

    for _ in range(num_layers):          # all layers share one weight set
        xm = x2d.astype(cdt)

        # ---- fused Q/K/V projection: ONE (M, D) x (D, 3D) MXU matmul ----
        qkv = jnp.dot(xm, wqkv, preferred_element_type=jnp.float32) + bqkv
        q = qkv[:, 0 * D:1 * D] * scale   # fold 1/sqrt(head_dim) into q once
        k = qkv[:, 1 * D:2 * D]           # K projection has no bias (zeros)
        v = qkv[:, 2 * D:3 * D]

        # ---- attention: per batch element, all heads in one batched einsum ----
        attn_blocks = []
        for b in range(bb):
            qb = split_heads(q, b).astype(cdt)                  # (nhead, S, hd)
            kb = split_heads(k, b).astype(cdt)
            vb = split_heads(v, b).astype(cdt)
            s = jnp.einsum("hqd,hkd->hqk", qb, kb,
                           preferred_element_type=jnp.float32)  # (nhead, S, S)
            s = s + masks[b]                                    # mask key columns
            s = s - jnp.max(s, axis=-1, keepdims=True)
            p = jnp.exp(s)
            denom = jnp.sum(p, axis=-1, keepdims=True)
            if approx_recip:
                p = p * pl.reciprocal(denom, approx=True)       # EUP slot
            else:
                p = p / denom
            o = jnp.einsum("hqk,hkd->hqd", p.astype(cdt), vb,
                           preferred_element_type=jnp.float32)  # (nhead, S, hd)
            attn_blocks.append(
                jnp.concatenate([o[h] for h in range(nhead)], axis=-1))  # (S, D)
        attn = (jnp.concatenate(attn_blocks, axis=0)
                if bb > 1 else attn_blocks[0])                  # (M, D)

        attn = jnp.dot(attn.astype(cdt), wo,
                       preferred_element_type=jnp.float32) + bo

        # ---- residual + LayerNorm 1 (dropout == identity) ----
        x2d = layer_norm(x2d + attn, ln1w, ln1b)

        # ---- feed-forward, batch-fused ----
        h1 = jnp.dot(x2d.astype(cdt), w1, preferred_element_type=jnp.float32) + b1
        h1 = jnp.maximum(h1, 0.0)                               # ReLU
        ff = jnp.dot(h1.astype(cdt), w2, preferred_element_type=jnp.float32) + b2

        # ---- residual + LayerNorm 2 ----
        x2d = layer_norm(x2d + ff, ln2w, ln2b)

    out_ref[...] = x2d.astype(out_ref.dtype)


# ----------------------------------------------------------------------------
# Wrapper
# ----------------------------------------------------------------------------
def transformer_encoder_pallas(x, add_mask, params, *, nhead, num_layers,
                               compute_dtype=jnp.float32, batch_block=None,
                               approx_recip=None):
    """x: (B,S,D) f32; add_mask: (B,1,S) additive float mask over key axis."""
    B, S, D = x.shape
    assert D % nhead == 0
    head_dim = D // nhead
    if batch_block is None:
        batch_block = B                 # fuse whole batch into the matmul M dim
    assert B % batch_block == 0
    if approx_recip is None:
        approx_recip = (compute_dtype == jnp.bfloat16)

    # Wrapper-side layout plumbing (free in XLA): present the kernel a
    # lane-dense (B*S, D) activation slab.
    x2d = x.reshape(B * S, D).astype(jnp.float32)
    mask = add_mask.astype(jnp.float32)                         # (B, 1, S)

    wcast = lambda w: w.astype(compute_dtype)     # matmul weights only
    f32 = lambda w: w.astype(jnp.float32)         # biases / LN params stay f32

    # Fused QKV weight (D, 3D); K has no bias -> zero slot in the fused bias.
    wqkv = jnp.concatenate([params["wq"], params["wk"], params["wv"]], axis=1)
    bqkv = jnp.concatenate(
        [params["bq"], jnp.zeros_like(params["bq"]), params["bv"]], axis=1)

    weights = [
        wcast(wqkv), f32(bqkv),
        wcast(params["wo"]), f32(params["bo"]),
        f32(params["ln1_w"]), f32(params["ln1_b"]),
        wcast(params["w1"]), f32(params["b1"]),
        wcast(params["w2"]), f32(params["b2"]),
        f32(params["ln2_w"]), f32(params["ln2_b"]),
    ]

    def wspec(w):
        nd = w.ndim
        return pl.BlockSpec(w.shape, lambda i, nd=nd: (0,) * nd)  # whole array, fetched once

    kernel = functools.partial(
        _encoder_stack_kernel, nhead=nhead, head_dim=head_dim, seq_len=S,
        num_layers=num_layers, approx_recip=approx_recip)

    mrows = batch_block * S
    out2d = pl.pallas_call(
        kernel,
        out_shape=jax.ShapeDtypeStruct((B * S, D), jnp.float32),
        grid_spec=pltpu.PrefetchScalarGridSpec(
            num_scalar_prefetch=0,
            grid=(B // batch_block,),           # "parallel" batch-block axis
            in_specs=[
                pl.BlockSpec((mrows, D), lambda i: (i, 0)),              # activations
                pl.BlockSpec((batch_block, 1, S), lambda i: (i, 0, 0)),  # mask
                *[wspec(w) for w in weights],
            ],
            out_specs=pl.BlockSpec((mrows, D), lambda i: (i, 0)),
        ),
        compiler_params=pltpu.CompilerParams(
            dimension_semantics=("parallel",),
            vmem_limit_bytes=64 * 1024 * 1024,
        ),
    )(x2d, mask, *weights)
    return out2d.reshape(B, S, D)


# ----------------------------------------------------------------------------
# Pure-JAX reference (mirrors the PyTorch forward) for correctness check.
# ----------------------------------------------------------------------------
def _reference_layer(x, add_mask, p, nhead):
    B, S, D = x.shape
    hd = D // nhead
    q = x @ p["wq"] + p["bq"][0]
    k = x @ p["wk"]
    v = x @ p["wv"] + p["bv"][0]
    q = q.reshape(B, S, nhead, hd).transpose(0, 2, 1, 3)
    k = k.reshape(B, S, nhead, hd).transpose(0, 2, 1, 3)
    v = v.reshape(B, S, nhead, hd).transpose(0, 2, 1, 3)
    scores = jnp.einsum("bhqd,bhkd->bhqk", q, k) / math.sqrt(hd)
    scores = scores + add_mask[:, None, :, :]            # (B,1,1,S) broadcast
    scores = jax.nn.softmax(scores, axis=-1)
    o = jnp.einsum("bhqk,bhkd->bhqd", scores, v)
    o = o.transpose(0, 2, 1, 3).reshape(B, S, D)
    o = o @ p["wo"] + p["bo"][0]
    src = x + o
    mu = src.mean(-1, keepdims=True)
    var = ((src - mu) ** 2).mean(-1, keepdims=True)
    src = (src - mu) / jnp.sqrt(var + 1e-5) * p["ln1_w"][0] + p["ln1_b"][0]
    h1 = jax.nn.relu(src @ p["w1"] + p["b1"][0])
    ff = h1 @ p["w2"] + p["b2"][0]
    src = src + ff
    mu = src.mean(-1, keepdims=True)
    var = ((src - mu) ** 2).mean(-1, keepdims=True)
    src = (src - mu) / jnp.sqrt(var + 1e-5) * p["ln2_w"][0] + p["ln2_b"][0]
    return src


def _reference_encoder(x, add_mask, p, nhead, num_layers):
    for _ in range(num_layers):
        x = _reference_layer(x, add_mask, p, nhead)
    return x


# ----------------------------------------------------------------------------
if __name__ == "__main__":
    B, S, D, NHEAD, DFF, NUM_LAYERS = 2, 8, 128, 4, 256, 2

    key = jax.random.PRNGKey(0)
    keys = jax.random.split(key, 16)

    def init(k, shape, scale=0.02):
        return jax.random.normal(k, shape, dtype=jnp.float32) * scale

    # Weights stored as (in, out), i.e. already transposed vs. nn.Linear.
    params = {
        "wq": init(keys[0], (D, D)),  "bq": init(keys[1], (1, D)),
        "wk": init(keys[2], (D, D)),                          # no bias (matches module)
        "wv": init(keys[3], (D, D)),  "bv": init(keys[4], (1, D)),
        "wo": init(keys[5], (D, D)),  "bo": init(keys[6], (1, D)),
        "ln1_w": jnp.ones((1, D), jnp.float32), "ln1_b": jnp.zeros((1, D), jnp.float32),
        "w1": init(keys[7], (D, DFF)), "b1": init(keys[8], (1, DFF)),
        "w2": init(keys[9], (DFF, D)), "b2": init(keys[10], (1, D)),
        "ln2_w": jnp.ones((1, D), jnp.float32), "ln2_b": jnp.zeros((1, D), jnp.float32),
    }

    x = jax.random.normal(keys[11], (B, S, D), dtype=jnp.float32)

    # Boolean padding pattern -> additive float mask (0 keep, -1e9 pad),
    # shaped (B, 1, S) so it broadcasts over query rows / heads.
    pad_bool = jnp.zeros((B, S), dtype=bool).at[1, S - 2:].set(True)
    add_mask = jnp.where(pad_bool, -1e9, 0.0).astype(jnp.float32)[:, None, :]

    ref = _reference_encoder(x, add_mask, params, NHEAD, NUM_LAYERS)

    # Exact (f32) path — tight correctness check.
    out = transformer_encoder_pallas(x, add_mask, params,
                                     nhead=NHEAD, num_layers=NUM_LAYERS)
    out = jax.block_until_ready(out)
    assert out.shape == (B, S, D)
    assert jnp.allclose(out, ref, atol=1e-3, rtol=1e-3), "f32 mismatch vs reference"

    # Fast path (v6e/v7x-oriented): bf16 MXU inputs + approx-reciprocal softmax.
    out_fast = transformer_encoder_pallas(x, add_mask, params,
                                          nhead=NHEAD, num_layers=NUM_LAYERS,
                                          compute_dtype=jnp.bfloat16)
    out_fast = jax.block_until_ready(out_fast)
    assert bool(jnp.all(jnp.isfinite(out_fast)))
    assert jnp.allclose(out_fast, ref, atol=1e-1, rtol=1e-1), "bf16 sanity check failed"

    print("KERNEL_OK")
</pallas_src>

<mosaic_0001>
module attributes {stable_mosaic.version = 11 : i64} {
  func.func @_encoder_stack_kernel(%arg0: i32, %arg1: memref<16x128xf32, #tpu.memory_space<vmem>>, %arg2: memref<2x1x8xf32, #tpu.memory_space<vmem>>, %arg3: memref<128x384xf32, #tpu.memory_space<vmem>>, %arg4: memref<1x384xf32, #tpu.memory_space<vmem>>, %arg5: memref<128x128xf32, #tpu.memory_space<vmem>>, %arg6: memref<1x128xf32, #tpu.memory_space<vmem>>, %arg7: memref<1x128xf32, #tpu.memory_space<vmem>>, %arg8: memref<1x128xf32, #tpu.memory_space<vmem>>, %arg9: memref<128x256xf32, #tpu.memory_space<vmem>>, %arg10: memref<1x256xf32, #tpu.memory_space<vmem>>, %arg11: memref<256x128xf32, #tpu.memory_space<vmem>>, %arg12: memref<1x128xf32, #tpu.memory_space<vmem>>, %arg13: memref<1x128xf32, #tpu.memory_space<vmem>>, %arg14: memref<1x128xf32, #tpu.memory_space<vmem>>, %arg15: memref<16x128xf32, #tpu.memory_space<vmem>>) attributes {dimension_semantics = [#tpu.dimension_semantics<parallel>], iteration_bounds = array<i64: 1>, scalar_prefetch = 0 : i64, scratch_operands = 0 : i64, tpu.core_type = #tpu.core_type<tc>, window_params = [{transform_indices = @transform_0, window_bounds = array<i64: 16, 128>}, {transform_indices = @transform_1, window_bounds = array<i64: 2, 1, 8>}, {pipeline_mode = #tpu.pipeline_mode<synchronous>, transform_indices = @transform_2, window_bounds = array<i64: 128, 384>}, {pipeline_mode = #tpu.pipeline_mode<synchronous>, transform_indices = @transform_3, window_bounds = array<i64: 1, 384>}, {pipeline_mode = #tpu.pipeline_mode<synchronous>, transform_indices = @transform_4, window_bounds = array<i64: 128, 128>}, {pipeline_mode = #tpu.pipeline_mode<synchronous>, transform_indices = @transform_5, window_bounds = array<i64: 1, 128>}, {pipeline_mode = #tpu.pipeline_mode<synchronous>, transform_indices = @transform_6, window_bounds = array<i64: 1, 128>}, {pipeline_mode = #tpu.pipeline_mode<synchronous>, transform_indices = @transform_7, window_bounds = array<i64: 1, 128>}, {pipeline_mode = #tpu.pipeline_mode<synchronous>, transform_indices = @transform_8, window_bounds = array<i64: 128, 256>}, {pipeline_mode = #tpu.pipeline_mode<synchronous>, transform_indices = @transform_9, window_bounds = array<i64: 1, 256>}, {pipeline_mode = #tpu.pipeline_mode<synchronous>, transform_indices = @transform_10, window_bounds = array<i64: 256, 128>}, {pipeline_mode = #tpu.pipeline_mode<synchronous>, transform_indices = @transform_11, window_bounds = array<i64: 1, 128>}, {pipeline_mode = #tpu.pipeline_mode<synchronous>, transform_indices = @transform_12, window_bounds = array<i64: 1, 128>}, {pipeline_mode = #tpu.pipeline_mode<synchronous>, transform_indices = @transform_13, window_bounds = array<i64: 1, 128>}, {transform_indices = @transform_14, window_bounds = array<i64: 16, 128>}]} {
    %c0 = arith.constant 0 : index
    %c0_0 = arith.constant 0 : index
    %0 = vector.load %arg3[%c0, %c0_0] : memref<128x384xf32, #tpu.memory_space<vmem>>, vector<128x384xf32>
    %c0_1 = arith.constant 0 : index
    %c0_2 = arith.constant 0 : index
    %1 = vector.load %arg4[%c0_1, %c0_2] : memref<1x384xf32, #tpu.memory_space<vmem>>, vector<1x384xf32>
    %c0_3 = arith.constant 0 : index
    %c0_4 = arith.constant 0 : index
    %2 = vector.load %arg5[%c0_3, %c0_4] : memref<128x128xf32, #tpu.memory_space<vmem>>, vector<128x128xf32>
    %c0_5 = arith.constant 0 : index
    %c0_6 = arith.constant 0 : index
    %3 = vector.load %arg6[%c0_5, %c0_6] : memref<1x128xf32, #tpu.memory_space<vmem>>, vector<1x128xf32>
    %c0_7 = arith.constant 0 : index
    %c0_8 = arith.constant 0 : index
    %4 = vector.load %arg7[%c0_7, %c0_8] : memref<1x128xf32, #tpu.memory_space<vmem>>, vector<1x128xf32>
    %c0_9 = arith.constant 0 : index
    %c0_10 = arith.constant 0 : index
    %5 = vector.load %arg8[%c0_9, %c0_10] : memref<1x128xf32, #tpu.memory_space<vmem>>, vector<1x128xf32>
    %c0_11 = arith.constant 0 : index
    %c0_12 = arith.constant 0 : index
    %6 = vector.load %arg9[%c0_11, %c0_12] : memref<128x256xf32, #tpu.memory_space<vmem>>, vector<128x256xf32>
    %c0_13 = arith.constant 0 : index
    %c0_14 = arith.constant 0 : index
    %7 = vector.load %arg10[%c0_13, %c0_14] : memref<1x256xf32, #tpu.memory_space<vmem>>, vector<1x256xf32>
    %c0_15 = arith.constant 0 : index
    %c0_16 = arith.constant 0 : index
    %8 = vector.load %arg11[%c0_15, %c0_16] : memref<256x128xf32, #tpu.memory_space<vmem>>, vector<256x128xf32>
    %c0_17 = arith.constant 0 : index
    %c0_18 = arith.constant 0 : index
    %9 = vector.load %arg12[%c0_17, %c0_18] : memref<1x128xf32, #tpu.memory_space<vmem>>, vector<1x128xf32>
    %c0_19 = arith.constant 0 : index
    %c0_20 = arith.constant 0 : index
    %10 = vector.load %arg13[%c0_19, %c0_20] : memref<1x128xf32, #tpu.memory_space<vmem>>, vector<1x128xf32>
    %c0_21 = arith.constant 0 : index
    %c0_22 = arith.constant 0 : index
    %11 = vector.load %arg14[%c0_21, %c0_22] : memref<1x128xf32, #tpu.memory_space<vmem>>, vector<1x128xf32>
    %c0_23 = arith.constant 0 : index
    %c0_24 = arith.constant 0 : index
    %c0_25 = arith.constant 0 : index
    %12 = vector.load %arg2[%c0_23, %c0_24, %c0_25] : memref<2x1x8xf32, #tpu.memory_space<vmem>>, vector<2x1x8xf32>
    %13 = vector.extract_strided_slice %12 {offsets = [0, 0, 0], sizes = [1, 1, 8], strides = [1, 1, 1]} : vector<2x1x8xf32> to vector<1x1x8xf32>
    %14 = vector.shape_cast %13 : vector<1x1x8xf32> to vector<1x8xf32>
    %15 = vector.shape_cast %14 : vector<1x8xf32> to vector<1x1x8xf32>
    %16 = vector.broadcast %15 : vector<1x1x8xf32> to vector<4x8x8xf32>
    %17 = vector.extract_strided_slice %12 {offsets = [1, 0, 0], sizes = [1, 1, 8], strides = [1, 1, 1]} : vector<2x1x8xf32> to vector<1x1x8xf32>
    %18 = vector.shape_cast %17 : vector<1x1x8xf32> to vector<1x8xf32>
    %19 = vector.shape_cast %18 : vector<1x8xf32> to vector<1x1x8xf32>
    %20 = vector.broadcast %19 : vector<1x1x8xf32> to vector<4x8x8xf32>
    %c0_26 = arith.constant 0 : index
    %c0_27 = arith.constant 0 : index
    %21 = vector.load %arg1[%c0_26, %c0_27] : memref<16x128xf32, #tpu.memory_space<vmem>>, vector<16x128xf32>
    %cst = arith.constant dense<0.000000e+00> : vector<16x384xf32>
    %22 = tpu.matmul %21, %0, %cst {dimension_numbers = #tpu.dot_dimension_numbers<[1], [0], [0], [1], [0, 0, 1, 1], [], []>} : vector<16x128xf32>, vector<128x384xf32>, vector<16x384xf32> -> vector<16x384xf32>
    %23 = vector.broadcast %1 : vector<1x384xf32> to vector<16x384xf32>
    %24 = arith.addf %22, %23 : vector<16x384xf32>
    %25 = vector.extract_strided_slice %24 {offsets = [0, 0], sizes = [16, 128], strides = [1, 1]} : vector<16x384xf32> to vector<16x128xf32>
    %cst_28 = arith.constant 0.176776692 : f32
    %26 = vector.broadcast %cst_28 : f32 to vector<16x128xf32>
    %27 = arith.mulf %25, %26 : vector<16x128xf32>
    %28 = vector.extract_strided_slice %24 {offsets = [0, 128], sizes = [16, 128], strides = [1, 1]} : vector<16x384xf32> to vector<16x128xf32>
    %29 = vector.extract_strided_slice %24 {offsets = [0, 256], sizes = [16, 128], strides = [1, 1]} : vector<16x384xf32> to vector<16x128xf32>
    %30 = vector.extract_strided_slice %27 {offsets = [0, 0], sizes = [8, 128], strides = [1, 1]} : vector<16x128xf32> to vector<8x128xf32>
    %31 = vector.extract_strided_slice %30 {offsets = [0, 0], sizes = [8, 32], strides = [1, 1]} : vector<8x128xf32> to vector<8x32xf32>
    %32 = vector.extract_strided_slice %30 {offsets = [0, 32], sizes = [8, 32], strides = [1, 1]} : vector<8x128xf32> to vector<8x32xf32>
    %33 = vector.extract_strided_slice %30 {offsets = [0, 64], sizes = [8, 32], strides = [1, 1]} : vector<8x128xf32> to vector<8x32xf32>
    %34 = vector.extract_strided_slice %30 {offsets = [0, 96], sizes = [8, 32], strides = [1, 1]} : vector<8x128xf32> to vector<8x32xf32>
    %35 = vector.shape_cast %31 : vector<8x32xf32> to vector<1x8x32xf32>
    %36 = vector.shape_cast %32 : vector<8x32xf32> to vector<1x8x32xf32>
    %37 = vector.shape_cast %33 : vector<8x32xf32> to vector<1x8x32xf32>
    %38 = vector.shape_cast %34 : vector<8x32xf32> to vector<1x8x32xf32>
    %39 = tpu.concatenate %35, %36, %37, %38 in 0 : vector<1x8x32xf32>, vector<1x8x32xf32>, vector<1x8x32xf32>, vector<1x8x32xf32> -> vector<4x8x32xf32>
    %40 = vector.extract_strided_slice %28 {offsets = [0, 0], sizes = [8, 128], strides = [1, 1]} : vector<16x128xf32> to vector<8x128xf32>
    %41 = vector.extract_strided_slice %40 {offsets = [0, 0], sizes = [8, 32], strides = [1, 1]} : vector<8x128xf32> to vector<8x32xf32>
    %42 = vector.extract_strided_slice %40 {offsets = [0, 32], sizes = [8, 32], strides = [1, 1]} : vector<8x128xf32> to vector<8x32xf32>
    %43 = vector.extract_strided_slice %40 {offsets = [0, 64], sizes = [8, 32], strides = [1, 1]} : vector<8x128xf32> to vector<8x32xf32>
    %44 = vector.extract_strided_slice %40 {offsets = [0, 96], sizes = [8, 32], strides = [1, 1]} : vector<8x128xf32> to vector<8x32xf32>
    %45 = vector.shape_cast %41 : vector<8x32xf32> to vector<1x8x32xf32>
    %46 = vector.shape_cast %42 : vector<8x32xf32> to vector<1x8x32xf32>
    %47 = vector.shape_cast %43 : vector<8x32xf32> to vector<1x8x32xf32>
    %48 = vector.shape_cast %44 : vector<8x32xf32> to vector<1x8x32xf32>
    %49 = tpu.concatenate %45, %46, %47, %48 in 0 : vector<1x8x32xf32>, vector<1x8x32xf32>, vector<1x8x32xf32>, vector<1x8x32xf32> -> vector<4x8x32xf32>
    %50 = vector.extract_strided_slice %29 {offsets = [0, 0], sizes = [8, 128], strides = [1, 1]} : vector<16x128xf32> to vector<8x128xf32>
    %51 = vector.extract_strided_slice %50 {offsets = [0, 0], sizes = [8, 32], strides = [1, 1]} : vector<8x128xf32> to vector<8x32xf32>
    %52 = vector.extract_strided_slice %50 {offsets = [0, 32], sizes = [8, 32], strides = [1, 1]} : vector<8x128xf32> to vector<8x32xf32>
    %53 = vector.extract_strided_slice %50 {offsets = [0, 64], sizes = [8, 32], strides = [1, 1]} : vector<8x128xf32> to vector<8x32xf32>
    %54 = vector.extract_strided_slice %50 {offsets = [0, 96], sizes = [8, 32], strides = [1, 1]} : vector<8x128xf32> to vector<8x32xf32>
    %55 = vector.shape_cast %51 : vector<8x32xf32> to vector<1x8x32xf32>
    %56 = vector.shape_cast %52 : vector<8x32xf32> to vector<1x8x32xf32>
    %57 = vector.shape_cast %53 : vector<8x32xf32> to vector<1x8x32xf32>
    %58 = vector.shape_cast %54 : vector<8x32xf32> to vector<1x8x32xf32>
    %59 = tpu.concatenate %55, %56, %57, %58 in 0 : vector<1x8x32xf32>, vector<1x8x32xf32>, vector<1x8x32xf32>, vector<1x8x32xf32> -> vector<4x8x32xf32>
    "tpu.trace_start"() <{level = 10 : i32, message = "hqd,hkd->hqk"}> : () -> ()
    %cst_29 = arith.constant dense<0.000000e+00> : vector<4x8x8xf32>
    %60 = tpu.matmul %39, %49, %cst_29 {dimension_numbers = #tpu.dot_dimension_numbers<[2], [2], [1], [1], [0, 0, 0, 1, 1, 1], [0], [0]>} : vector<4x8x32xf32>, vector<4x8x32xf32>, vector<4x8x8xf32> -> vector<4x8x8xf32>
    "tpu.trace_stop"() : () -> ()
    %61 = arith.addf %60, %16 : vector<4x8x8xf32>
    %cst_30 = arith.constant dense<0xFF800000> : vector<4x8xf32>
    %62 = vector.multi_reduction <maximumf>, %61, %cst_30 [2] : vector<4x8x8xf32> to vector<4x8xf32>
    %63 = vector.shape_cast %62 : vector<4x8xf32> to vector<4x8x1xf32>
    %64 = vector.broadcast %63 : vector<4x8x1xf32> to vector<4x8x8xf32>
    %65 = arith.subf %61, %64 : vector<4x8x8xf32>
    %66 = math.exp %65 : vector<4x8x8xf32>
    %cst_31 = arith.constant dense<0.000000e+00> : vector<4x8xf32>
    %67 = vector.multi_reduction <add>, %66, %cst_31 [2] : vector<4x8x8xf32> to vector<4x8xf32>
    %68 = vector.shape_cast %67 : vector<4x8xf32> to vector<4x8x1xf32>
    %69 = vector.broadcast %68 : vector<4x8x1xf32> to vector<4x8x8xf32>
    %70 = arith.divf %66, %69 : vector<4x8x8xf32>
    "tpu.trace_start"() <{level = 10 : i32, message = "hqk,hkd->hqd"}> : () -> ()
    %cst_32 = arith.constant dense<0.000000e+00> : vector<4x8x32xf32>
    %71 = tpu.matmul %70, %59, %cst_32 {dimension_numbers = #tpu.dot_dimension_numbers<[2], [1], [1], [2], [0, 0, 0, 1, 1, 2], [0], [0]>} : vector<4x8x8xf32>, vector<4x8x32xf32>, vector<4x8x32xf32> -> vector<4x8x32xf32>
    "tpu.trace_stop"() : () -> ()
    %72 = vector.extract_strided_slice %71 {offsets = [0, 0, 0], sizes = [1, 8, 32], strides = [1, 1, 1]} : vector<4x8x32xf32> to vector<1x8x32xf32>
    %73 = vector.shape_cast %72 : vector<1x8x32xf32> to vector<8x32xf32>
    %74 = vector.extract_strided_slice %71 {offsets = [1, 0, 0], sizes = [1, 8, 32], strides = [1, 1, 1]} : vector<4x8x32xf32> to vector<1x8x32xf32>
    %75 = vector.shape_cast %74 : vector<1x8x32xf32> to vector<8x32xf32>
    %76 = vector.extract_strided_slice %71 {offsets = [2, 0, 0], sizes = [1, 8, 32], strides = [1, 1, 1]} : vector<4x8x32xf32> to vector<1x8x32xf32>
    %77 = vector.shape_cast %76 : vector<1x8x32xf32> to vector<8x32xf32>
    %78 = vector.extract_strided_slice %71 {offsets = [3, 0, 0], sizes = [1, 8, 32], strides = [1, 1, 1]} : vector<4x8x32xf32> to vector<1x8x32xf32>
    %79 = vector.shape_cast %78 : vector<1x8x32xf32> to vector<8x32xf32>
    %80 = tpu.concatenate %73, %75, %77, %79 in 1 : vector<8x32xf32>, vector<8x32xf32>, vector<8x32xf32>, vector<8x32xf32> -> vector<8x128xf32>
    %81 = vector.extract_strided_slice %27 {offsets = [8, 0], sizes = [8, 128], strides = [1, 1]} : vector<16x128xf32> to vector<8x128xf32>
    %82 = vector.extract_strided_slice %81 {offsets = [0, 0], sizes = [8, 32], strides = [1, 1]} : vector<8x128xf32> to vector<8x32xf32>
    %83 = vector.extract_strided_slice %81 {offsets = [0, 32], sizes = [8, 32], strides = [1, 1]} : vector<8x128xf32> to vector<8x32xf32>
    %84 = vector.extract_strided_slice %81 {offsets = [0, 64], sizes = [8, 32], strides = [1, 1]} : vector<8x128xf32> to vector<8x32xf32>
    %85 = vector.extract_strided_slice %81 {offsets = [0, 96], sizes = [8, 32], strides = [1, 1]} : vector<8x128xf32> to vector<8x32xf32>
    %86 = vector.shape_cast %82 : vector<8x32xf32> to vector<1x8x32xf32>
    %87 = vector.shape_cast %83 : vector<8x32xf32> to vector<1x8x32xf32>
    %88 = vector.shape_cast %84 : vector<8x32xf32> to vector<1x8x32xf32>
    %89 = vector.shape_cast %85 : vector<8x32xf32> to vector<1x8x32xf32>
    %90 = tpu.concatenate %86, %87, %88, %89 in 0 : vector<1x8x32xf32>, vector<1x8x32xf32>, vector<1x8x32xf32>, vector<1x8x32xf32> -> vector<4x8x32xf32>
    %91 = vector.extract_strided_slice %28 {offsets = [8, 0], sizes = [8, 128], strides = [1, 1]} : vector<16x128xf32> to vector<8x128xf32>
    %92 = vector.extract_strided_slice %91 {offsets = [0, 0], sizes = [8, 32], strides = [1, 1]} : vector<8x128xf32> to vector<8x32xf32>
    %93 = vector.extract_strided_slice %91 {offsets = [0, 32], sizes = [8, 32], strides = [1, 1]} : vector<8x128xf32> to vector<8x32xf32>
    %94 = vector.extract_strided_slice %91 {offsets = [0, 64], sizes = [8, 32], strides = [1, 1]} : vector<8x128xf32> to vector<8x32xf32>
    %95 = vector.extract_strided_slice %91 {offsets = [0, 96], sizes = [8, 32], strides = [1, 1]} : vector<8x128xf32> to vector<8x32xf32>
    %96 = vector.shape_cast %92 : vector<8x32xf32> to vector<1x8x32xf32>
    %97 = vector.shape_cast %93 : vector<8x32xf32> to vector<1x8x32xf32>
    %98 = vector.shape_cast %94 : vector<8x32xf32> to vector<1x8x32xf32>
    %99 = vector.shape_cast %95 : vector<8x32xf32> to vector<1x8x32xf32>
    %100 = tpu.concatenate %96, %97, %98, %99 in 0 : vector<1x8x32xf32>, vector<1x8x32xf32>, vector<1x8x32xf32>, vector<1x8x32xf32> -> vector<4x8x32xf32>
    %101 = vector.extract_strided_slice %29 {offsets = [8, 0], sizes = [8, 128], strides = [1, 1]} : vector<16x128xf32> to vector<8x128xf32>
    %102 = vector.extract_strided_slice %101 {offsets = [0, 0], sizes = [8, 32], strides = [1, 1]} : vector<8x128xf32> to vector<8x32xf32>
    %103 = vector.extract_strided_slice %101 {offsets = [0, 32], sizes = [8, 32], strides = [1, 1]} : vector<8x128xf32> to vector<8x32xf32>
    %104 = vector.extract_strided_slice %101 {offsets = [0, 64], sizes = [8, 32], strides = [1, 1]} : vector<8x128xf32> to vector<8x32xf32>
    %105 = vector.extract_strided_slice %101 {offsets = [0, 96], sizes = [8, 32], strides = [1, 1]} : vector<8x128xf32> to vector<8x32xf32>
    %106 = vector.shape_cast %102 : vector<8x32xf32> to vector<1x8x32xf32>
    %107 = vector.shape_cast %103 : vector<8x32xf32> to vector<1x8x32xf32>
    %108 = vector.shape_cast %104 : vector<8x32xf32> to vector<1x8x32xf32>
    %109 = vector.shape_cast %105 : vector<8x32xf32> to vector<1x8x32xf32>
    %110 = tpu.concatenate %106, %107, %108, %109 in 0 : vector<1x8x32xf32>, vector<1x8x32xf32>, vector<1x8x32xf32>, vector<1x8x32xf32> -> vector<4x8x32xf32>
    "tpu.trace_start"() <{level = 10 : i32, message = "hqd,hkd->hqk"}> : () -> ()
    %cst_33 = arith.constant dense<0.000000e+00> : vector<4x8x8xf32>
    %111 = tpu.matmul %90, %100, %cst_33 {dimension_numbers = #tpu.dot_dimension_numbers<[2], [2], [1], [1], [0, 0, 0, 1, 1, 1], [0], [0]>} : vector<4x8x32xf32>, vector<4x8x32xf32>, vector<4x8x8xf32> -> vector<4x8x8xf32>
    "tpu.trace_stop"() : () -> ()
    %112 = arith.addf %111, %20 : vector<4x8x8xf32>
    %cst_34 = arith.constant dense<0xFF800000> : vector<4x8xf32>
    %113 = vector.multi_reduction <maximumf>, %112, %cst_34 [2] : vector<4x8x8xf32> to vector<4x8xf32>
    %114 = vector.shape_cast %113 : vector<4x8xf32> to vector<4x8x1xf32>
    %115 = vector.broadcast %114 : vector<4x8x1xf32> to vector<4x8x8xf32>
    %116 = arith.subf %112, %115 : vector<4x8x8xf32>
    %117 = math.exp %116 : vector<4x8x8xf32>
    %cst_35 = arith.constant dense<0.000000e+00> : vector<4x8xf32>
    %118 = vector.multi_reduction <add>, %117, %cst_35 [2] : vector<4x8x8xf32> to vector<4x8xf32>
    %119 = vector.shape_cast %118 : vector<4x8xf32> to vector<4x8x1xf32>
    %120 = vector.broadcast %119 : vector<4x8x1xf32> to vector<4x8x8xf32>
    %121 = arith.divf %117, %120 : vector<4x8x8xf32>
    "tpu.trace_start"() <{level = 10 : i32, message = "hqk,hkd->hqd"}> : () -> ()
    %cst_36 = arith.constant dense<0.000000e+00> : vector<4x8x32xf32>
    %122 = tpu.matmul %121, %110, %cst_36 {dimension_numbers = #tpu.dot_dimension_numbers<[2], [1], [1], [2], [0, 0, 0, 1, 1, 2], [0], [0]>} : vector<4x8x8xf32>, vector<4x8x32xf32>, vector<4x8x32xf32> -> vector<4x8x32xf32>
    "tpu.trace_stop"() : () -> ()
    %123 = vector.extract_strided_slice %122 {offsets = [0, 0, 0], sizes = [1, 8, 32], strides = [1, 1, 1]} : vector<4x8x32xf32> to vector<1x8x32xf32>
    %124 = vector.shape_cast %123 : vector<1x8x32xf32> to vector<8x32xf32>
    %125 = vector.extract_strided_slice %122 {offsets = [1, 0, 0], sizes = [1, 8, 32], strides = [1, 1, 1]} : vector<4x8x32xf32> to vector<1x8x32xf32>
    %126 = vector.shape_cast %125 : vector<1x8x32xf32> to vector<8x32xf32>
    %127 = vector.extract_strided_slice %122 {offsets = [2, 0, 0], sizes = [1, 8, 32], strides = [1, 1, 1]} : vector<4x8x32xf32> to vector<1x8x32xf32>
    %128 = vector.shape_cast %127 : vector<1x8x32xf32> to vector<8x32xf32>
    %129 = vector.extract_strided_slice %122 {offsets = [3, 0, 0], sizes = [1, 8, 32], strides = [1, 1, 1]} : vector<4x8x32xf32> to vector<1x8x32xf32>
    %130 = vector.shape_cast %129 : vector<1x8x32xf32> to vector<8x32xf32>
    %131 = tpu.concatenate %124, %126, %128, %130 in 1 : vector<8x32xf32>, vector<8x32xf32>, vector<8x32xf32>, vector<8x32xf32> -> vector<8x128xf32>
    %132 = tpu.concatenate %80, %131 in 0 : vector<8x128xf32>, vector<8x128xf32> -> vector<16x128xf32>
    %cst_37 = arith.constant dense<0.000000e+00> : vector<16x128xf32>
    %133 = tpu.matmul %132, %2, %cst_37 {dimension_numbers = #tpu.dot_dimension_numbers<[1], [0], [0], [1], [0, 0, 1, 1], [], []>} : vector<16x128xf32>, vector<128x128xf32>, vector<16x128xf32> -> vector<16x128xf32>
    %134 = vector.broadcast %3 : vector<1x128xf32> to vector<16x128xf32>
    %135 = arith.addf %133, %134 : vector<16x128xf32>
    %136 = arith.addf %21, %135 : vector<16x128xf32>
    %cst_38 = arith.constant dense<0.000000e+00> : vector<16xf32>
    %137 = vector.multi_reduction <add>, %136, %cst_38 [1] : vector<16x128xf32> to vector<16xf32>
    %138 = vector.shape_cast %137 : vector<16xf32> to vector<16x1xf32>
    %cst_39 = arith.constant 1.280000e+02 : f32
    %139 = vector.broadcast %cst_39 : f32 to vector<16x1xf32>
    %140 = arith.divf %138, %139 : vector<16x1xf32>
    %141 = vector.broadcast %140 : vector<16x1xf32> to vector<16x128xf32>
    %142 = arith.subf %136, %141 : vector<16x128xf32>
    %143 = arith.mulf %142, %142 : vector<16x128xf32>
    %cst_40 = arith.constant dense<0.000000e+00> : vector<16xf32>
    %144 = vector.multi_reduction <add>, %143, %cst_40 [1] : vector<16x128xf32> to vector<16xf32>
    %145 = vector.shape_cast %144 : vector<16xf32> to vector<16x1xf32>
    %cst_41 = arith.constant 1.280000e+02 : f32
    %146 = vector.broadcast %cst_41 : f32 to vector<16x1xf32>
    %147 = arith.divf %145, %146 : vector<16x1xf32>
    %148 = vector.broadcast %140 : vector<16x1xf32> to vector<16x128xf32>
    %149 = arith.subf %136, %148 : vector<16x128xf32>
    %cst_42 = arith.constant 9.99999974E-6 : f32
    %150 = vector.broadcast %cst_42 : f32 to vector<16x1xf32>
    %151 = arith.addf %147, %150 : vector<16x1xf32>
    %152 = math.rsqrt %151 : vector<16x1xf32>
    %153 = vector.broadcast %152 : vector<16x1xf32> to vector<16x128xf32>
    %154 = arith.mulf %149, %153 : vector<16x128xf32>
    %155 = vector.broadcast %4 : vector<1x128xf32> to vector<16x128xf32>
    %156 = arith.mulf %154, %155 : vector<16x128xf32>
    %157 = vector.broadcast %5 : vector<1x128xf32> to vector<16x128xf32>
    %158 = arith.addf %156, %157 : vector<16x128xf32>
    %cst_43 = arith.constant dense<0.000000e+00> : vector<16x256xf32>
    %159 = tpu.matmul %158, %6, %cst_43 {dimension_numbers = #tpu.dot_dimension_numbers<[1], [0], [0], [1], [0, 0, 1, 1], [], []>} : vector<16x128xf32>, vector<128x256xf32>, vector<16x256xf32> -> vector<16x256xf32>
    %160 = vector.broadcast %7 : vector<1x256xf32> to vector<16x256xf32>
    %161 = arith.addf %159, %160 : vector<16x256xf32>
    %cst_44 = arith.constant 0.000000e+00 : f32
    %162 = vector.broadcast %cst_44 : f32 to vector<16x256xf32>
    %163 = arith.maximumf %161, %162 : vector<16x256xf32>
    %cst_45 = arith.constant dense<0.000000e+00> : vector<16x128xf32>
    %164 = tpu.matmul %163, %8, %cst_45 {dimension_numbers = #tpu.dot_dimension_numbers<[1], [0], [0], [1], [0, 0, 1, 1], [], []>} : vector<16x256xf32>, vector<256x128xf32>, vector<16x128xf32> -> vector<16x128xf32>
    %165 = vector.broadcast %9 : vector<1x128xf32> to vector<16x128xf32>
    %166 = arith.addf %164, %165 : vector<16x128xf32>
    %167 = arith.addf %158, %166 : vector<16x128xf32>
    %cst_46 = arith.constant dense<0.000000e+00> : vector<16xf32>
    %168 = vector.multi_reduction <add>, %167, %cst_46 [1] : vector<16x128xf32> to vector<16xf32>
    %169 = vector.shape_cast %168 : vector<16xf32> to vector<16x1xf32>
    %cst_47 = arith.constant 1.280000e+02 : f32
    %170 = vector.broadcast %cst_47 : f32 to vector<16x1xf32>
    %171 = arith.divf %169, %170 : vector<16x1xf32>
    %172 = vector.broadcast %171 : vector<16x1xf32> to vector<16x128xf32>
    %173 = arith.subf %167, %172 : vector<16x128xf32>
    %174 = arith.mulf %173, %173 : vector<16x128xf32>
    %cst_48 = arith.constant dense<0.000000e+00> : vector<16xf32>
    %175 = vector.multi_reduction <add>, %174, %cst_48 [1] : vector<16x128xf32> to vector<16xf32>
    %176 = vector.shape_cast %175 : vector<16xf32> to vector<16x1xf32>
    %cst_49 = arith.constant 1.280000e+02 : f32
    %177 = vector.broadcast %cst_49 : f32 to vector<16x1xf32>
    %178 = arith.divf %176, %177 : vector<16x1xf32>
    %179 = vector.broadcast %171 : vector<16x1xf32> to vector<16x128xf32>
    %180 = arith.subf %167, %179 : vector<16x128xf32>
    %cst_50 = arith.constant 9.99999974E-6 : f32
    %181 = vector.broadcast %cst_50 : f32 to vector<16x1xf32>
    %182 = arith.addf %178, %181 : vector<16x1xf32>
    %183 = math.rsqrt %182 : vector<16x1xf32>
    %184 = vector.broadcast %183 : vector<16x1xf32> to vector<16x128xf32>
    %185 = arith.mulf %180, %184 : vector<16x128xf32>
    %186 = vector.broadcast %10 : vector<1x128xf32> to vector<16x128xf32>
    %187 = arith.mulf %185, %186 : vector<16x128xf32>
    %188 = vector.broadcast %11 : vector<1x128xf32> to vector<16x128xf32>
    %189 = arith.addf %187, %188 : vector<16x128xf32>
    %cst_51 = arith.constant dense<0.000000e+00> : vector<16x384xf32>
    %190 = tpu.matmul %189, %0, %cst_51 {dimension_numbers = #tpu.dot_dimension_numbers<[1], [0], [0], [1], [0, 0, 1, 1], [], []>} : vector<16x128xf32>, vector<128x384xf32>, vector<16x384xf32> -> vector<16x384xf32>
    %191 = vector.broadcast %1 : vector<1x384xf32> to vector<16x384xf32>
    %192 = arith.addf %190, %191 : vector<16x384xf32>
    %193 = vector.extract_strided_slice %192 {offsets = [0, 0], sizes = [16, 128], strides = [1, 1]} : vector<16x384xf32> to vector<16x128xf32>
    %cst_52 = arith.constant 0.176776692 : f32
    %194 = vector.broadcast %cst_52 : f32 to vector<16x128xf32>
    %195 = arith.mulf %193, %194 : vector<16x128xf32>
    %196 = vector.extract_strided_slice %192 {offsets = [0, 128], sizes = [16, 128], strides = [1, 1]} : vector<16x384xf32> to vector<16x128xf32>
    %197 = vector.extract_strided_slice %192 {offsets = [0, 256], sizes = [16, 128], strides = [1, 1]} : vector<16x384xf32> to vector<16x128xf32>
    %198 = vector.extract_strided_slice %195 {offsets = [0, 0], sizes = [8, 128], strides = [1, 1]} : vector<16x128xf32> to vector<8x128xf32>
    %199 = vector.extract_strided_slice %198 {offsets = [0, 0], sizes = [8, 32], strides = [1, 1]} : vector<8x128xf32> to vector<8x32xf32>
    %200 = vector.extract_strided_slice %198 {offsets = [0, 32], sizes = [8, 32], strides = [1, 1]} : vector<8x128xf32> to vector<8x32xf32>
    %201 = vector.extract_strided_slice %198 {offsets = [0, 64], sizes = [8, 32], strides = [1, 1]} : vector<8x128xf32> to vector<8x32xf32>
    %202 = vector.extract_strided_slice %198 {offsets = [0, 96], sizes = [8, 32], strides = [1, 1]} : vector<8x128xf32> to vector<8x32xf32>
    %203 = vector.shape_cast %199 : vector<8x32xf32> to vector<1x8x32xf32>
    %204 = vector.shape_cast %200 : vector<8x32xf32> to vector<1x8x32xf32>
    %205 = vector.shape_cast %201 : vector<8x32xf32> to vector<1x8x32xf32>
    %206 = vector.shape_cast %202 : vector<8x32xf32> to vector<1x8x32xf32>
    %207 = tpu.concatenate %203, %204, %205, %206 in 0 : vector<1x8x32xf32>, vector<1x8x32xf32>, vector<1x8x32xf32>, vector<1x8x32xf32> -> vector<4x8x32xf32>
    %208 = vector.extract_strided_slice %196 {offsets = [0, 0], sizes = [8, 128], strides = [1, 1]} : vector<16x128xf32> to vector<8x128xf32>
    %209 = vector.extract_strided_slice %208 {offsets = [0, 0], sizes = [8, 32], strides = [1, 1]} : vector<8x128xf32> to vector<8x32xf32>
    %210 = vector.extract_strided_slice %208 {offsets = [0, 32], sizes = [8, 32], strides = [1, 1]} : vector<8x128xf32> to vector<8x32xf32>
    %211 = vector.extract_strided_slice %208 {offsets = [0, 64], sizes = [8, 32], strides = [1, 1]} : vector<8x128xf32> to vector<8x32xf32>
    %212 = vector.extract_strided_slice %208 {offsets = [0, 96], sizes = [8, 32], strides = [1, 1]} : vector<8x128xf32> to vector<8x32xf32>
    %213 = vector.shape_cast %209 : vector<8x32xf32> to vector<1x8x32xf32>
    %214 = vector.shape_cast %210 : vector<8x32xf32> to vector<1x8x32xf32>
    %215 = vector.shape_cast %211 : vector<8x32xf32> to vector<1x8x32xf32>
    %216 = vector.shape_cast %212 : vector<8x32xf32> to vector<1x8x32xf32>
    %217 = tpu.concatenate %213, %214, %215, %216 in 0 : vector<1x8x32xf32>, vector<1x8x32xf32>, vector<1x8x32xf32>, vector<1x8x32xf32> -> vector<4x8x32xf32>
    %218 = vector.extract_strided_slice %197 {offsets = [0, 0], sizes = [8, 128], strides = [1, 1]} : vector<16x128xf32> to vector<8x128xf32>
    %219 = vector.extract_strided_slice %218 {offsets = [0, 0], sizes = [8, 32], strides = [1, 1]} : vector<8x128xf32> to vector<8x32xf32>
    %220 = vector.extract_strided_slice %218 {offsets = [0, 32], sizes = [8, 32], strides = [1, 1]} : vector<8x128xf32> to vector<8x32xf32>
    %221 = vector.extract_strided_slice %218 {offsets = [0, 64], sizes = [8, 32], strides = [1, 1]} : vector<8x128xf32> to vector<8x32xf32>
    %222 = vector.extract_strided_slice %218 {offsets = [0, 96], sizes = [8, 32], strides = [1, 1]} : vector<8x128xf32> to vector<8x32xf32>
    %223 = vector.shape_cast %219 : vector<8x32xf32> to vector<1x8x32xf32>
    %224 = vector.shape_cast %220 : vector<8x32xf32> to vector<1x8x32xf32>
    %225 = vector.shape_cast %221 : vector<8x32xf32> to vector<1x8x32xf32>
    %226 = vector.shape_cast %222 : vector<8x32xf32> to vector<1x8x32xf32>
    %227 = tpu.concatenate %223, %224, %225, %226 in 0 : vector<1x8x32xf32>, vector<1x8x32xf32>, vector<1x8x32xf32>, vector<1x8x32xf32> -> vector<4x8x32xf32>
    "tpu.trace_start"() <{level = 10 : i32, message = "hqd,hkd->hqk"}> : () -> ()
    %cst_53 = arith.constant dense<0.000000e+00> : vector<4x8x8xf32>
    %228 = tpu.matmul %207, %217, %cst_53 {dimension_numbers = #tpu.dot_dimension_numbers<[2], [2], [1], [1], [0, 0, 0, 1, 1, 1], [0], [0]>} : vector<4x8x32xf32>, vector<4x8x32xf32>, vector<4x8x8xf32> -> vector<4x8x8xf32>
    "tpu.trace_stop"() : () -> ()
    %229 = arith.addf %228, %16 : vector<4x8x8xf32>
    %cst_54 = arith.constant dense<0xFF800000> : vector<4x8xf32>
    %230 = vector.multi_reduction <maximumf>, %229, %cst_54 [2] : vector<4x8x8xf32> to vector<4x8xf32>
    %231 = vector.shape_cast %230 : vector<4x8xf32> to vector<4x8x1xf32>
    %232 = vector.broadcast %231 : vector<4x8x1xf32> to vector<4x8x8xf32>
    %233 = arith.subf %229, %232 : vector<4x8x8xf32>
    %234 = math.exp %233 : vector<4x8x8xf32>
    %cst_55 = arith.constant dense<0.000000e+00> : vector<4x8xf32>
    %235 = vector.multi_reduction <add>, %234, %cst_55 [2] : vector<4x8x8xf32> to vector<4x8xf32>
    %236 = vector.shape_cast %235 : vector<4x8xf32> to vector<4x8x1xf32>
    %237 = vector.broadcast %236 : vector<4x8x1xf32> to vector<4x8x8xf32>
    %238 = arith.divf %234, %237 : vector<4x8x8xf32>
    "tpu.trace_start"() <{level = 10 : i32, message = "hqk,hkd->hqd"}> : () -> ()
    %cst_56 = arith.constant dense<0.000000e+00> : vector<4x8x32xf32>
    %239 = tpu.matmul %238, %227, %cst_56 {dimension_numbers = #tpu.dot_dimension_numbers<[2], [1], [1], [2], [0, 0, 0, 1, 1, 2], [0], [0]>} : vector<4x8x8xf32>, vector<4x8x32xf32>, vector<4x8x32xf32> -> vector<4x8x32xf32>
    "tpu.trace_stop"() : () -> ()
    %240 = vector.extract_strided_slice %239 {offsets = [0, 0, 0], sizes = [1, 8, 32], strides = [1, 1, 1]} : vector<4x8x32xf32> to vector<1x8x32xf32>
    %241 = vector.shape_cast %240 : vector<1x8x32xf32> to vector<8x32xf32>
    %242 = vector.extract_strided_slice %239 {offsets = [1, 0, 0], sizes = [1, 8, 32], strides = [1, 1, 1]} : vector<4x8x32xf32> to vector<1x8x32xf32>
    %243 = vector.shape_cast %242 : vector<1x8x32xf32> to vector<8x32xf32>
    %244 = vector.extract_strided_slice %239 {offsets = [2, 0, 0], sizes = [1, 8, 32], strides = [1, 1, 1]} : vector<4x8x32xf32> to vector<1x8x32xf32>
    %245 = vector.shape_cast %244 : vector<1x8x32xf32> to vector<8x32xf32>
    %246 = vector.extract_strided_slice %239 {offsets = [3, 0, 0], sizes = [1, 8, 32], strides = [1, 1, 1]} : vector<4x8x32xf32> to vector<1x8x32xf32>
    %247 = vector.shape_cast %246 : vector<1x8x32xf32> to vector<8x32xf32>
    %248 = tpu.concatenate %241, %243, %245, %247 in 1 : vector<8x32xf32>, vector<8x32xf32>, vector<8x32xf32>, vector<8x32xf32> -> vector<8x128xf32>
    %249 = vector.extract_strided_slice %195 {offsets = [8, 0], sizes = [8, 128], strides = [1, 1]} : vector<16x128xf32> to vector<8x128xf32>
    %250 = vector.extract_strided_slice %249 {offsets = [0, 0], sizes = [8, 32], strides = [1, 1]} : vector<8x128xf32> to vector<8x32xf32>
    %251 = vector.extract_strided_slice %249 {offsets = [0, 32], sizes = [8, 32], strides = [1, 1]} : vector<8x128xf32> to vector<8x32xf32>
    %252 = vector.extract_strided_slice %249 {offsets = [0, 64], sizes = [8, 32], strides = [1, 1]} : vector<8x128xf32> to vector<8x32xf32>
    %253 = vector.extract_strided_slice %249 {offsets = [0, 96], sizes = [8, 32], strides = [1, 1]} : vector<8x128xf32> to vector<8x32xf32>
    %254 = vector.shape_cast %250 : vector<8x32xf32> to vector<1x8x32xf32>
    %255 = vector.shape_cast %251 : vector<8x32xf32> to vector<1x8x32xf32>
    %256 = vector.shape_cast %252 : vector<8x32xf32> to vector<1x8x32xf32>
    %257 = vector.shape_cast %253 : vector<8x32xf32> to vector<1x8x32xf32>
    %258 = tpu.concatenate %254, %255, %256, %257 in 0 : vector<1x8x32xf32>, vector<1x8x32xf32>, vector<1x8x32xf32>, vector<1x8x32xf32> -> vector<4x8x32xf32>
    %259 = vector.extract_strided_slice %196 {offsets = [8, 0], sizes = [8, 128], strides = [1, 1]} : vector<16x128xf32> to vector<8x128xf32>
    %260 = vector.extract_strided_slice %259 {offsets = [0, 0], sizes = [8, 32], strides = [1, 1]} : vector<8x128xf32> to vector<8x32xf32>
    %261 = vector.extract_strided_slice %259 {offsets = [0, 32], sizes = [8, 32], strides = [1, 1]} : vector<8x128xf32> to vector<8x32xf32>
    %262 = vector.extract_strided_slice %259 {offsets = [0, 64], sizes = [8, 32], strides = [1, 1]} : vector<8x128xf32> to vector<8x32xf32>
    %263 = vector.extract_strided_slice %259 {offsets = [0, 96], sizes = [8, 32], strides = [1, 1]} : vector<8x128xf32> to vector<8x32xf32>
    %264 = vector.shape_cast %260 : vector<8x32xf32> to vector<1x8x32xf32>
    %265 = vector.shape_cast %261 : vector<8x32xf32> to vector<1x8x32xf32>
    %266 = vector.shape_cast %262 : vector<8x32xf32> to vector<1x8x32xf32>
    %267 = vector.shape_cast %263 : vector<8x32xf32> to vector<1x8x32xf32>
    %268 = tpu.concatenate %264, %265, %266, %267 in 0 : vector<1x8x32xf32>, vector<1x8x32xf32>, vector<1x8x32xf32>, vector<1x8x32xf32> -> vector<4x8x32xf32>
    %269 = vector.extract_strided_slice %197 {offsets = [8, 0], sizes = [8, 128], strides = [1, 1]} : vector<16x128xf32> to vector<8x128xf32>
    %270 = vector.extract_strided_slice %269 {offsets = [0, 0], sizes = [8, 32], strides = [1, 1]} : vector<8x128xf32> to vector<8x32xf32>
    %271 = vector.extract_strided_slice %269 {offsets = [0, 32], sizes = [8, 32], strides = [1, 1]} : vector<8x128xf32> to vector<8x32xf32>
    %272 = vector.extract_strided_slice %269 {offsets = [0, 64], sizes = [8, 32], strides = [1, 1]} : vector<8x128xf32> to vector<8x32xf32>
    %273 = vector.extract_strided_slice %269 {offsets = [0, 96], sizes = [8, 32], strides = [1, 1]} : vector<8x128xf32> to vector<8x32xf32>
    %274 = vector.shape_cast %270 : vector<8x32xf32> to vector<1x8x32xf32>
    %275 = vector.shape_cast %271 : vector<8x32xf32> to vector<1x8x32xf32>
    %276 = vector.shape_cast %272 : vector<8x32xf32> to vector<1x8x32xf32>
    %277 = vector.shape_cast %273 : vector<8x32xf32> to vector<1x8x32xf32>
    %278 = tpu.concatenate %274, %275, %276, %277 in 0 : vector<1x8x32xf32>, vector<1x8x32xf32>, vector<1x8x32xf32>, vector<1x8x32xf32> -> vector<4x8x32xf32>
    "tpu.trace_start"() <{level = 10 : i32, message = "hqd,hkd->hqk"}> : () -> ()
    %cst_57 = arith.constant dense<0.000000e+00> : vector<4x8x8xf32>
    %279 = tpu.matmul %258, %268, %cst_57 {dimension_numbers = #tpu.dot_dimension_numbers<[2], [2], [1], [1], [0, 0, 0, 1, 1, 1], [0], [0]>} : vector<4x8x32xf32>, vector<4x8x32xf32>, vector<4x8x8xf32> -> vector<4x8x8xf32>
    "tpu.trace_stop"() : () -> ()
    %280 = arith.addf %279, %20 : vector<4x8x8xf32>
    %cst_58 = arith.constant dense<0xFF800000> : vector<4x8xf32>
    %281 = vector.multi_reduction <maximumf>, %280, %cst_58 [2] : vector<4x8x8xf32> to vector<4x8xf32>
    %282 = vector.shape_cast %281 : vector<4x8xf32> to vector<4x8x1xf32>
    %283 = vector.broadcast %282 : vector<4x8x1xf32> to vector<4x8x8xf32>
    %284 = arith.subf %280, %283 : vector<4x8x8xf32>
    %285 = math.exp %284 : vector<4x8x8xf32>
    %cst_59 = arith.constant dense<0.000000e+00> : vector<4x8xf32>
    %286 = vector.multi_reduction <add>, %285, %cst_59 [2] : vector<4x8x8xf32> to vector<4x8xf32>
    %287 = vector.shape_cast %286 : vector<4x8xf32> to vector<4x8x1xf32>
    %288 = vector.broadcast %287 : vector<4x8x1xf32> to vector<4x8x8xf32>
    %289 = arith.divf %285, %288 : vector<4x8x8xf32>
    "tpu.trace_start"() <{level = 10 : i32, message = "hqk,hkd->hqd"}> : () -> ()
    %cst_60 = arith.constant dense<0.000000e+00> : vector<4x8x32xf32>
    %290 = tpu.matmul %289, %278, %cst_60 {dimension_numbers = #tpu.dot_dimension_numbers<[2], [1], [1], [2], [0, 0, 0, 1, 1, 2], [0], [0]>} : vector<4x8x8xf32>, vector<4x8x32xf32>, vector<4x8x32xf32> -> vector<4x8x32xf32>
    "tpu.trace_stop"() : () -> ()
    %291 = vector.extract_strided_slice %290 {offsets = [0, 0, 0], sizes = [1, 8, 32], strides = [1, 1, 1]} : vector<4x8x32xf32> to vector<1x8x32xf32>
    %292 = vector.shape_cast %291 : vector<1x8x32xf32> to vector<8x32xf32>
    %293 = vector.extract_strided_slice %290 {offsets = [1, 0, 0], sizes = [1, 8, 32], strides = [1, 1, 1]} : vector<4x8x32xf32> to vector<1x8x32xf32>
    %294 = vector.shape_cast %293 : vector<1x8x32xf32> to vector<8x32xf32>
    %295 = vector.extract_strided_slice %290 {offsets = [2, 0, 0], sizes = [1, 8, 32], strides = [1, 1, 1]} : vector<4x8x32xf32> to vector<1x8x32xf32>
    %296 = vector.shape_cast %295 : vector<1x8x32xf32> to vector<8x32xf32>
    %297 = vector.extract_strided_slice %290 {offsets = [3, 0, 0], sizes = [1, 8, 32], strides = [1, 1, 1]} : vector<4x8x32xf32> to vector<1x8x32xf32>
    %298 = vector.shape_cast %297 : vector<1x8x32xf32> to vector<8x32xf32>
    %299 = tpu.concatenate %292, %294, %296, %298 in 1 : vector<8x32xf32>, vector<8x32xf32>, vector<8x32xf32>, vector<8x32xf32> -> vector<8x128xf32>
    %300 = tpu.concatenate %248, %299 in 0 : vector<8x128xf32>, vector<8x128xf32> -> vector<16x128xf32>
    %cst_61 = arith.constant dense<0.000000e+00> : vector<16x128xf32>
    %301 = tpu.matmul %300, %2, %cst_61 {dimension_numbers = #tpu.dot_dimension_numbers<[1], [0], [0], [1], [0, 0, 1, 1], [], []>} : vector<16x128xf32>, vector<128x128xf32>, vector<16x128xf32> -> vector<16x128xf32>
    %302 = vector.broadcast %3 : vector<1x128xf32> to vector<16x128xf32>
    %303 = arith.addf %301, %302 : vector<16x128xf32>
    %304 = arith.addf %189, %303 : vector<16x128xf32>
    %cst_62 = arith.constant dense<0.000000e+00> : vector<16xf32>
    %305 = vector.multi_reduction <add>, %304, %cst_62 [1] : vector<16x128xf32> to vector<16xf32>
    %306 = vector.shape_cast %305 : vector<16xf32> to vector<16x1xf32>
    %cst_63 = arith.constant 1.280000e+02 : f32
    %307 = vector.broadcast %cst_63 : f32 to vector<16x1xf32>
    %308 = arith.divf %306, %307 : vector<16x1xf32>
    %309 = vector.broadcast %308 : vector<16x1xf32> to vector<16x128xf32>
    %310 = arith.subf %304, %309 : vector<16x128xf32>
    %311 = arith.mulf %310, %310 : vector<16x128xf32>
    %cst_64 = arith.constant dense<0.000000e+00> : vector<16xf32>
    %312 = vector.multi_reduction <add>, %311, %cst_64 [1] : vector<16x128xf32> to vector<16xf32>
    %313 = vector.shape_cast %312 : vector<16xf32> to vector<16x1xf32>
    %cst_65 = arith.constant 1.280000e+02 : f32
    %314 = vector.broadcast %cst_65 : f32 to vector<16x1xf32>
    %315 = arith.divf %313, %314 : vector<16x1xf32>
    %316 = vector.broadcast %308 : vector<16x1xf32> to vector<16x128xf32>
    %317 = arith.subf %304, %316 : vector<16x128xf32>
    %cst_66 = arith.constant 9.99999974E-6 : f32
    %318 = vector.broadcast %cst_66 : f32 to vector<16x1xf32>
    %319 = arith.addf %315, %318 : vector<16x1xf32>
    %320 = math.rsqrt %319 : vector<16x1xf32>
    %321 = vector.broadcast %320 : vector<16x1xf32> to vector<16x128xf32>
    %322 = arith.mulf %317, %321 : vector<16x128xf32>
    %323 = vector.broadcast %4 : vector<1x128xf32> to vector<16x128xf32>
    %324 = arith.mulf %322, %323 : vector<16x128xf32>
    %325 = vector.broadcast %5 : vector<1x128xf32> to vector<16x128xf32>
    %326 = arith.addf %324, %325 : vector<16x128xf32>
    %cst_67 = arith.constant dense<0.000000e+00> : vector<16x256xf32>
    %327 = tpu.matmul %326, %6, %cst_67 {dimension_numbers = #tpu.dot_dimension_numbers<[1], [0], [0], [1], [0, 0, 1, 1], [], []>} : vector<16x128xf32>, vector<128x256xf32>, vector<16x256xf32> -> vector<16x256xf32>
    %328 = vector.broadcast %7 : vector<1x256xf32> to vector<16x256xf32>
    %329 = arith.addf %327, %328 : vector<16x256xf32>
    %cst_68 = arith.constant 0.000000e+00 : f32
    %330 = vector.broadcast %cst_68 : f32 to vector<16x256xf32>
    %331 = arith.maximumf %329, %330 : vector<16x256xf32>
    %cst_69 = arith.constant dense<0.000000e+00> : vector<16x128xf32>
    %332 = tpu.matmul %331, %8, %cst_69 {dimension_numbers = #tpu.dot_dimension_numbers<[1], [0], [0], [1], [0, 0, 1, 1], [], []>} : vector<16x256xf32>, vector<256x128xf32>, vector<16x128xf32> -> vector<16x128xf32>
    %333 = vector.broadcast %9 : vector<1x128xf32> to vector<16x128xf32>
    %334 = arith.addf %332, %333 : vector<16x128xf32>
    %335 = arith.addf %326, %334 : vector<16x128xf32>
    %cst_70 = arith.constant dense<0.000000e+00> : vector<16xf32>
    %336 = vector.multi_reduction <add>, %335, %cst_70 [1] : vector<16x128xf32> to vector<16xf32>
    %337 = vector.shape_cast %336 : vector<16xf32> to vector<16x1xf32>
    %cst_71 = arith.constant 1.280000e+02 : f32
    %338 = vector.broadcast %cst_71 : f32 to vector<16x1xf32>
    %339 = arith.divf %337, %338 : vector<16x1xf32>
    %340 = vector.broadcast %339 : vector<16x1xf32> to vector<16x128xf32>
    %341 = arith.subf %335, %340 : vector<16x128xf32>
    %342 = arith.mulf %341, %341 : vector<16x128xf32>
    %cst_72 = arith.constant dense<0.000000e+00> : vector<16xf32>
    %343 = vector.multi_reduction <add>, %342, %cst_72 [1] : vector<16x128xf32> to vector<16xf32>
    %344 = vector.shape_cast %343 : vector<16xf32> to vector<16x1xf32>
    %cst_73 = arith.constant 1.280000e+02 : f32
    %345 = vector.broadcast %cst_73 : f32 to vector<16x1xf32>
    %346 = arith.divf %344, %345 : vector<16x1xf32>
    %347 = vector.broadcast %339 : vector<16x1xf32> to vector<16x128xf32>
    %348 = arith.subf %335, %347 : vector<16x128xf32>
    %cst_74 = arith.constant 9.99999974E-6 : f32
    %349 = vector.broadcast %cst_74 : f32 to vector<16x1xf32>
    %350 = arith.addf %346, %349 : vector<16x1xf32>
    %351 = math.rsqrt %350 : vector<16x1xf32>
    %352 = vector.broadcast %351 : vector<16x1xf32> to vector<16x128xf32>
    %353 = arith.mulf %348, %352 : vector<16x128xf32>
    %354 = vector.broadcast %10 : vector<1x128xf32> to vector<16x128xf32>
    %355 = arith.mulf %353, %354 : vector<16x128xf32>
    %356 = vector.broadcast %11 : vector<1x128xf32> to vector<16x128xf32>
    %357 = arith.addf %355, %356 : vector<16x128xf32>
    %c0_75 = arith.constant 0 : index
    %c0_76 = arith.constant 0 : index
    %358 = vector.load %arg15[%c0_75, %c0_76] : memref<16x128xf32, #tpu.memory_space<vmem>>, vector<16x128xf32>
    tpu.vector_store %arg15[%c0_75, %c0_76], %357 {strides = array<i32>} : memref<16x128xf32, #tpu.memory_space<vmem>>, vector<16x128xf32>,
    return
  }
  func.func @transform_0(%arg0: i32) -> (i32, i32) {
    %c0_i32 = arith.constant 0 : i32
    %c0_i32_0 = arith.constant 0 : i32
    return %arg0, %c0_i32 : i32, i32
  }
  func.func @transform_1(%arg0: i32) -> (i32, i32, i32) {
    %c0_i32 = arith.constant 0 : i32
    %c0_i32_0 = arith.constant 0 : i32
    %c0_i32_1 = arith.constant 0 : i32
    return %arg0, %c0_i32, %c0_i32_0 : i32, i32, i32
  }
  func.func @transform_2(%arg0: i32) -> (i32, i32) {
    %c0_i32 = arith.constant 0 : i32
    %c0_i32_0 = arith.constant 0 : i32
    %c0_i32_1 = arith.constant 0 : i32
    return %c0_i32, %c0_i32_0 : i32, i32
  }
  func.func @transform_3(%arg0: i32) -> (i32, i32) {
    %c0_i32 = arith.constant 0 : i32
    %c0_i32_0 = arith.constant 0 : i32
    %c0_i32_1 = arith.constant 0 : i32
    return %c0_i32, %c0_i32_0 : i32, i32
  }
  func.func @transform_4(%arg0: i32) -> (i32, i32) {
    %c0_i32 = arith.constant 0 : i32
    %c0_i32_0 = arith.constant 0 : i32
    %c0_i32_1 = arith.constant 0 : i32
    return %c0_i32, %c0_i32_0 : i32, i32
  }
  func.func @transform_5(%arg0: i32) -> (i32, i32) {
    %c0_i32 = arith.constant 0 : i32
    %c0_i32_0 = arith.constant 0 : i32
    %c0_i32_1 = arith.constant 0 : i32
    return %c0_i32, %c0_i32_0 : i32, i32
  }
  func.func @transform_6(%arg0: i32) -> (i32, i32) {
    %c0_i32 = arith.constant 0 : i32
    %c0_i32_0 = arith.constant 0 : i32
    %c0_i32_1 = arith.constant 0 : i32
    return %c0_i32, %c0_i32_0 : i32, i32
  }
  func.func @transform_7(%arg0: i32) -> (i32, i32) {
    %c0_i32 = arith.constant 0 : i32
    %c0_i32_0 = arith.constant 0 : i32
    %c0_i32_1 = arith.constant 0 : i32
    return %c0_i32, %c0_i32_0 : i32, i32
  }
  func.func @transform_8(%arg0: i32) -> (i32, i32) {
    %c0_i32 = arith.constant 0 : i32
    %c0_i32_0 = arith.constant 0 : i32
    %c0_i32_1 = arith.constant 0 : i32
    return %c0_i32, %c0_i32_0 : i32, i32
  }
  func.func @transform_9(%arg0: i32) -> (i32, i32) {
    %c0_i32 = arith.constant 0 : i32
    %c0_i32_0 = arith.constant 0 : i32
    %c0_i32_1 = arith.constant 0 : i32
    return %c0_i32, %c0_i32_0 : i32, i32
  }
  func.func @transform_10(%arg0: i32) -> (i32, i32) {
    %c0_i32 = arith.constant 0 : i32
    %c0_i32_0 = arith.constant 0 : i32
    %c0_i32_1 = arith.constant 0 : i32
    return %c0_i32, %c0_i32_0 : i32, i32
  }
  func.func @transform_11(%arg0: i32) -> (i32, i32) {
    %c0_i32 = arith.constant 0 : i32
    %c0_i32_0 = arith.constant 0 : i32
    %c0_i32_1 = arith.constant 0 : i32
    return %c0_i32, %c0_i32_0 : i32, i32
  }
  func.func @transform_12(%arg0: i32) -> (i32, i32) {
    %c0_i32 = arith.constant 0 : i32
    %c0_i32_0 = arith.constant 0 : i32
    %c0_i32_1 = arith.constant 0 : i32
    return %c0_i32, %c0_i32_0 : i32, i32
  }
  func.func @transform_13(%arg0: i32) -> (i32, i32) {
    %c0_i32 = arith.constant 0 : i32
    %c0_i32_0 = arith.constant 0 : i32
    %c0_i32_1 = arith.constant 0 : i32
    return %c0_i32, %c0_i32_0 : i32, i32
  }
  func.func @transform_14(%arg0: i32) -> (i32, i32) {
    %c0_i32 = arith.constant 0 : i32
    %c0_i32_0 = arith.constant 0 : i32
    return %arg0, %c0_i32 : i32, i32
  }
}

</mosaic_0001>

<bundles_post_ra>
// kernel: tpu_custom_call.1
= control target key start
LH: loop header
LB: loop body
LE: loop exit
PB: predicated region body
PF: predicated region fallthrough
CT: control target
= control target key end

     0   :  { %19 = vsyncpa [#allocation3], 0  ;;  %s6381_s0 = inlined_call_operand.hbm [shape: f32[16,128], index: 0, kind: input, shape index: {}]   ;;  %s6382_s1 = inlined_call_operand.hbm [shape: f32[2,1,8], index: 1, kind: input, shape index: {}]   ;;  %s6383_s2 = inlined_call_operand.hbm [shape: f32[128,384], index: 2, kind: input, shape index: {}]   ;;  %s6384_s3 = inlined_call_operand.hbm [shape: f32[1,384], index: 3, kind: input, shape index: {}]   ;;  %s6385_s4 = inlined_call_operand.hbm [shape: f32[128,128], index: 4, kind: input, shape index: {}]   ;;  %s6386_s5 = inlined_call_operand.hbm [shape: f32[1,128], index: 5, kind: input, shape index: {}]   ;;  %s6387_s6 = inlined_call_operand.hbm [shape: f32[1,128], index: 6, kind: input, shape index: {}]   ;;  %s6388_s7 = inlined_call_operand.hbm [shape: f32[1,128], index: 7, kind: input, shape index: {}]   ;;  %s6389_s8 = inlined_call_operand.hbm [shape: f32[128,256], index: 8, kind: input, shape index: {}]   ;;  %s6390_s9 = inlined_call_operand.hbm [shape: f32[1,256], index: 9, kind: input, shape index: {}]   ;;  %s6391_s10 = inlined_call_operand.hbm [shape: f32[256,128], index: 10, kind: input, shape index: {}]   ;;  %s6392_s11 = inlined_call_operand.hbm [shape: f32[1,128], index: 11, kind: input, shape index: {}]   ;;  %s6393_s12 = inlined_call_operand.hbm [shape: f32[1,128], index: 12, kind: input, shape index: {}]   ;;  %s6394_s13 = inlined_call_operand.hbm [shape: f32[1,128], index: 13, kind: input, shape index: {}]   ;;  %s6395_s14 = inlined_call_operand.hbm [shape: f32[16,128], index: 14, kind: output, shape index: {}]  }
   0x1   :  { %20 = vsyncpa [#allocation6], 0 }
   0x2   :  { %21 = vsyncpa [#allocation9], 0 }
   0x3   :  { %22 = vsyncpa [#allocation12], 0 }
   0x4   :  { %23 = vsyncpa [#allocation15], 0 }
   0x5   :  { %24 = vsyncpa [#allocation18], 0 }
   0x6   :  { %25 = vsyncpa [#allocation21], 0 }
   0x7   :  { %26 = vsyncpa [#allocation24], 0 }
   0x8   :  { %27 = vsyncpa [#allocation4], 0  ;;  %s5412_s29 = smov [#allocation5]   ;;  %s5064_s17 = scalar_lea.hbm %s6382_s1, 32 }
   0x9   :  { %s45_s30 = sshll.u32 %s5412_s29, 4  ;;  %p5065_p0 = scmp.ne.s32.totalorder %s6382_s1, %s5064_s17  ;;  %s46_s30 = int_to_ptr.vmem [resolvable:$true] %s45_s30 }
   0xa   :  { %p5068_p1 = scmp.lt.u32.totalorder %s5064_s17, %s6382_s1 }
   0xc   :  { %p5070_p2 = pnand %p5068_p1, %p5065_p0 }
   0xe   :  { %5073 = shalt.err (!%p5070_p2)
}
   0xf   :  { %s5074_s22 = scalar_lea.vmem %s46_s30, 32  ;;  %p5079_p4 = scmp.lt.s32.totalorder %s46_s30, %s46_s30 }
  0x10   :  { %p5075_p3 = scmp.ne.s32.totalorder %s46_s30, %s5074_s22  ;;  %p5080_p5 = scmp.lt.s32.totalorder %s5074_s22, %s5074_s22 }
  0x12   :  { %p5081_p6 = por %p5080_p5, %p5079_p4 }
  0x14   :  { %p5082_p7 = pnand %p5081_p6, %p5075_p3 }
  0x16   :  { %5085 = shalt.err (!%p5082_p7)
}
  0x17   :  { %s5413_s23 = smov 16   ;;  %s5414_s24 = smov 1  }
  0x18   :  { %51 = dma.hbm_to_vmem [thread:$0]  %s6382_s1, 32, %s46_s30, [#allocation6], %s5413_s23, %s5413_s23, %s5414_s24  }
  0x19   :  { %s5415_s27 = smov [#allocation8]   ;;  %s5416_s29 = smov [#allocation11]  }
  0x1a   :  { %s70_s28 = sshll.u32 %s5415_s27, 4  ;;  %s92_s15 = sshll.u32 %s5416_s29, 4  ;;  %s71_s28 = int_to_ptr.vmem [resolvable:$true] %s70_s28  ;;  %s93_s15 = int_to_ptr.vmem [resolvable:$true] %s92_s15 }
  0x1b   :  { %s5086_s18 = scalar_lea.hbm %s6384_s3, 48 }
  0x1c   :  { %p5087_p8 = scmp.ne.s32.totalorder %s6384_s3, %s5086_s18  ;;  %p5090_p9 = scmp.lt.u32.totalorder %s5086_s18, %s6384_s3 }
  0x1e   :  { %p5092_p10 = pnand %p5090_p9, %p5087_p8 }
  0x20   :  { %5095 = shalt.err (!%p5092_p10)
}
  0x21   :  { %s5096_s1 = scalar_lea.vmem %s71_s28, 48  ;;  %s5100_s30 = scalar_lea.vmem %s71_s28, 64 }
  0x22   :  { %p5097_p11 = scmp.ne.s32.totalorder %s71_s28, %s5096_s1  ;;  %p5101_p12 = scmp.lt.s32.totalorder %s71_s28, %s71_s28 }
  0x23   :  { %p5102_p13 = scmp.lt.s32.totalorder %s5100_s30, %s5096_s1 }
  0x25   :  { %p5103_p0 = por %p5102_p13, %p5101_p12 }
  0x27   :  { %p5104_p1 = pnand %p5103_p0, %p5097_p11 }
  0x29   :  { %5107 = shalt.err (!%p5104_p1)
}
  0x2a   :  { %73 = dma.hbm_to_vmem [thread:$0]  %s6384_s3, 48, %s71_s28, [#allocation9]  }
  0x2b   :  { %s5108_s29 = scalar_lea.hbm %s6386_s5, 16 }
  0x2c   :  { %p5109_p2 = scmp.ne.s32.totalorder %s6386_s5, %s5108_s29  ;;  %p5112_p3 = scmp.lt.u32.totalorder %s5108_s29, %s6386_s5 }
  0x2e   :  { %p5114_p4 = pnand %p5112_p3, %p5109_p2 }
  0x30   :  { %5117 = shalt.err (!%p5114_p4)
}
  0x31   :  { %s5118_s20 = scalar_lea.vmem %s93_s15, 16  ;;  %s5122_s21 = scalar_lea.vmem %s93_s15, 32 }
  0x32   :  { %p5119_p5 = scmp.ne.s32.totalorder %s93_s15, %s5118_s20  ;;  %p5123_p6 = scmp.lt.s32.totalorder %s93_s15, %s93_s15 }
  0x33   :  { %p5124_p7 = scmp.lt.s32.totalorder %s5122_s21, %s5118_s20 }
  0x35   :  { %p5125_p8 = por %p5124_p7, %p5123_p6 }
  0x37   :  { %p5126_p9 = pnand %p5125_p8, %p5119_p5 }
  0x39   :  { %5129 = shalt.err (!%p5126_p9)
}
  0x3a   :  { %95 = dma.hbm_to_vmem [thread:$0]  %s6386_s5, 16, %s93_s15, [#allocation12]  }
  0x3b   :  { %s5417_s22 = smov [#allocation14]   ;;  %s5418_s30 = smov [#allocation17]  }
  0x3c   :  { %s112_s1 = sshll.u32 %s5417_s22, 4  ;;  %s134_s24 = sshll.u32 %s5418_s30, 4  ;;  %s113_s1 = int_to_ptr.vmem [resolvable:$true] %s112_s1  ;;  %s135_s24 = int_to_ptr.vmem [resolvable:$true] %s134_s24 }
  0x3d   :  { %s5130_s27 = scalar_lea.hbm %s6388_s7, 16 }
  0x3e   :  { %p5131_p10 = scmp.ne.s32.totalorder %s6388_s7, %s5130_s27  ;;  %p5134_p11 = scmp.lt.u32.totalorder %s5130_s27, %s6388_s7 }
  0x40   :  { %p5136_p12 = pnand %p5134_p11, %p5131_p10 }
  0x42   :  { %5139 = shalt.err (!%p5136_p12)
}
  0x43   :  { %s5140_s5 = scalar_lea.vmem %s113_s1, 16  ;;  %s5144_s15 = scalar_lea.vmem %s113_s1, 32 }
  0x44   :  { %p5141_p13 = scmp.ne.s32.totalorder %s113_s1, %s5140_s5  ;;  %p5145_p0 = scmp.lt.s32.totalorder %s113_s1, %s113_s1 }
  0x45   :  { %p5146_p1 = scmp.lt.s32.totalorder %s5144_s15, %s5140_s5 }
  0x47   :  { %p5147_p2 = por %p5146_p1, %p5145_p0 }
  0x49   :  { %p5148_p3 = pnand %p5147_p2, %p5141_p13 }
  0x4b   :  { %5151 = shalt.err (!%p5148_p3)
}
  0x4c   :  { %115 = dma.hbm_to_vmem [thread:$0]  %s6388_s7, 16, %s113_s1, [#allocation15]  }
  0x4d   :  { %s5152_s28 = scalar_lea.hbm %s6390_s9, 32 }
  0x4e   :  { %p5153_p4 = scmp.ne.s32.totalorder %s6390_s9, %s5152_s28  ;;  %p5156_p5 = scmp.lt.u32.totalorder %s5152_s28, %s6390_s9 }
  0x50   :  { %p5158_p6 = pnand %p5156_p5, %p5153_p4 }
  0x52   :  { %5161 = shalt.err (!%p5158_p6)
}
  0x53   :  { %s5162_s27 = scalar_lea.vmem %s135_s24, 32  ;;  %p5167_p8 = scmp.lt.s32.totalorder %s135_s24, %s135_s24 }
  0x54   :  { %p5163_p7 = scmp.ne.s32.totalorder %s135_s24, %s5162_s27  ;;  %p5168_p9 = scmp.lt.s32.totalorder %s5162_s27, %s5162_s27 }
  0x56   :  { %p5169_p10 = por %p5168_p9, %p5167_p8 }
  0x58   :  { %p5170_p11 = pnand %p5169_p10, %p5163_p7 }
  0x5a   :  { %5173 = shalt.err (!%p5170_p11)
}
  0x5b   :  { %137 = dma.hbm_to_vmem [thread:$0]  %s6390_s9, 32, %s135_s24, [#allocation18]  }
  0x5c   :  { %s5419_s29 = smov [#allocation20]   ;;  %s5420_s17 = smov [#allocation2]  }
  0x5d   :  { %s156_s16 = sshll.u32 %s5419_s29, 4  ;;  %s33_s18 = sshll.u32 %s5420_s17, 4  ;;  %s157_s16 = int_to_ptr.vmem [resolvable:$true] %s156_s16  ;;  %s34_s18 = int_to_ptr.vmem [resolvable:$true] %s33_s18 }
  0x5e   :  { %s5174_s19 = scalar_lea.hbm %s6392_s11, 16 }
  0x5f   :  { %p5175_p12 = scmp.ne.s32.totalorder %s6392_s11, %s5174_s19  ;;  %p5178_p13 = scmp.lt.u32.totalorder %s5174_s19, %s6392_s11 }
  0x61   :  { %p5180_p0 = pnand %p5178_p13, %p5175_p12 }
  0x63   :  { %5183 = shalt.err (!%p5180_p0)
}
  0x64   :  { %s5184_s9 = scalar_lea.vmem %s157_s16, 16  ;;  %s5188_s24 = scalar_lea.vmem %s157_s16, 32 }
  0x65   :  { %p5185_p1 = scmp.ne.s32.totalorder %s157_s16, %s5184_s9  ;;  %p5189_p2 = scmp.lt.s32.totalorder %s157_s16, %s157_s16 }
  0x66   :  { %p5190_p3 = scmp.lt.s32.totalorder %s5188_s24, %s5184_s9 }
  0x68   :  { %p5191_p4 = por %p5190_p3, %p5189_p2 }
  0x6a   :  { %p5192_p5 = pnand %p5191_p4, %p5185_p1 }
  0x6c   :  { %5195 = shalt.err (!%p5192_p5)
}
  0x6d   :  { %159 = dma.hbm_to_vmem [thread:$0]  %s6392_s11, 16, %s157_s16, [#allocation21]  }
  0x6e   :  { %s5196_s27 = scalar_lea.hbm %s6381_s0, 256 }
  0x6f   :  { %p5197_p6 = scmp.ne.s32.totalorder %s6381_s0, %s5196_s27  ;;  %p5200_p7 = scmp.lt.u32.totalorder %s5196_s27, %s6381_s0 }
  0x71   :  { %p5202_p8 = pnand %p5200_p7, %p5197_p6 }
  0x73   :  { %5205 = shalt.err (!%p5202_p8)
}
  0x74   :  { %s5206_s5 = scalar_lea.vmem %s34_s18, 256  ;;  %p5211_p10 = scmp.lt.s32.totalorder %s34_s18, %s34_s18 }
  0x75   :  { %p5207_p9 = scmp.ne.s32.totalorder %s34_s18, %s5206_s5  ;;  %p5212_p11 = scmp.lt.s32.totalorder %s5206_s5, %s5206_s5 }
  0x77   :  { %p5213_p12 = por %p5212_p11, %p5211_p10 }
  0x79   :  { %p5214_p13 = pnand %p5213_p12, %p5207_p9 }
  0x7b   :  { %5217 = shalt.err (!%p5214_p13)
}
  0x7c   :  { %s5421_s11 = smov 128   ;;  %s5422_s16 = smov 8  }
  0x7d   :  { %39 = dma.hbm_to_vmem [thread:$0]  %s6381_s0, 256, %s34_s18, [#allocation3], %s5421_s11, %s5421_s11, %s5422_s16  }
  0x7e   :  { %s5423_s20 = smov [#allocation7]   ;;  %s5218_s9 = scalar_lea.hbm %s6383_s2, 6144 }
  0x7f   :  { %s57_s21 = sshll.u32 %s5423_s20, 4  ;;  %p5219_p0 = scmp.ne.s32.totalorder %s6383_s2, %s5218_s9  ;;  %s58_s21 = int_to_ptr.vmem [resolvable:$true] %s57_s21 }
  0x80   :  { %p5222_p1 = scmp.lt.u32.totalorder %s5218_s9, %s6383_s2 }
  0x82   :  { %p5224_p2 = pnand %p5222_p1, %p5219_p0 }
  0x84   :  { %5227 = shalt.err (!%p5224_p2)
}
  0x85   :  { %s5228_s26 = scalar_lea.vmem %s58_s21, 6144  ;;  %p5233_p4 = scmp.lt.s32.totalorder %s58_s21, %s58_s21 }
  0x86   :  { %p5229_p3 = scmp.ne.s32.totalorder %s58_s21, %s5228_s26  ;;  %p5234_p5 = scmp.lt.s32.totalorder %s5228_s26, %s5228_s26 }
  0x88   :  { %p5235_p6 = por %p5234_p5, %p5233_p4 }
  0x8a   :  { %p5236_p7 = pnand %p5235_p6, %p5229_p3 }
  0x8c   :  { %5239 = shalt.err (!%p5236_p7)
}
  0x8d   :  { %s5424_s0 = smov 384   ;;  %s5425_s18 = smov 24  }
  0x8e   :  { %63 = dma.hbm_to_vmem [thread:$0]  %s6383_s2, 6144, %s58_s21, [#allocation6], %s5424_s0, %s5424_s0, %s5425_s18  }
  0x8f   :  { %s5426_s1 = smov [#allocation10]   ;;  %s5427_s17 = smov [#allocation13]  }
  0x90   :  { %s79_s29 = sshll.u32 %s5426_s1, 4  ;;  %s102_s5 = sshll.u32 %s5427_s17, 4  ;;  %s80_s29 = int_to_ptr.vmem [resolvable:$true] %s79_s29  ;;  %s103_s5 = int_to_ptr.vmem [resolvable:$true] %s102_s5 }
  0x91   :  { %s5240_s20 = scalar_lea.hbm %s6385_s4, 2048 }
  0x92   :  { %p5241_p8 = scmp.ne.s32.totalorder %s6385_s4, %s5240_s20  ;;  %p5244_p9 = scmp.lt.u32.totalorder %s5240_s20, %s6385_s4 }
  0x94   :  { %p5246_p10 = pnand %p5244_p9, %p5241_p8 }
  0x96   :  { %5249 = shalt.err (!%p5246_p10)
}
  0x97   :  { %s5250_s2 = scalar_lea.vmem %s80_s29, 2048  ;;  %p5255_p12 = scmp.lt.s32.totalorder %s80_s29, %s80_s29 }
  0x98   :  { %p5251_p11 = scmp.ne.s32.totalorder %s80_s29, %s5250_s2  ;;  %p5256_p13 = scmp.lt.s32.totalorder %s5250_s2, %s5250_s2 }
  0x9a   :  { %p5257_p0 = por %p5256_p13, %p5255_p12 }
  0x9c   :  { %p5258_p1 = pnand %p5257_p0, %p5251_p11 }
  0x9e   :  { %5261 = shalt.err (!%p5258_p1)
}
  0x9f   :  { %85 = dma.hbm_to_vmem [thread:$0]  %s6385_s4, 2048, %s80_s29, [#allocation9], %s5421_s11, %s5421_s11, %s5422_s16  }
  0xa0   :  { %s5262_s26 = scalar_lea.hbm %s6387_s6, 16 }
  0xa1   :  { %p5263_p2 = scmp.ne.s32.totalorder %s6387_s6, %s5262_s26  ;;  %p5266_p3 = scmp.lt.u32.totalorder %s5262_s26, %s6387_s6 }
  0xa3   :  { %p5268_p4 = pnand %p5266_p3, %p5263_p2 }
  0xa5   :  { %5271 = shalt.err (!%p5268_p4)
}
  0xa6   :  { %s5272_s1 = scalar_lea.vmem %s103_s5, 16  ;;  %s5276_s17 = scalar_lea.vmem %s103_s5, 32 }
  0xa7   :  { %p5273_p5 = scmp.ne.s32.totalorder %s103_s5, %s5272_s1  ;;  %p5277_p6 = scmp.lt.s32.totalorder %s103_s5, %s103_s5 }
  0xa8   :  { %p5278_p7 = scmp.lt.s32.totalorder %s5276_s17, %s5272_s1 }
  0xaa   :  { %p5279_p8 = por %p5278_p7, %p5277_p6 }
  0xac   :  { %p5280_p9 = pnand %p5279_p8, %p5273_p5 }
  0xae   :  { %5283 = shalt.err (!%p5280_p9)
}
  0xaf   :  { %105 = dma.hbm_to_vmem [thread:$0]  %s6387_s6, 16, %s103_s5, [#allocation12]  }
  0xb0   :  { %s5428_s15 = smov [#allocation16]   ;;  %s5429_s20 = smov [#allocation19]  }
  0xb1   :  { %s121_s19 = sshll.u32 %s5428_s15, 4  ;;  %s143_s3 = sshll.u32 %s5429_s20, 4  ;;  %s122_s19 = int_to_ptr.vmem [resolvable:$true] %s121_s19  ;;  %s144_s3 = int_to_ptr.vmem [resolvable:$true] %s143_s3 }
  0xb2   :  { %s5284_s24 = scalar_lea.hbm %s6389_s8, 4096 }
  0xb3   :  { %p5285_p10 = scmp.ne.s32.totalorder %s6389_s8, %s5284_s24  ;;  %p5288_p11 = scmp.lt.u32.totalorder %s5284_s24, %s6389_s8 }
  0xb5   :  { %p5290_p12 = pnand %p5288_p11, %p5285_p10 }
  0xb7   :  { %5293 = shalt.err (!%p5290_p12)
}
  0xb8   :  { %s5294_s6 = scalar_lea.vmem %s122_s19, 4096  ;;  %p5299_p0 = scmp.lt.s32.totalorder %s122_s19, %s122_s19 }
  0xb9   :  { %p5295_p13 = scmp.ne.s32.totalorder %s122_s19, %s5294_s6  ;;  %p5300_p1 = scmp.lt.s32.totalorder %s5294_s6, %s5294_s6 }
  0xbb   :  { %p5301_p2 = por %p5300_p1, %p5299_p0 }
  0xbd   :  { %p5302_p3 = pnand %p5301_p2, %p5295_p13 }
  0xbf   :  { %5305 = shalt.err (!%p5302_p3)
}
  0xc0   :  { %s5430_s5 = smov 256   ;;  %s5306_s27 = scalar_lea.hbm %s6391_s10, 4096 }
  0xc1   :  { %127 = dma.hbm_to_vmem [thread:$0]  %s6389_s8, 4096, %s122_s19, [#allocation15], %s5430_s5, %s5430_s5, %s5413_s23  }
  0xc2   :  { %p5307_p4 = scmp.ne.s32.totalorder %s6391_s10, %s5306_s27  ;;  %p5310_p5 = scmp.lt.u32.totalorder %s5306_s27, %s6391_s10 }
  0xc4   :  { %p5312_p6 = pnand %p5310_p5, %p5307_p4 }
  0xc6   :  { %5315 = shalt.err (!%p5312_p6)
}
  0xc7   :  { %s5316_s29 = scalar_lea.vmem %s144_s3, 4096  ;;  %p5321_p8 = scmp.lt.s32.totalorder %s144_s3, %s144_s3 }
  0xc8   :  { %p5317_p7 = scmp.ne.s32.totalorder %s144_s3, %s5316_s29  ;;  %p5322_p9 = scmp.lt.s32.totalorder %s5316_s29, %s5316_s29 }
  0xca   :  { %p5323_p10 = por %p5322_p9, %p5321_p8 }
  0xcc   :  { %p5324_p11 = pnand %p5323_p10, %p5317_p7 }
  0xce   :  { %5327 = shalt.err (!%p5324_p11)
}
  0xcf   :  { %149 = dma.hbm_to_vmem [thread:$0]  %s6391_s10, 4096, %s144_s3, [#allocation18], %s5421_s11, %s5421_s11, %s5422_s16  }
  0xd0   :  { %s5431_s15 = smov [#allocation22]   ;;  %s5432_s20 = smov [#allocation23]  }
  0xd1   :  { %s166_s19 = sshll.u32 %s5431_s15, 4  ;;  %s176_s28 = sshll.u32 %s5432_s20, 4  ;;  %s167_s19 = int_to_ptr.vmem [resolvable:$true] %s166_s19  ;;  %s177_s28 = int_to_ptr.vmem [resolvable:$true] %s176_s28 }
  0xd2   :  { %s5328_s2 = scalar_lea.hbm %s6393_s12, 16 }
  0xd3   :  { %p5329_p12 = scmp.ne.s32.totalorder %s6393_s12, %s5328_s2  ;;  %p5332_p13 = scmp.lt.u32.totalorder %s5328_s2, %s6393_s12 }
  0xd5   :  { %p5334_p0 = pnand %p5332_p13, %p5329_p12 }
  0xd7   :  { %5337 = shalt.err (!%p5334_p0)
}
  0xd8   :  { %s5338_s10 = scalar_lea.vmem %s167_s19, 16  ;;  %s5342_s3 = scalar_lea.vmem %s167_s19, 32 }
  0xd9   :  { %p5339_p1 = scmp.ne.s32.totalorder %s167_s19, %s5338_s10  ;;  %p5343_p2 = scmp.lt.s32.totalorder %s167_s19, %s167_s19 }
  0xda   :  { %p5344_p3 = scmp.lt.s32.totalorder %s5342_s3, %s5338_s10 }
  0xdc   :  { %p5345_p4 = por %p5344_p3, %p5343_p2 }
  0xde   :  { %p5346_p5 = pnand %p5345_p4, %p5339_p1 }
  0xe0   :  { %5349 = shalt.err (!%p5346_p5)
}
  0xe1   :  { %169 = dma.hbm_to_vmem [thread:$0]  %s6393_s12, 16, %s167_s19, [#allocation21]  }
  0xe2   :  { %s5350_s18 = scalar_lea.hbm %s6394_s13, 16 }
  0xe3   :  { %p5351_p6 = scmp.ne.s32.totalorder %s6394_s13, %s5350_s18  ;;  %p5354_p7 = scmp.lt.u32.totalorder %s5350_s18, %s6394_s13 }
  0xe5   :  { %p5356_p8 = pnand %p5354_p7, %p5351_p6 }
  0xe7   :  { %5359 = shalt.err (!%p5356_p8)
}
  0xe8   :  { %s5360_s4 = scalar_lea.vmem %s177_s28, 16  ;;  %s5364_s29 = scalar_lea.vmem %s177_s28, 32 }
  0xe9   :  { %p5361_p9 = scmp.ne.s32.totalorder %s177_s28, %s5360_s4  ;;  %p5365_p10 = scmp.lt.s32.totalorder %s177_s28, %s177_s28 }
  0xea   :  { %p5366_p11 = scmp.lt.s32.totalorder %s5364_s29, %s5360_s4 }
  0xec   :  { %p5367_p12 = por %p5366_p11, %p5365_p10 }
  0xee   :  { %p5368_p13 = pnand %p5367_p12, %p5361_p9 }
  0xf0   :  { %5371 = shalt.err (!%p5368_p13)
}
  0xf1   :  { %179 = dma.hbm_to_vmem [thread:$0]  %s6394_s13, 16, %s177_s28, [#allocation24]  }
  0xf2   :  { %5394 = dma.done.wait [#allocation3], 256  }
  0xf3   :  { %5395 = vsyncadd [#allocation3], 4294967040 }
  0xf4   :  { %5396 = dma.done.wait [#allocation6], 6176  }
  0xf5   :  { %5397 = vsyncadd [#allocation6], 4294961120 }
  0xf6   :  { %5398 = dma.done.wait [#allocation9], 2096  }
  0xf7   :  { %5399 = vsyncadd [#allocation9], 4294965200 }
  0xf8   :  { %5400 = dma.done.wait [#allocation12], 32  }
  0xf9   :  { %5401 = vsyncadd [#allocation12], 4294967264 }
  0xfa   :  { %5402 = dma.done.wait [#allocation15], 4112  }
  0xfb   :  { %5403 = vsyncadd [#allocation15], 4294963184 }
  0xfc   :  { %5404 = dma.done.wait [#allocation18], 4128  }
  0xfd   :  { %5405 = vsyncadd [#allocation18], 4294963168 }
  0xfe   :  { %5406 = dma.done.wait [#allocation21], 32  }
  0xff   :  { %5407 = vsyncadd [#allocation21], 4294967264 }
 0x100   :  { %5408 = dma.done.wait [#allocation24], 16  }
 0x101   :  { %5409 = vsyncadd [#allocation24], 4294967280  ;;  %v6398_v0 = vmov 0.0   ;;  %v223_v1 = vld [vmem:[#allocation7 + $0x8] sm:$0xff]  ;;  %v226_v2 = vld [vmem:[#allocation7 + $0x20] sm:$0xff]  ;;  %vm5434_vm0 = vmmov 0  }
 0x102   :  { %454 = vmatprep.mubr.f32.mxu0 %v6398_v0  ;;  %v222_v3 = vld [vmem:[#allocation7] sm:$0xff]  ;;  %v5695_v4 = vpack.c.bf16 %v226_v2, %v223_v1  ;;  %v225_v5 = vld [vmem:[#allocation7 + $0x18] sm:$0xff]  ;;  %v232_v7 = vld [vmem:[#allocation7 + $0x50] sm:$0xff]  ;;  %vm568_vm1 = vcmask 261120   ;;  %s5435_s13 = smov 64   ;;  %s5436_s23 = smov 96  }
 0x103   :  { %v229_v6 = vld [vmem:[#allocation7 + $0x38] sm:$0xff]  ;;  %v5697_v8 = vpack.c.bf16 %v225_v5, %v222_v3  ;;  %v228_v10 = vld [vmem:[#allocation7 + $0x30] sm:$0xff]  ;;  %v231_v11 = vld [vmem:[#allocation7 + $0x48] sm:$0xff]  ;;  %s5437_s15 = smov 32   ;;  %vm865_vm2 = vcmask 64512   ;;  %vm1215_vm3 = vcmask 523264  }
 0x104   :  { %v5699_v9 = vpack.c.bf16 %v232_v7, %v229_v6  ;;  %v235_v12 = vld [vmem:[#allocation7 + $0x68] sm:$0xff]  ;;  %4603 = vmatprep.subr.bf16.mxu0 %v5695_v4  ;;  %v238_v13 = vld [vmem:[#allocation7 + $0x80] sm:$0xff]  ;;  %v5703_v14 = vpack.c.bf16 %v231_v11, %v228_v10  ;;  %v237_v17 = vld [vmem:[#allocation7 + $0x78] sm:$0xff]  ;;  %vm1217_vm4 = vcmask 785408   ;;  %s5438_s19 = smov [#allocation25]  }
 0x105   :  { %4605 = vmatpush1.bf16.msra.mxu0 %v5697_v8  ;;  %v5706_v15 = vpack.c.bf16 %v238_v13, %v235_v12  ;;  %v234_v16 = vld [vmem:[#allocation7 + $0x60] sm:$0xff]  ;;  %v241_v18 = vld [vmem:[#allocation7 + $0x98] sm:$0xff]  ;;  %v244_v19 = vld [vmem:[#allocation7 + $0xb0] sm:$0xff]  ;;  %s4015_s20 = sshll.u32 %s5438_s19, 4  ;;  %s4016_s20 = int_to_ptr.vmem [resolvable:$true] %s4015_s20 }
 0x106   :  { %4607 = vmatprep.subr.bf16.mxu0 %v5699_v9  ;;  %v5709_v20 = vpack.c.bf16 %v237_v17, %v234_v16  ;;  %v5712_v21 = vpack.c.bf16 %v244_v19, %v241_v18  ;;  %v240_v22 = vld [vmem:[#allocation7 + $0x90] sm:$0xff]  ;;  %v243_v23 = vld [vmem:[#allocation7 + $0xa8] sm:$0xff]  ;;  %v250_v25 = vld [vmem:[#allocation7 + $0xe0] sm:$0xff]  ;;  %v375_v17 = vlaneseq  ;;  %s5372_s28 = scalar_lea.vmem %s4016_s20, 256  ;;  %p5377_p1 = scmp.lt.s32.totalorder %s4016_s20, %s4016_s20 }
 0x107   :  { %v247_v24 = vld [vmem:[#allocation7 + $0xc8] sm:$0xff]  ;;  %v224_v27 = vld [vmem:[#allocation7 + $0x10] sm:$0xff]  ;;  %v230_v29 = vld [vmem:[#allocation7 + $0x40] sm:$0xff]  ;;  %v5718_v30 = vpack.c.bf16 %v243_v23, %v240_v22  ;;  %p5373_p0 = scmp.ne.s32.totalorder %s4016_s20, %s5372_s28  ;;  %p5378_p2 = scmp.lt.s32.totalorder %s5372_s28, %s5372_s28 }
 0x108   :  { %v5714_v26 = vld [vmem:[#allocation2] sm:$0xff]  ;;  %v246_v31 = vld [vmem:[#allocation7 + $0xc0] sm:$0xff]  ;;  %v233_v33 = vld [vmem:[#allocation7 + $0x58] sm:$0xff]  ;;  %v5723_v34 = vpack.c.bf16 %v250_v25, %v247_v24  ;;  %v5790_v18 = vshrl.u32 %v375_v17, 7 }
 0x109   :  { %4609 = vmatpush1.bf16.msra.mxu0 %v5703_v14  ;;  %v227_v28 = vld [vmem:[#allocation7 + $0x28] sm:$0xff]  ;;  %4334 = vmatprep.mubr.f32.mxu1 %v5714_v26  ;;  %v249_v35 = vld [vmem:[#allocation7 + $0xd8] sm:$0xff]  ;;  %v5725_v36 = vpack.c.bf16 %v233_v33, %v230_v29  ;;  %v236_v37 = vld [vmem:[#allocation7 + $0x70] sm:$0xff]  ;;  %p5379_p3 = por %p5378_p2, %p5377_p1 }
 0x10a   :  { %4611 = vmatprep.subr.bf16.mxu0 %v5706_v15  ;;  %v5720_v32 = vpack.c.bf16 %v227_v28, %v224_v27  ;;  %v239_v38 = vld [vmem:[#allocation7 + $0x88] sm:$0xff]  ;;  %v253_v39 = vld [vmem:[#allocation7 + $0xf8] sm:$0xff]  ;;  %v256_v40 = vld [vmem:[#allocation7 + $0x110] sm:$0xff]  ;;  %v5730_v41 = vpack.c.bf16 %v249_v35, %v246_v31  ;;  %v6397_v19 = vsub.s32 0, %v5790_v18  ;;  %v6396_v22 = vsub.s32 1, %v5790_v18 }
 0x10b   :  { %v252_v42 = vld [vmem:[#allocation7 + $0xf0] sm:$0xff]  ;;  %v5733_v43 = vpack.c.bf16 %v239_v38, %v236_v37  ;;  %v5736_v44 = vpack.c.bf16 %v256_v40, %v253_v39  ;;  %v255_v45 = vld [vmem:[#allocation7 + $0x108] sm:$0xff]  ;;  %v242_v46 = vld [vmem:[#allocation7 + $0xa0] sm:$0xff]  ;;  %v385_v40 = vsub.s32 2, %v5790_v18  ;;  %p5380_p4 = pnand %p5379_p3, %p5373_p0 }
 0x10c   :  { %4635 = vmatprep.subr.bf16.mxu1 %v5720_v32  ;;  %v245_v47 = vld [vmem:[#allocation7 + $0xb8] sm:$0xff]  ;;  %v259_v48 = vld [vmem:[#allocation7 + $0x128] sm:$0xff]  ;;  %v262_v49 = vld [vmem:[#allocation7 + $0x140] sm:$0xff]  ;;  %v5740_v50 = vpack.c.bf16 %v255_v45, %v252_v42 }
 0x10d   :  { %4613 = vmatpush1.bf16.msra.mxu0 %v5709_v20  ;;  %4637 = vmatpush3.bf16.msra.mxu1 %v5720_v32  ;;  %v258_v51 = vld [vmem:[#allocation7 + $0x120] sm:$0xff]  ;;  %v5743_v52 = vpack.c.bf16 %v245_v47, %v242_v46  ;;  %v5746_v53 = vpack.c.bf16 %v262_v49, %v259_v48  ;;  %v261_v54 = vld [vmem:[#allocation7 + $0x138] sm:$0xff]  ;;  %v248_v55 = vld [vmem:[#allocation7 + $0xd0] sm:$0xff] }
 0x10e   :  { %4615 = vmatprep.subr.bf16.mxu0 %v5712_v21  ;;  %4639 = vmatprep.subr.bf16.mxu1 %v5725_v36  ;;  %v251_v56 = vld [vmem:[#allocation7 + $0xe8] sm:$0xff]  ;;  %v265_v57 = vld [vmem:[#allocation7 + $0x158] sm:$0xff]  ;;  %v268_v58 = vld [vmem:[#allocation7 + $0x170] sm:$0xff]  ;;  %v5750_v59 = vpack.c.bf16 %v261_v54, %v258_v51 }
 0x10f   :  { %v264_v60 = vld [vmem:[#allocation7 + $0x150] sm:$0xff]  ;;  %v5753_v61 = vpack.c.bf16 %v251_v56, %v248_v55  ;;  %v5756_v62 = vpack.c.bf16 %v268_v58, %v265_v57  ;;  %v267_v63 = vld [vmem:[#allocation7 + $0x168] sm:$0xff]  ;;  %v254_v1 = vld [vmem:[#allocation7 + $0x100] sm:$0xff] }
 0x110   :  { %v257_v2 = vld [vmem:[#allocation7 + $0x118] sm:$0xff]  ;;  %v5760_v3 = vpack.c.bf16 %v267_v63, %v264_v60  ;;  %v260_v6 = vld [vmem:[#allocation7 + $0x130] sm:$0xff]  ;;  %v263_v7 = vld [vmem:[#allocation7 + $0x148] sm:$0xff] }
 0x111   :  { %4617 = vmatpush1.bf16.msra.mxu0 %v5718_v30  ;;  %4641 = vmatpush3.bf16.msra.mxu1 %v5725_v36  ;;  %v5763_v5 = vpack.c.bf16 %v257_v2, %v254_v1  ;;  %v5769_v10 = vpack.c.bf16 %v263_v7, %v260_v6  ;;  %v266_v11 = vld [vmem:[#allocation7 + $0x160] sm:$0xff]  ;;  %v269_v12 = vld [vmem:[#allocation7 + $0x178] sm:$0xff] }
 0x112   :  { %4619 = vmatprep.subr.bf16.mxu0 %v5723_v34  ;;  %4643 = vmatprep.subr.bf16.mxu1 %v5733_v43  ;;  %v5775_v13 = vpack.c.bf16 %v269_v12, %v266_v11  ;;  %v5782_v16 = vld [vmem:[#allocation2 + $0x8] sm:$0xff]  ;;  %v270_v23 = vld [vmem:[#allocation8] sm:$0x7]  ;;  %v4034_v51 = vld [vmem:[#allocation5] ss:$0 sm:$0xff] }
 0x113   :  { %v5796_v24 = vrot.slane %v270_v23, %v6397_v19  ;;  %v5800_v25 = vrot.slane %v270_v23, %v6396_v22  ;;  %v5824_v46 = vrot.slane %v270_v23, %v385_v40 }
 0x115   :  { %4621 = vmatpush1.bf16.msra.mxu0 %v5730_v41  ;;  %4645 = vmatpush3.bf16.msra.mxu1 %v5733_v43 }
 0x116   :  { %4623 = vmatprep.subr.bf16.mxu0 %v5736_v44  ;;  %4647 = vmatprep.subr.bf16.mxu1 %v5743_v52 }
 0x119   :  { %4625 = vmatpush1.bf16.msra.mxu0 %v5740_v50  ;;  %4649 = vmatpush3.bf16.msra.mxu1 %v5743_v52 }
 0x11a   :  { %4627 = vmatprep.subr.bf16.mxu0 %v5746_v53  ;;  %4651 = vmatprep.subr.bf16.mxu1 %v5753_v61 }
 0x11d   :  { %4629 = vmatpush1.bf16.msra.mxu0 %v5750_v59  ;;  %4653 = vmatpush3.bf16.msra.mxu1 %v5753_v61 }
 0x11e   :  { %4631 = vmatprep.subr.bf16.mxu0 %v5756_v62  ;;  %4655 = vmatprep.subr.bf16.mxu1 %v5763_v5 }
 0x121   :  { %4633 = vmatpush1.bf16.msra.mxu0 %v5760_v3  ;;  %4657 = vmatpush3.bf16.msra.mxu1 %v5763_v5 }
 0x122   :  { %4382 = vmatprep.subr.mxu0 %v6398_v0  ;;  %4659 = vmatprep.subr.bf16.mxu1 %v5769_v10 }
 0x124   :  { %455 = vmatmul.mubr.f32.vlgmr.msra.gmra.mrb[0].mxu0 %v5714_v26 }
 0x125   :  { %460 = vmatprep.mubr.f32.mxu0 %v6398_v0  ;;  %4661 = vmatpush3.bf16.msra.mxu1 %v5769_v10 }
 0x126   :  { %4663 = vmatprep.subr.bf16.mxu1 %v5775_v13 }
 0x128   :  { %461 = vmatmul.mubr.f32.gmra.mrb[2].mxu0 %v5782_v16 }
 0x129   :  { %4665 = vmatpush3.bf16.msra.mxu1 %v5775_v13  ;;  %4384 = vmatprep.mubr.msk.f32.mxu0 %vm5434_vm0, %v6398_v0 }
 0x12a   :  { %4337 = vmatprep.subr.mxu1 %v6398_v0 }
 0x12c   :  { %4335 = vmatmul.mubr.f32.vlgmr.msra.gmra.mrb[0].mxu1 %v5782_v16 }
 0x12d   :  { %4339 = vmatprep.mubr.msk.f32.mxu1 %vm5434_vm0, %v6398_v0 }
 0x1f7   :  { %v456_v27 = vpop.f32.mrb[0].mxu0 }
 0x1f8   :  { %v458_v28 = vpop.f32.mrb[1].mxu0  ;;  %v457_v29 = vadd.f32 %v456_v27, %v5796_v24 }
 0x1f9   :  { %v459_v31 = vadd.f32 %v458_v28, %v5800_v25 }
 0x1fa   :  { %v542_v33 = vmul.f32 0.17677669, %v457_v29 }
 0x1fb   :  { %554 = vrot.lane.b32.xlu1 %v459_v31, %s5435_s13  ;;  %552 = vrot.lane.b32.xlu0 %v459_v31, %s5436_s23 }
 0x1fc   :  { %4338 = vmatpush3.xpose.msk.msra.mxu1 %vm568_vm1, %v459_v31 }
 0x1fd   :  { %4342 = vmatprep.subr.mxu1 %v6398_v0 }
 0x1ff   :  { %4340 = vmatmul.mubr.msk.f32.vlgmr.msra.gmra.mrb[2].mxu1 %vm568_vm1, %v542_v33  ;;  %547 = vrot.lane.b32.xlu1 %v542_v33, %s5435_s13  ;;  %v5815_v35 = vpop.f32.mrb[0].mxu1 }
 0x200   :  { %545 = vrot.lane.b32.xlu0 %v542_v33, %s5436_s23  ;;  %4344 = vmatprep.mubr.msk.f32.mxu1 %vm5434_vm0, %v6398_v0  ;;  %v533_v37 = vpop.f32.mrb[1].mxu1 }
 0x201   :  { %v534_v48 = vadd.f32 %v533_v37, %v5824_v46 }
 0x203   :  { %549 = vrot.lane.b32.xlu1 %v542_v33, %s5437_s15 }
 0x204   :  { %556 = vrot.lane.b32.xlu0 %v459_v31, %s5437_s15 }
 0x26d   :  { %v553_v38 = vpop.permute.xlu0 %552  ;;  %v555_v39 = vpop.permute.xlu1 %554 }
 0x26e   :  { %4343 = vmatpush3.xpose.msk.msra.mxu1 %vm568_vm1, %v553_v38  ;;  %v462_v38 = vpop.f32.mrb[2].mxu0 }
 0x26f   :  { %4347 = vmatprep.subr.mxu1 %v6398_v0 }
 0x271   :  { %v548_v45 = vpop.permute.xlu1 %547 }
 0x272   :  { %v546_v42 = vpop.permute.xlu0 %545 }
 0x273   :  { %4345 = vmatmul.mubr.msk.f32.vlgmr.msra.gmra.mrb[4].mxu1 %vm568_vm1, %v546_v42 }
 0x274   :  { %4348 = vmatpush3.xpose.msk.msra.mxu1 %vm568_vm1, %v555_v39  ;;  %4349 = vmatprep.mubr.msk.f32.mxu1 %vm5434_vm0, %v6398_v0  ;;  %v464_v39 = vpop.f32.mrb[3].mxu0 }
 0x275   :  { %4352 = vmatprep.subr.mxu1 %v6398_v0  ;;  %v550_v49 = vpop.permute.xlu1 %549 }
 0x276   :  { %v557_v47 = vpop.permute.xlu0 %556 }
 0x277   :  { %4350 = vmatmul.mubr.msk.f32.vlgmr.msra.gmra.mrb[6].mxu1 %vm568_vm1, %v548_v45 }
 0x278   :  { %4353 = vmatpush3.xpose.msk.msra.mxu1 %vm568_vm1, %v557_v47  ;;  %4354 = vmatprep.mubr.msk.f32.mxu1 %vm5434_vm0, %v6398_v0 }
 0x279   :  { %4357 = vmatprep.subr.mxu1 %v6398_v0 }
 0x27b   :  { %4355 = vmatmul.mubr.msk.f32.vlgmr.msra.gmra.mrb[8].mxu1 %vm568_vm1, %v550_v49 }
 0x27c   :  { %4358 = vmatpush3.msra.mxu1 %v534_v48  ;;  %4359 = vmatprep.mubr.msk.f32.mxu1 %vm5434_vm0, %v6398_v0 }
 0x27d   :  { %4362 = vmatprep.subr.mxu1 %v6398_v0 }
 0x2d2   :  { %v639_v54 = vpop.f32.mrb[2].mxu1 }
 0x2d3   :  { %v640_v55 = vadd.f32 %v4034_v51, %v639_v54  ;;  %v4341_v56 = vpop.f32.mrb[3].mxu1 }
 0x2d5   :  { %v866_v57 = vsel %vm865_vm2, %v640_v55, -inf }
 0x2d6   :  { %867 = vmax.xlane.f32.xlu0 %v866_v57 }
 0x346   :  { %v713_v58 = vpop.f32.mrb[4].mxu1 }
 0x347   :  { %v714_v60 = vadd.f32 %v4034_v51, %v713_v58  ;;  %v4346_v63 = vpop.f32.mrb[5].mxu1  ;;  %v465_v58 = vadd.f32 %v464_v39, %v5800_v25 }
 0x349   :  { %v869_v1 = vsel %vm865_vm2, %v714_v60, -inf }
 0x34a   :  { %870 = vmax.xlane.f32.xlu1 %v869_v1  ;;  %v787_v2 = vpop.f32.mrb[6].mxu1 }
 0x34b   :  { %v788_v6 = vadd.f32 %v4034_v51, %v787_v2  ;;  %v4351_v7 = vpop.f32.mrb[7].mxu1 }
 0x34d   :  { %v872_v11 = vsel %vm865_vm2, %v788_v6, -inf }
 0x34e   :  { %873 = vmax.xlane.f32.xlu0 %v872_v11  ;;  %v861_v12 = vpop.f32.mrb[8].mxu1 }
 0x34f   :  { %v862_v17 = vadd.f32 %v4034_v51, %v861_v12  ;;  %v4356_v23 = vpop.f32.mrb[9].mxu1 }
 0x351   :  { %v875_v27 = vsel %vm865_vm2, %v862_v17, -inf }
 0x352   :  { %876 = vmax.xlane.f32.xlu0 %v875_v27 }
 0x35b   :  { %559 = vrot.lane.b32.xlu1 %v534_v48, %s5436_s23 }
 0x363   :  { %v868_v28 = vpop.xlane.xlu0 %867 }
 0x364   :  { %v878_v29 = vsub.f32 %v640_v55, %v868_v28 }
 0x366   :  { %v882_v31 = vmul.f32 1.442695, %v878_v29 }
 0x368   :  { %4979 = vpow2.f32 %v882_v31 }
 0x372   :  { %v4980_v33 = vpop.eup %4979 }
 0x373   :  { %v890_v37 = vsel %vm865_vm2, %v4980_v33, 0.0 }
 0x37f   :  { %891 = vadd.xlane.f32.xlu1 %v890_v37 }
 0x390   :  { %565 = vrot.lane.b32.xlu1 %v534_v48, %s5437_s15 }
 0x3d7   :  { %v871_v40 = vpop.xlane.xlu1 %870 }
 0x3d8   :  { %v879_v42 = vsub.f32 %v714_v60, %v871_v40  ;;  %v463_v60 = vadd.f32 %v462_v38, %v5796_v24 }
 0x3da   :  { %v884_v45 = vmul.f32 1.442695, %v879_v42  ;;  %v543_v63 = vmul.f32 0.17677669, %v463_v60 }
 0x3db   :  { %v874_v47 = vpop.xlane.xlu0 %873 }
 0x3dc   :  { %4981 = vpow2.f32 %v884_v45  ;;  %v880_v49 = vsub.f32 %v788_v6, %v874_v47  ;;  %v560_v6 = vpop.permute.xlu1 %559 }
 0x3de   :  { %v886_v51 = vmul.f32 1.442695, %v880_v49 }
 0x3df   :  { %v877_v1 = vpop.xlane.xlu0 %876 }
 0x3e0   :  { %4983 = vpow2.f32 %v886_v51  ;;  %v881_v2 = vsub.f32 %v862_v17, %v877_v1 }
 0x3e2   :  { %v888_v7 = vmul.f32 1.442695, %v881_v2 }
 0x3e6   :  { %v4982_v54 = vpop.eup %4981 }
 0x3e7   :  { %v893_v55 = vsel %vm865_vm2, %v4982_v54, 0.0 }
 0x3e8   :  { %894 = vadd.xlane.f32.xlu0 %v893_v55 }
 0x3ea   :  { %v4984_v56 = vpop.eup %4983 }
 0x3eb   :  { %v896_v57 = vsel %vm865_vm2, %v4984_v56, 0.0 }
 0x3ec   :  { %897 = vadd.xlane.f32.xlu1 %v896_v57 }
 0x3fd   :  { %1227 = vrot.lane.b32.xlu1 %v465_v58, %s5436_s23 }
 0x3fe   :  { %562 = vrot.lane.b32.xlu0 %v534_v48, %s5435_s13 }
 0x401   :  { %1229 = vrot.lane.b32.xlu1 %v465_v58, %s5435_s13 }
 0x405   :  { %1222 = vrot.lane.b32.xlu1 %v543_v63, %s5435_s13 }
 0x40c   :  { %v892_v11 = vpop.xlane.xlu1 %891 }
 0x40d   :  { %4985 = vrcp.f32 %v892_v11 }
 0x40e   :  { %4987 = vpow2.f32 %v888_v7 }
 0x410   :  { %v566_v17 = vpop.permute.xlu1 %565 }
 0x417   :  { %v4986_v12 = vpop.eup %4985 }
 0x418   :  { %v903_v23 = vmul.f32 %v4986_v12, %v4980_v33  ;;  %v4988_v27 = vpop.eup %4987 }
 0x419   :  { %v899_v48 = vsel %vm865_vm2, %v4988_v27, 0.0 }
 0x41a   :  { %4360 = vmatmul.mubr.msk.f32.vlgmr.msra.gmra.mrb[10].mxu1 %vm865_vm2, %v903_v23 }
 0x41b   :  { %4363 = vmatpush3.msra.mxu1 %v560_v6  ;;  %4364 = vmatprep.mubr.msk.f32.mxu1 %vm5434_vm0, %v6398_v0  ;;  %v4035_v6 = vld [vmem:[#allocation5 + $0x1] ss:$0 sm:$0xff] }
 0x41c   :  { %4367 = vmatprep.subr.mxu1 %v6398_v0 }
 0x41d   :  { %900 = vadd.xlane.f32.xlu0 %v899_v48 }
 0x433   :  { %1220 = vrot.lane.b32.xlu0 %v543_v63, %s5436_s23 }
 0x437   :  { %1231 = vrot.lane.b32.xlu0 %v465_v58, %s5437_s15 }
 0x43b   :  { %1224 = vrot.lane.b32.xlu0 %v543_v63, %s5437_s15 }
 0x475   :  { %v895_v28 = vpop.xlane.xlu0 %894 }
 0x476   :  { %4989 = vrcp.f32 %v895_v28 }
 0x479   :  { %v898_v29 = vpop.xlane.xlu1 %897  ;;  %v563_v38 = vpop.permute.xlu0 %562 }
 0x47a   :  { %4991 = vrcp.f32 %v898_v29 }
 0x47d   :  { %v1228_v31 = vpop.permute.xlu1 %1227 }
 0x47e   :  { %4383 = vmatpush3.xpose.msk.msra.mxu0 %vm568_vm1, %v1228_v31 }
 0x47f   :  { %4392 = vmatprep.subr.mxu0 %v6398_v0 }
 0x480   :  { %v4990_v33 = vpop.eup %4989 }
 0x481   :  { %v905_v37 = vmul.f32 %v4990_v33, %v4982_v54  ;;  %v1230_v55 = vpop.permute.xlu1 %1229 }
 0x483   :  { %4365 = vmatmul.mubr.msk.f32.vlgmr.msra.gmra.mrb[12].mxu1 %vm865_vm2, %v905_v37 }
 0x484   :  { %v4992_v39 = vpop.eup %4991  ;;  %4368 = vmatpush3.msra.mxu1 %v563_v38  ;;  %4369 = vmatprep.mubr.msk.f32.mxu1 %vm5434_vm0, %v6398_v0 }
 0x485   :  { %v907_v40 = vmul.f32 %v4992_v39, %v4984_v56  ;;  %4372 = vmatprep.subr.mxu1 %v6398_v0  ;;  %v5890_v56 = vadd.f32 %v5815_v35, %v5824_v46  ;;  %v1223_v57 = vpop.permute.xlu1 %1222 }
 0x487   :  { %4370 = vmatmul.mubr.msk.f32.vlgmr.msra.gmra.mrb[14].mxu1 %vm865_vm2, %v907_v40 }
 0x488   :  { %4373 = vmatpush3.msra.mxu1 %v566_v17  ;;  %4374 = vmatprep.mubr.msk.f32.mxu1 %vm5434_vm0, %v6398_v0 }
 0x489   :  { %4377 = vmatprep.subr.mxu1 %v6398_v0 }
 0x4aa   :  { %v901_v42 = vpop.xlane.xlu0 %900 }
 0x4ab   :  { %4993 = vrcp.f32 %v901_v42 }
 0x4ae   :  { %v1221_v45 = vpop.permute.xlu0 %1220 }
 0x4af   :  { %4385 = vmatmul.mubr.msk.f32.vlgmr.msra.gmra.mrb[4].mxu0 %vm568_vm1, %v1221_v45 }
 0x4b0   :  { %4394 = vmatprep.mubr.msk.f32.mxu0 %vm5434_vm0, %v6398_v0 }
 0x4b2   :  { %v1232_v47 = vpop.permute.xlu0 %1231 }
 0x4b3   :  { %4393 = vmatpush3.xpose.msk.msra.mxu0 %vm568_vm1, %v1232_v47 }
 0x4b4   :  { %4402 = vmatprep.subr.mxu0 %v6398_v0 }
 0x4b5   :  { %v4994_v49 = vpop.eup %4993 }
 0x4b6   :  { %v909_v51 = vmul.f32 %v4994_v49, %v4988_v27  ;;  %v1225_v54 = vpop.permute.xlu0 %1224 }
 0x4b7   :  { %4395 = vmatmul.mubr.msk.f32.vlgmr.msra.gmra.mrb[6].mxu0 %vm568_vm1, %v1225_v54 }
 0x4b8   :  { %4375 = vmatmul.mubr.msk.f32.vlgmr.msra.gmra.mrb[16].mxu1 %vm865_vm2, %v909_v51  ;;  %4404 = vmatprep.mubr.msk.f32.mxu0 %vm5434_vm0, %v6398_v0 }
 0x4b9   :  { %4378 = vmatpush3.xpose.msk.msra.mxu1 %vm568_vm1, %v465_v58  ;;  %4379 = vmatprep.mubr.msk.f32.mxu1 %vm5434_vm0, %v6398_v0 }
 0x4ba   :  { %4387 = vmatprep.subr.mxu1 %v6398_v0 }
 0x4bc   :  { %4380 = vmatmul.mubr.msk.f32.vlgmr.msra.gmra.mrb[18].mxu1 %vm568_vm1, %v543_v63 }
 0x4bd   :  { %4388 = vmatpush3.xpose.msk.msra.mxu1 %vm568_vm1, %v1230_v55  ;;  %4389 = vmatprep.mubr.msk.f32.mxu1 %vm5434_vm0, %v6398_v0 }
 0x4be   :  { %4397 = vmatprep.subr.mxu1 %v6398_v0 }
 0x4c0   :  { %4390 = vmatmul.mubr.msk.f32.vlgmr.msra.gmra.mrb[20].mxu1 %vm568_vm1, %v1223_v57 }
 0x4c1   :  { %4398 = vmatpush3.msra.mxu1 %v5890_v56  ;;  %4399 = vmatprep.mubr.msk.f32.mxu1 %vm5434_vm0, %v6398_v0 }
 0x4c2   :  { %4407 = vmatprep.subr.mxu1 %v6398_v0 }
 0x4ed   :  { %v5897_v58 = vpop.f32.mrb[10].mxu1 }
 0x4ee   :  { %v4361_v60 = vpop.f32.mrb[11].mxu1 }
 0x556   :  { %v5899_v63 = vpop.f32.mrb[12].mxu1 }
 0x557   :  { %v4366_v1 = vpop.f32.mrb[13].mxu1 }
 0x55a   :  { %v5901_v2 = vpop.f32.mrb[14].mxu1 }
 0x55b   :  { %v4371_v35 = vpop.f32.mrb[15].mxu1 }
 0x582   :  { %v1387_v7 = vpop.f32.mrb[4].mxu0 }
 0x583   :  { %v1388_v11 = vadd.f32 %v4035_v6, %v1387_v7  ;;  %v4386_v12 = vpop.f32.mrb[5].mxu0 }
 0x585   :  { %v1542_v23 = vsel %vm865_vm2, %v1388_v11, -inf }
 0x586   :  { %1543 = vmax.xlane.f32.xlu0 %v1542_v23 }
 0x58a   :  { %v1535_v27 = vpop.f32.mrb[6].mxu0 }
 0x58b   :  { %v5904_v48 = vpop.f32.mrb[16].mxu1  ;;  %v4396_v17 = vpop.f32.mrb[7].mxu0  ;;  %v1536_v37 = vadd.f32 %v4035_v6, %v1535_v27 }
 0x58c   :  { %v4376_v28 = vpop.f32.mrb[17].mxu1 }
 0x58d   :  { %v1548_v45 = vsel %vm865_vm2, %v1536_v37, -inf }
 0x58f   :  { %v1313_v29 = vpop.f32.mrb[18].mxu1 }
 0x590   :  { %v1314_v31 = vadd.f32 %v4035_v6, %v1313_v29  ;;  %v4381_v33 = vpop.f32.mrb[19].mxu1 }
 0x592   :  { %v1539_v38 = vsel %vm865_vm2, %v1314_v31, -inf }
 0x593   :  { %1540 = vmax.xlane.f32.xlu1 %v1539_v38  ;;  %v1461_v39 = vpop.f32.mrb[20].mxu1 }
 0x594   :  { %v1462_v40 = vadd.f32 %v4035_v6, %v1461_v39  ;;  %v4391_v42 = vpop.f32.mrb[21].mxu1 }
 0x596   :  { %v1545_v47 = vsel %vm865_vm2, %v1462_v40, -inf }
 0x597   :  { %1549 = vmax.xlane.f32.xlu1 %v1548_v45  ;;  %1546 = vmax.xlane.f32.xlu0 %v1545_v47 }
 0x613   :  { %v1544_v49 = vpop.xlane.xlu0 %1543 }
 0x614   :  { %v1552_v51 = vsub.f32 %v1388_v11, %v1544_v49 }
 0x616   :  { %v1557_v54 = vmul.f32 1.442695, %v1552_v51 }
 0x618   :  { %4995 = vpow2.f32 %v1557_v54 }
 0x620   :  { %v1541_v55 = vpop.xlane.xlu1 %1540 }
 0x621   :  { %v1551_v57 = vsub.f32 %v1314_v31, %v1541_v55 }
 0x622   :  { %v4996_v60 = vpop.eup %4995 }
 0x623   :  { %v1555_v1 = vmul.f32 1.442695, %v1551_v57  ;;  %v1566_v35 = vsel %vm865_vm2, %v4996_v60, 0.0 }
 0x624   :  { %1567 = vadd.xlane.f32.xlu1 %v1566_v35  ;;  %v1550_v7 = vpop.xlane.xlu1 %1549  ;;  %v1547_v6 = vpop.xlane.xlu0 %1546 }
 0x625   :  { %4997 = vpow2.f32 %v1555_v1  ;;  %v1554_v12 = vsub.f32 %v1536_v37, %v1550_v7  ;;  %v1553_v23 = vsub.f32 %v1462_v40, %v1547_v6  ;;  %v271_v7 = vld [vmem:[#allocation10] sm:$0xff]  ;;  %v272_v6 = vld [vmem:[#allocation10 + $0x8] sm:$0xff] }
 0x627   :  { %v1561_v27 = vmul.f32 1.442695, %v1554_v12  ;;  %v1559_v17 = vmul.f32 1.442695, %v1553_v23  ;;  %v273_v12 = vld [vmem:[#allocation10 + $0x10] sm:$0xff]  ;;  %v5929_v23 = vpack.c.bf16 %v272_v6, %v271_v7 }
 0x629   :  { %4999 = vpow2.f32 %v1561_v27  ;;  %v274_v27 = vld [vmem:[#allocation10 + $0x18] sm:$0xff] }
 0x62a   :  { %5001 = vpow2.f32 %v1559_v17  ;;  %v5931_v17 = vpack.c.bf16 %v274_v27, %v273_v12 }
 0x62f   :  { %v4998_v28 = vpop.eup %4997 }
 0x630   :  { %v1563_v11 = vsel %vm865_vm2, %v4998_v28, 0.0 }
 0x631   :  { %1564 = vadd.xlane.f32.xlu0 %v1563_v11  ;;  %v276_v11 = vld [vmem:[#allocation10 + $0x28] sm:$0xff] }
 0x633   :  { %v5000_v29 = vpop.eup %4999 }
 0x634   :  { %v5002_v31 = vpop.eup %5001  ;;  %v1572_v33 = vsel %vm865_vm2, %v5000_v29, 0.0 }
 0x635   :  { %1573 = vadd.xlane.f32.xlu1 %v1572_v33  ;;  %v1569_v38 = vsel %vm865_vm2, %v5002_v31, 0.0  ;;  %v278_v33 = vld [vmem:[#allocation10 + $0x38] sm:$0xff] }
 0x636   :  { %1570 = vadd.xlane.f32.xlu0 %v1569_v38 }
 0x646   :  { %1237 = vrot.lane.b32.xlu1 %v5890_v56, %s5435_s13 }
 0x64a   :  { %1240 = vrot.lane.b32.xlu1 %v5890_v56, %s5437_s15 }
 0x64c   :  { %1234 = vrot.lane.b32.xlu0 %v5890_v56, %s5436_s23 }
 0x6b1   :  { %v1568_v37 = vpop.xlane.xlu1 %1567 }
 0x6b2   :  { %5003 = vrcp.f32 %v1568_v37  ;;  %v279_v37 = vld [vmem:[#allocation10 + $0x40] sm:$0xff] }
 0x6bc   :  { %v5004_v45 = vpop.eup %5003 }
 0x6bd   :  { %v1578_v49 = vmul.f32 %v5004_v45, %v4996_v60  ;;  %v282_v45 = vld [vmem:[#allocation10 + $0x58] sm:$0xff] }
 0x6be   :  { %v1565_v39 = vpop.xlane.xlu0 %1564 }
 0x6bf   :  { %5005 = vrcp.f32 %v1565_v39  ;;  %v280_v39 = vld [vmem:[#allocation10 + $0x48] sm:$0xff] }
 0x6c2   :  { %v1574_v40 = vpop.xlane.xlu1 %1573 }
 0x6c3   :  { %5007 = vrcp.f32 %v1574_v40  ;;  %v1571_v42 = vpop.xlane.xlu0 %1570  ;;  %v5944_v40 = vpack.c.bf16 %v280_v39, %v279_v37 }
 0x6c4   :  { %5009 = vrcp.f32 %v1571_v42  ;;  %v281_v42 = vld [vmem:[#allocation10 + $0x50] sm:$0xff] }
 0x6c6   :  { %v1238_v47 = vpop.permute.xlu1 %1237 }
 0x6c7   :  { %v1235_v51 = vpop.permute.xlu0 %1234 }
 0x6c8   :  { %4403 = vmatpush3.msra.mxu0 %v1235_v51  ;;  %v284_v51 = vld [vmem:[#allocation10 + $0x68] sm:$0xff] }
 0x6c9   :  { %v5006_v54 = vpop.eup %5005  ;;  %4405 = vmatmul.mubr.msk.f32.vlgmr.msra.gmra.mrb[8].mxu0 %vm865_vm2, %v1578_v49  ;;  %4412 = vmatprep.subr.mxu0 %v6398_v0  ;;  %v283_v49 = vld [vmem:[#allocation10 + $0x60] sm:$0xff] }
 0x6ca   :  { %v1576_v55 = vmul.f32 %v5006_v54, %v4998_v28  ;;  %v1241_v56 = vpop.permute.xlu1 %1240  ;;  %4414 = vmatprep.mubr.msk.f32.mxu0 %vm5434_vm0, %v6398_v0  ;;  %v275_v28 = vld [vmem:[#allocation10 + $0x20] sm:$0xff]  ;;  %v5953_v54 = vpack.c.bf16 %v284_v51, %v283_v49 }
 0x6cb   :  { %4413 = vmatpush3.msra.mxu0 %v1241_v56  ;;  %v286_v56 = vld [vmem:[#allocation10 + $0x78] sm:$0xff] }
 0x6cc   :  { %4400 = vmatmul.mubr.msk.f32.vlgmr.msra.gmra.mrb[22].mxu1 %vm865_vm2, %v1576_v55  ;;  %v285_v55 = vld [vmem:[#allocation10 + $0x70] sm:$0xff] }
 0x6cd   :  { %v5008_v57 = vpop.eup %5007  ;;  %4408 = vmatpush3.msra.mxu1 %v1238_v47  ;;  %4409 = vmatprep.mubr.msk.f32.mxu1 %vm5434_vm0, %v6398_v0  ;;  %v5949_v47 = vpack.c.bf16 %v282_v45, %v281_v42 }
 0x6ce   :  { %v5010_v60 = vpop.eup %5009  ;;  %v1582_v1 = vmul.f32 %v5008_v57, %v5000_v29  ;;  %4667 = vmatprep.subr.bf16.mxu1 %v5929_v23  ;;  %v5936_v29 = vpack.c.bf16 %v276_v11, %v275_v28  ;;  %v5957_v57 = vpack.c.bf16 %v286_v56, %v285_v55 }
 0x6cf   :  { %v1580_v35 = vmul.f32 %v5010_v60, %v5002_v31  ;;  %v277_v31 = vld [vmem:[#allocation10 + $0x30] sm:$0xff] }
 0x6d0   :  { %4415 = vmatmul.mubr.msk.f32.vlgmr.msra.gmra.mrb[10].mxu0 %vm865_vm2, %v1582_v1  ;;  %v5940_v38 = vpack.c.bf16 %v278_v33, %v277_v31 }
 0x6d1   :  { %4410 = vmatmul.mubr.msk.f32.vlgmr.msra.gmra.mrb[24].mxu1 %vm865_vm2, %v1580_v35  ;;  %2087 = vmatprep.mubr.f32.mxu0 %v6398_v0 }
 0x6d2   :  { %4669 = vmatpush3.bf16.msra.mxu1 %v5929_v23 }
 0x6d3   :  { %4671 = vmatprep.subr.bf16.mxu1 %v5931_v17 }
 0x6d6   :  { %4673 = vmatpush3.bf16.msra.mxu1 %v5931_v17 }
 0x6d7   :  { %4675 = vmatprep.subr.bf16.mxu1 %v5936_v29 }
 0x6da   :  { %4677 = vmatpush3.bf16.msra.mxu1 %v5936_v29 }
 0x6db   :  { %4679 = vmatprep.subr.bf16.mxu1 %v5940_v38 }
 0x6de   :  { %4681 = vmatpush3.bf16.msra.mxu1 %v5940_v38 }
 0x6df   :  { %4683 = vmatprep.subr.bf16.mxu1 %v5944_v40 }
 0x6e2   :  { %4685 = vmatpush3.bf16.msra.mxu1 %v5944_v40 }
 0x6e3   :  { %4687 = vmatprep.subr.bf16.mxu1 %v5949_v47 }
 0x6e6   :  { %4689 = vmatpush3.bf16.msra.mxu1 %v5949_v47 }
 0x6e7   :  { %4691 = vmatprep.subr.bf16.mxu1 %v5953_v54 }
 0x6ea   :  { %4693 = vmatpush3.bf16.msra.mxu1 %v5953_v54 }
 0x6eb   :  { %4695 = vmatprep.subr.bf16.mxu1 %v5957_v57 }
 0x6ee   :  { %4697 = vmatpush3.bf16.msra.mxu1 %v5957_v57 }
 0x79c   :  { %v1725_v60 = vpop.f32.mrb[8].mxu0 }
 0x79d   :  { %v4949_v1 = vpack.i.bf16 %v1725_v60, %v5899_v63  ;;  %v4406_v35 = vpop.f32.mrb[9].mxu0 }
 0x79f   :  { %4950 = vrot.lane.b32.xlu0 %v4949_v1, %s5437_s15  ;;  %v1652_v7 = vpop.f32.mrb[22].mxu1 }
 0x7a0   :  { %v4401_v6 = vpop.f32.mrb[23].mxu1 }
 0x7a3   :  { %v1871_v12 = vpop.f32.mrb[10].mxu0 }
 0x7a4   :  { %v1798_v27 = vpop.f32.mrb[24].mxu1  ;;  %v4959_v28 = vpack.i.bf16 %v1871_v12, %v5904_v48  ;;  %v4416_v11 = vpop.f32.mrb[11].mxu0  ;;  %v4060_v12 = vld [vmem:[#allocation11] ss:$0 sm:$0xff] }
 0x7a5   :  { %v4954_v31 = vpack.i.bf16 %v1798_v27, %v5901_v2  ;;  %v4411_v33 = vpop.f32.mrb[25].mxu1 }
 0x7a6   :  { %4960 = vrot.lane.b32.xlu0 %v4959_v28, %s5436_s23  ;;  %v293_v33 = vld [vmem:[#allocation16 + $0x18] sm:$0xff] }
 0x7a7   :  { %4955 = vrot.lane.b32.xlu1 %v4954_v31, %s5435_s13 }
 0x811   :  { %v4951_v37 = vpop.permute.xlu0 %4950 }
 0x812   :  { %v4953_v39 = vunpack.i.h.bf16 %v4951_v37  ;;  %v4952_v63 = vunpack.i.l.bf16 %v4951_v37 }
 0x814   :  { %v1887_v48 = vsel %vm568_vm1, %v1652_v7, %v4953_v39  ;;  %v1214_v2 = vsel %vm568_vm1, %v5897_v58, %v4952_v63  ;;  %v291_v7 = vld [vmem:[#allocation16 + $0x8] sm:$0xff]  ;;  %v290_v58 = vld [vmem:[#allocation16] sm:$0xff]  ;;  %v292_v39 = vld [vmem:[#allocation16 + $0x10] sm:$0xff] }
 0x815   :  { %v5975_v37 = vpack.c.bf16 %v293_v33, %v291_v7  ;;  %v295_v63 = vld [vmem:[#allocation16 + $0x28] sm:$0xff] }
 0x817   :  { %4699 = vmatprep.subr.bf16.mxu0 %v5975_v37 }
 0x818   :  { %v4961_v42 = vpop.permute.xlu0 %4960 }
 0x819   :  { %v4963_v45 = vunpack.i.h.bf16 %v4961_v42  ;;  %v4962_v49 = vunpack.i.l.bf16 %v4961_v42  ;;  %v4956_v51 = vpop.permute.xlu1 %4955  ;;  %v297_v42 = vld [vmem:[#allocation16 + $0x38] sm:$0xff] }
 0x81a   :  { %v4958_v55 = vunpack.i.h.bf16 %v4956_v51  ;;  %v4957_v56 = vunpack.i.l.bf16 %v4956_v51  ;;  %v294_v51 = vld [vmem:[#allocation16 + $0x20] sm:$0xff] }
 0x81c   :  { %v1216_v60 = vsel %vm1215_vm3, %v1214_v2, %v4957_v56  ;;  %v1888_v1 = vsel %vm1215_vm3, %v1887_v48, %v4958_v55  ;;  %v296_v55 = vld [vmem:[#allocation16 + $0x30] sm:$0xff]  ;;  %v299_v56 = vld [vmem:[#allocation16 + $0x48] sm:$0xff]  ;;  %v301_v48 = vld [vmem:[#allocation16 + $0x58] sm:$0xff] }
 0x81d   :  { %v1218_v35 = vsel %vm1217_vm4, %v1216_v60, %v4962_v49  ;;  %v1889_v6 = vsel %vm1217_vm4, %v1888_v1, %v4963_v45  ;;  %v5977_v49 = vpack.c.bf16 %v292_v39, %v290_v58  ;;  %v5979_v45 = vpack.c.bf16 %v297_v42, %v295_v63  ;;  %v298_v60 = vld [vmem:[#allocation16 + $0x40] sm:$0xff]  ;;  %v300_v1 = vld [vmem:[#allocation16 + $0x50] sm:$0xff]  ;;  %v303_v39 = vld [vmem:[#allocation16 + $0x68] sm:$0xff] }
 0x81e   :  { %4449 = vmatprep.mubr.f32.mxu1 %v1218_v35  ;;  %v5986_v2 = vpack.c.bf16 %v301_v48, %v299_v56  ;;  %v5989_v35 = vpack.c.bf16 %v300_v1, %v298_v60  ;;  %v305_v63 = vld [vmem:[#allocation16 + $0x78] sm:$0xff]  ;;  %v307_v48 = vld [vmem:[#allocation16 + $0x88] sm:$0xff]  ;;  %v308_v60 = vld [vmem:[#allocation16 + $0x90] sm:$0xff] }
 0x81f   :  { %4450 = vmatmul.mubr.f32.vlgmr.msra.gmra.mrb[26].mxu1 %v1889_v6  ;;  %4701 = vmatpush1.bf16.msra.mxu0 %v5977_v49  ;;  %v5994_v42 = vpack.c.bf16 %v305_v63, %v303_v39  ;;  %v311_v1 = vld [vmem:[#allocation16 + $0xa8] sm:$0xff] }
 0x820   :  { %4703 = vmatprep.subr.bf16.mxu0 %v5979_v45  ;;  %v315_v63 = vld [vmem:[#allocation16 + $0xc8] sm:$0xff] }
 0x8f2   :  { %v4451_v27 = vpop.f32.mrb[26].mxu1 }
 0x8f3   :  { %v1962_v28 = vpop.f32.mrb[27].mxu1  ;;  %v1968_v7 = vadd.f32 %v4451_v27, %v4060_v12  ;;  %v306_v27 = vld [vmem:[#allocation16 + $0x80] sm:$0xff] }
 0x8f4   :  { %v1963_v11 = vadd.f32 %v4060_v12, %v1962_v28 }
 0x8f5   :  { %v1972_v58 = vadd.f32 %v1968_v7, %v5782_v16  ;;  %v6002_v16 = vpack.c.bf16 %v308_v60, %v306_v27  ;;  %v319_v27 = vld [vmem:[#allocation16 + $0xe8] sm:$0xff]  ;;  %v321_v60 = vld [vmem:[#allocation16 + $0xf8] sm:$0xff] }
 0x8f6   :  { %v1971_v31 = vadd.f32 %v1963_v11, %v5714_v26  ;;  %v5983_v26 = vpack.c.bf16 %v296_v55, %v294_v51  ;;  %v302_v51 = vld [vmem:[#allocation16 + $0x60] sm:$0xff]  ;;  %v304_v55 = vld [vmem:[#allocation16 + $0x70] sm:$0xff]  ;;  %v6016_v19 = vpack.c.bf16 %v321_v60, %v319_v27 }
 0x8f7   :  { %v5996_v56 = vpack.c.bf16 %v304_v55, %v302_v51  ;;  %v317_v51 = vld [vmem:[#allocation16 + $0xd8] sm:$0xff]  ;;  %v314_v55 = vld [vmem:[#allocation16 + $0xc0] sm:$0xff] }
 0x8f8   :  { %1973 = vadd.xlane.f32.xlu1 %v1971_v31  ;;  %4705 = vmatpush1.bf16.msra.mxu0 %v5983_v26  ;;  %6410 = vst [vmem:[#allocation35_spill] sm:$0xff] %v6016_v19 }
 0x8f9   :  { %4707 = vmatprep.subr.bf16.mxu0 %v5986_v2 }
 0x8fc   :  { %4709 = vmatpush1.bf16.msra.mxu0 %v5989_v35 }
 0x8fd   :  { %4711 = vmatprep.subr.bf16.mxu0 %v5994_v42 }
 0x900   :  { %4713 = vmatpush1.bf16.msra.mxu0 %v5996_v56 }
 0x985   :  { %v1974_v6 = vpop.xlane.xlu1 %1973 }
 0x986   :  { %v1978_v28 = vmul.f32 0.0078125, %v1974_v6  ;;  %v313_v6 = vld [vmem:[#allocation16 + $0xb8] sm:$0xff] }
 0x987   :  { %v6006_v7 = vpack.c.bf16 %v313_v6, %v311_v1  ;;  %v318_v1 = vld [vmem:[#allocation16 + $0xe0] sm:$0xff]  ;;  %v320_v6 = vld [vmem:[#allocation16 + $0xf0] sm:$0xff] }
 0x988   :  { %v1980_v11 = vsub.f32 %v1971_v31, %v1978_v28  ;;  %v309_v31 = vld [vmem:[#allocation16 + $0x98] sm:$0xff]  ;;  %v310_v28 = vld [vmem:[#allocation16 + $0xa0] sm:$0xff] }
 0x989   :  { %v6000_v12 = vpack.c.bf16 %v309_v31, %v307_v48  ;;  %v6012_v48 = vpack.c.bf16 %v317_v51, %v315_v63  ;;  %v316_v31 = vld [vmem:[#allocation16 + $0xd0] sm:$0xff] }
 0x98a   :  { %v1982_v33 = vmul.f32 %v1980_v11, %v1980_v11  ;;  %v6014_v22 = vpack.c.bf16 %v316_v31, %v314_v55 }
 0x98b   :  { %4715 = vmatprep.subr.bf16.mxu0 %v6000_v12 }
 0x98c   :  { %1984 = vadd.xlane.f32.xlu0 %v1982_v33  ;;  %4717 = vmatpush1.bf16.msra.mxu0 %v6002_v16  ;;  %v312_v33 = vld [vmem:[#allocation16 + $0xb0] sm:$0xff] }
 0x98d   :  { %v6008_v39 = vpack.c.bf16 %v312_v33, %v310_v28  ;;  %4719 = vmatprep.subr.bf16.mxu0 %v6006_v7  ;;  %v6020_v28 = vpack.c.bf16 %v320_v6, %v318_v1  ;;  %v6029_v6 = vld [vmem:[#allocation13] ss:$0 sm:$0xff] }
 0x990   :  { %1975 = vadd.xlane.f32.xlu0 %v1972_v58  ;;  %4721 = vmatpush1.bf16.msra.mxu0 %v6008_v39 }
 0x991   :  { %4723 = vmatprep.subr.bf16.mxu0 %v6012_v48 }
 0x994   :  { %4725 = vmatpush1.bf16.msra.mxu0 %v6014_v22 }
 0x995   :  { %4727 = vmatprep.subr.bf16.mxu0 %v6016_v19  ;;  %v6031_v19 = vld [vmem:[#allocation14] ss:$0 sm:$0xff] }
 0x998   :  { %4729 = vmatpush1.bf16.msra.mxu0 %v6020_v28 }
 0x999   :  { %4763 = vmatprep.subr.bf16.mxu0 %v5695_v4 }
 0xa19   :  { %v1985_v33 = vpop.xlane.xlu0 %1984 }
 0xa1a   :  { %v1988_v63 = vmul.f32 0.0078125, %v1985_v33 }
 0xa1c   :  { %v1990_v51 = vadd.f32 1e-05, %v1988_v63  ;;  %v6411_v63 = vmov 0.0  }
 0xa1d   :  { %v1976_v55 = vpop.xlane.xlu0 %1975 }
 0xa1e   :  { %5011 = vrsqrt.f32 %v1990_v51  ;;  %v1979_v31 = vmul.f32 0.0078125, %v1976_v55  ;;  %v328_v51 = vld [vmem:[#allocation19 + $0x28] sm:$0xff]  ;;  %v345_v55 = vld [vmem:[#allocation19 + $0xb0] sm:$0xff] }
 0xa20   :  { %v6025_v27 = vsub.f32 %v1972_v58, %v1979_v31  ;;  %v346_v31 = vld [vmem:[#allocation19 + $0xb8] sm:$0xff] }
 0xa22   :  { %v1983_v60 = vmul.f32 %v6025_v27, %v6025_v27 }
 0xa24   :  { %1986 = vadd.xlane.f32.xlu1 %v1983_v60  ;;  %v6072_v60 = vpack.c.bf16 %v346_v31, %v345_v55  ;;  %v352_v55 = vld [vmem:[#allocation19 + $0xe8] sm:$0xff] }
 0xa28   :  { %v5012_v1 = vpop.eup %5011 }
 0xa29   :  { %v1994_v0 = vmul.f32 %v5012_v1, %v1980_v11  ;;  %v343_v11 = vld [vmem:[#allocation19 + $0xa0] sm:$0xff]  ;;  %v329_v1 = vld [vmem:[#allocation19 + $0x30] sm:$0xff] }
 0xa2b   :  { %v2002_v4 = vmul.f32 %v6029_v6, %v1994_v0  ;;  %v339_v0 = vld [vmem:[#allocation19 + $0x80] sm:$0xff] }
 0xa2d   :  { %v6035_v33 = vadd.f32 %v6031_v19, %v2002_v4  ;;  %v330_v4 = vld [vmem:[#allocation19 + $0x38] sm:$0xff] }
 0xa2f   :  { %2088 = vmatmul.mubr.f32.vlgmr.msra.gmra.mrb[12].mxu0 %v6035_v33 }
 0xa30   :  { %2093 = vmatprep.mubr.f32.mxu0 %v6411_v63  ;;  %4765 = vmatpush1.bf16.msra.mxu0 %v5697_v8  ;;  %v340_v8 = vld [vmem:[#allocation19 + $0x88] sm:$0xff] }
 0xa31   :  { %4767 = vmatprep.subr.bf16.mxu0 %v5699_v9  ;;  %v323_v9 = vld [vmem:[#allocation19] sm:$0xff] }
 0xa34   :  { %4769 = vmatpush1.bf16.msra.mxu0 %v5703_v14  ;;  %v6051_v14 = vpack.c.bf16 %v340_v8, %v339_v0  ;;  %v347_v0 = vld [vmem:[#allocation19 + $0xc0] sm:$0xff]  ;;  %v348_v8 = vld [vmem:[#allocation19 + $0xc8] sm:$0xff] }
 0xa35   :  { %4771 = vmatprep.subr.bf16.mxu0 %v5706_v15  ;;  %v324_v15 = vld [vmem:[#allocation19 + $0x8] sm:$0xff] }
 0xa36   :  { %4731 = vmatprep.subr.bf16.mxu1 %v6051_v14 }
 0xa38   :  { %4773 = vmatpush1.bf16.msra.mxu0 %v5709_v20  ;;  %v341_v20 = vld [vmem:[#allocation19 + $0x90] sm:$0xff] }
 0xa39   :  { %4775 = vmatprep.subr.bf16.mxu0 %v5712_v21  ;;  %v342_v21 = vld [vmem:[#allocation19 + $0x98] sm:$0xff] }
 0xa3c   :  { %4777 = vmatpush1.bf16.msra.mxu0 %v5718_v30  ;;  %v6054_v30 = vpack.c.bf16 %v324_v15, %v323_v9  ;;  %v6075_v9 = vpack.c.bf16 %v330_v4, %v329_v1  ;;  %v331_v15 = vld [vmem:[#allocation19 + $0x40] sm:$0xff] }
 0xa3d   :  { %4779 = vmatprep.subr.bf16.mxu0 %v5723_v34  ;;  %v6056_v34 = vpack.c.bf16 %v342_v21, %v341_v20  ;;  %v332_v20 = vld [vmem:[#allocation19 + $0x48] sm:$0xff]  ;;  %v349_v21 = vld [vmem:[#allocation19 + $0xd0] sm:$0xff]  ;;  %v335_v4 = vld [vmem:[#allocation19 + $0x60] sm:$0xff] }
 0xa3e   :  { %4733 = vmatpush3.bf16.msra.mxu1 %v6054_v30 }
 0xa3f   :  { %4735 = vmatprep.subr.bf16.mxu1 %v6056_v34 }
 0xa40   :  { %4781 = vmatpush1.bf16.msra.mxu0 %v5730_v41  ;;  %v325_v41 = vld [vmem:[#allocation19 + $0x10] sm:$0xff] }
 0xa41   :  { %4783 = vmatprep.subr.bf16.mxu0 %v5736_v44  ;;  %v326_v44 = vld [vmem:[#allocation19 + $0x18] sm:$0xff] }
 0xa44   :  { %4785 = vmatpush1.bf16.msra.mxu0 %v5740_v50  ;;  %v344_v50 = vld [vmem:[#allocation19 + $0xa8] sm:$0xff] }
 0xa45   :  { %4787 = vmatprep.subr.bf16.mxu0 %v5746_v53  ;;  %v6061_v53 = vpack.c.bf16 %v326_v44, %v325_v41  ;;  %v6064_v58 = vpack.c.bf16 %v344_v50, %v343_v11  ;;  %v350_v41 = vld [vmem:[#allocation19 + $0xd8] sm:$0xff]  ;;  %v6081_v44 = vpack.c.bf16 %v332_v20, %v331_v15  ;;  %v333_v50 = vld [vmem:[#allocation19 + $0x50] sm:$0xff] }
 0xa46   :  { %v6084_v11 = vpack.c.bf16 %v350_v41, %v349_v21  ;;  %v353_v15 = vld [vmem:[#allocation19 + $0xf0] sm:$0xff]  ;;  %v354_v20 = vld [vmem:[#allocation19 + $0xf8] sm:$0xff] }
 0xa47   :  { %4737 = vmatpush3.bf16.msra.mxu1 %v6061_v53  ;;  %v6097_v21 = vpack.c.bf16 %v354_v20, %v353_v15  ;;  %v337_v41 = vld [vmem:[#allocation19 + $0x70] sm:$0xff] }
 0xa48   :  { %4789 = vmatpush1.bf16.msra.mxu0 %v5750_v59  ;;  %v327_v59 = vld [vmem:[#allocation19 + $0x20] sm:$0xff]  ;;  %4739 = vmatprep.subr.bf16.mxu1 %v6064_v58 }
 0xa49   :  { %4791 = vmatprep.subr.bf16.mxu0 %v5756_v62  ;;  %v6069_v62 = vpack.c.bf16 %v328_v51, %v327_v59  ;;  %v334_v59 = vld [vmem:[#allocation19 + $0x58] sm:$0xff]  ;;  %v351_v51 = vld [vmem:[#allocation19 + $0xe0] sm:$0xff]  ;;  %6413 = vst [vmem:[#allocation37_spill] sm:$0xff] %v6097_v21 }
 0xa4a   :  { %v6087_v31 = vpack.c.bf16 %v334_v59, %v333_v50  ;;  %v6090_v1 = vpack.c.bf16 %v352_v55, %v351_v51  ;;  %v338_v50 = vld [vmem:[#allocation19 + $0x78] sm:$0xff] }
 0xa4b   :  { %4741 = vmatpush3.bf16.msra.mxu1 %v6069_v62  ;;  %v6099_v59 = vpack.c.bf16 %v338_v50, %v337_v41  ;;  %v322_v41 = vld [vmem:[#allocation17] sm:$0x3]  ;;  %v6415_v50 = vsub.s32 0, %v5790_v18 }
 0xa4c   :  { %4793 = vmatpush1.bf16.msra.mxu0 %v5760_v3  ;;  %4743 = vmatprep.subr.bf16.mxu1 %v6072_v60  ;;  %v6078_v3 = vpack.c.bf16 %v348_v8, %v347_v0  ;;  %v336_v0 = vld [vmem:[#allocation19 + $0x68] sm:$0xff] }
 0xa4d   :  { %4487 = vmatprep.subr.mxu0 %v6411_v63  ;;  %v6094_v8 = vpack.c.bf16 %v336_v0, %v335_v4  ;;  %6414 = vst [vmem:[#allocation38_spill] sm:$0xff] %v6099_v59 }
 0xa4f   :  { %4745 = vmatpush3.bf16.msra.mxu1 %v6075_v9  ;;  %6412 = vst [vmem:[#allocation36_spill] sm:$0xff] %v6094_v8 }
 0xa50   :  { %4747 = vmatprep.subr.bf16.mxu1 %v6078_v3 }
 0xa53   :  { %4749 = vmatpush3.bf16.msra.mxu1 %v6081_v44 }
 0xa54   :  { %4751 = vmatprep.subr.bf16.mxu1 %v6084_v11 }
 0xa57   :  { %4753 = vmatpush3.bf16.msra.mxu1 %v6087_v31 }
 0xa58   :  { %4755 = vmatprep.subr.bf16.mxu1 %v6090_v1 }
 0xa5b   :  { %4757 = vmatpush3.bf16.msra.mxu1 %v6094_v8 }
 0xa5c   :  { %4759 = vmatprep.subr.bf16.mxu1 %v6097_v21  ;;  %v6416_v21 = vsub.s32 1, %v5790_v18 }
 0xa5f   :  { %4761 = vmatpush3.bf16.msra.mxu1 %v6099_v59  ;;  %v6110_v59 = vrot.slane %v322_v41, %v6415_v50 }
 0xa60   :  { %4795 = vmatprep.subr.bf16.mxu1 %v5720_v32 }
 0xab1   :  { %v1987_v51 = vpop.xlane.xlu1 %1986 }
 0xab2   :  { %v1989_v55 = vmul.f32 0.0078125, %v1987_v51  ;;  %v6114_v51 = vrot.slane %v322_v41, %v6416_v21  ;;  %v6136_v21 = vld [vmem:[#allocation20] ss:$0 sm:$0xff] }
 0xab3   :  { %6417 = vst [vmem:[#allocation39_spill] sm:$0xff] %v6136_v21 }
 0xab4   :  { %v1991_v4 = vadd.f32 1e-05, %v1989_v55 }
 0xab6   :  { %5013 = vrsqrt.f32 %v1991_v4 }
 0xac0   :  { %v5014_v0 = vpop.eup %5013 }
 0xac1   :  { %v1995_v8 = vmul.f32 %v5014_v0, %v6025_v27 }
 0xac3   :  { %v2003_v15 = vmul.f32 %v6029_v6, %v1995_v8 }
 0xac5   :  { %v2011_v20 = vadd.f32 %v6031_v19, %v2003_v15 }
 0xac7   :  { %2094 = vmatmul.mubr.f32.gmra.mrb[14].mxu0 %v2011_v20 }
 0xac8   :  { %2289 = vmatprep.mubr.f32.mxu0 %v6411_v63 }
 0xb02   :  { %v2089_v55 = vpop.f32.mrb[12].mxu0 }
 0xb03   :  { %v2090_v4 = vadd.f32 %v2089_v55, %v6110_v59  ;;  %v2091_v27 = vpop.f32.mrb[13].mxu0 }
 0xb04   :  { %v2092_v6 = vadd.f32 %v2091_v27, %v6114_v51 }
 0xb05   :  { %v2100_v19 = vmax.f32 %v2090_v4, 0.0 }
 0xb06   :  { %v2101_v8 = vmax.f32 %v2092_v6, 0.0 }
 0xb08   :  { %2174 = vmatprep.mubr.f32.mxu1 %v2101_v8 }
 0xb09   :  { %2175 = vmatmul.mubr.f32.vlgmr.msra.gmra.mrb[28].mxu1 %v2100_v19 }
 0xb0a   :  { %4797 = vmatpush3.bf16.msra.mxu1 %v5720_v32 }
 0xb0b   :  { %4799 = vmatprep.subr.bf16.mxu1 %v5725_v36 }
 0xb0e   :  { %4801 = vmatpush3.bf16.msra.mxu1 %v5725_v36 }
 0xb0f   :  { %4803 = vmatprep.subr.bf16.mxu1 %v5733_v43 }
 0xb12   :  { %4805 = vmatpush3.bf16.msra.mxu1 %v5733_v43 }
 0xb13   :  { %4807 = vmatprep.subr.bf16.mxu1 %v5743_v52 }
 0xb16   :  { %4809 = vmatpush3.bf16.msra.mxu1 %v5743_v52 }
 0xb17   :  { %4811 = vmatprep.subr.bf16.mxu1 %v5753_v61 }
 0xb1a   :  { %4813 = vmatpush3.bf16.msra.mxu1 %v5753_v61 }
 0xb1b   :  { %4815 = vmatprep.subr.bf16.mxu1 %v5763_v5 }
 0xb1e   :  { %4817 = vmatpush3.bf16.msra.mxu1 %v5763_v5 }
 0xb1f   :  { %4819 = vmatprep.subr.bf16.mxu1 %v5769_v10 }
 0xb22   :  { %4821 = vmatpush3.bf16.msra.mxu1 %v5769_v10 }
 0xb23   :  { %4823 = vmatprep.subr.bf16.mxu1 %v5775_v13 }
 0xb26   :  { %4825 = vmatpush3.bf16.msra.mxu1 %v5775_v13 }
 0xb27   :  { %4522 = vmatprep.subr.mxu1 %v6411_v63 }
 0xb9a   :  { %v2095_v32 = vpop.f32.mrb[14].mxu0 }
 0xb9b   :  { %v2096_v36 = vadd.f32 %v2095_v32, %v6110_v59  ;;  %v2097_v43 = vpop.f32.mrb[15].mxu0 }
 0xb9c   :  { %v2098_v52 = vadd.f32 %v2097_v43, %v6114_v51 }
 0xb9d   :  { %v2102_v18 = vmax.f32 %v2096_v36, 0.0 }
 0xb9e   :  { %v2103_v61 = vmax.f32 %v2098_v52, 0.0 }
 0xba0   :  { %2179 = vmatprep.mubr.f32.mxu1 %v2103_v61 }
 0xba1   :  { %2180 = vmatmul.mubr.f32.gmra.mrb[30].mxu1 %v2102_v18 }
 0xbdc   :  { %v4190_v5 = vpop.f32.mrb[28].mxu1 }
 0xbdd   :  { %v4191_v10 = vpop.f32.mrb[29].mxu1 }
 0xbde   :  { %v4192_v0 = vadd.f32 %v4191_v10, %v4190_v5 }
 0xbe0   :  { %v2177_v15 = vadd.f32 %v4192_v0, %v6136_v21  ;;  %v6141_v0 = vld [vmem:[#allocation22] ss:$0 sm:$0xff] }
 0xbe1   :  { %6418 = vst [vmem:[#allocation40_spill] sm:$0xff] %v6141_v0 }
 0xbe2   :  { %v2185_v13 = vadd.f32 %v2177_v15, %v6035_v33 }
 0xbe4   :  { %2187 = vadd.xlane.f32.xlu0 %v2185_v13 }
 0xc71   :  { %v2188_v41 = vpop.xlane.xlu0 %2187 }
 0xc72   :  { %v2191_v50 = vmul.f32 0.0078125, %v2188_v41 }
 0xc74   :  { %v2193_v55 = vsub.f32 %v2185_v13, %v2191_v50  ;;  %v4193_v4 = vpop.f32.mrb[30].mxu1  ;;  %v6143_v13 = vld [vmem:[#allocation23] ss:$0 sm:$0xff] }
 0xc75   :  { %v4194_v27 = vpop.f32.mrb[31].mxu1  ;;  %6419 = vst [vmem:[#allocation41_spill] sm:$0xff] %v6143_v13 }
 0xc76   :  { %v4195_v6 = vadd.f32 %v4194_v27, %v4193_v4  ;;  %v2195_v8 = vmul.f32 %v2193_v55, %v2193_v55 }
 0xc78   :  { %v2182_v19 = vadd.f32 %v4195_v6, %v6136_v21  ;;  %2197 = vadd.xlane.f32.xlu1 %v2195_v8 }
 0xc7a   :  { %v2186_v32 = vadd.f32 %v2182_v19, %v2011_v20 }
 0xc7c   :  { %2189 = vadd.xlane.f32.xlu0 %v2186_v32 }
 0xd05   :  { %v2198_v36 = vpop.xlane.xlu1 %2197 }
 0xd06   :  { %v2201_v43 = vmul.f32 0.0078125, %v2198_v36 }
 0xd08   :  { %v2203_v52 = vadd.f32 1e-05, %v2201_v43 }
 0xd09   :  { %v2190_v61 = vpop.xlane.xlu0 %2189 }
 0xd0a   :  { %5015 = vrsqrt.f32 %v2203_v52  ;;  %v2192_v18 = vmul.f32 0.0078125, %v2190_v61 }
 0xd0c   :  { %v2194_v33 = vsub.f32 %v2186_v32, %v2192_v18 }
 0xd0e   :  { %v2196_v5 = vmul.f32 %v2194_v33, %v2194_v33 }
 0xd10   :  { %2199 = vadd.xlane.f32.xlu1 %v2196_v5 }
 0xd14   :  { %v5016_v10 = vpop.eup %5015 }
 0xd15   :  { %v2207_v15 = vmul.f32 %v5016_v10, %v2193_v55 }
 0xd17   :  { %v2215_v41 = vmul.f32 %v6141_v0, %v2207_v15 }
 0xd19   :  { %v6147_v20 = vadd.f32 %v6143_v13, %v2215_v41 }
 0xd1b   :  { %2290 = vmatmul.mubr.f32.vlgmr.msra.gmra.mrb[16].mxu0 %v6147_v20  ;;  %4484 = vmatprep.mubr.f32.mxu1 %v6147_v20 }
 0xd1c   :  { %2295 = vmatprep.mubr.f32.mxu0 %v6411_v63 }
 0xd9d   :  { %v2200_v50 = vpop.xlane.xlu1 %2199 }
 0xd9e   :  { %v2202_v4 = vmul.f32 0.0078125, %v2200_v50 }
 0xda0   :  { %v2204_v27 = vadd.f32 1e-05, %v2202_v4 }
 0xda2   :  { %5017 = vrsqrt.f32 %v2204_v27 }
 0xdac   :  { %v5018_v6 = vpop.eup %5017 }
 0xdad   :  { %v2208_v8 = vmul.f32 %v5018_v6, %v2194_v33 }
 0xdaf   :  { %v2216_v55 = vmul.f32 %v6141_v0, %v2208_v8 }
 0xdb1   :  { %v6154_v19 = vadd.f32 %v6143_v13, %v2216_v55 }
 0xdb3   :  { %2296 = vmatmul.mubr.f32.gmra.mrb[18].mxu0 %v6154_v19  ;;  %4485 = vmatmul.mubr.f32.vlgmr.msra.gmra.mrb[32].mxu1 %v6154_v19 }
 0xdb4   :  { %4489 = vmatprep.mubr.msk.f32.mxu0 %vm5434_vm0, %v6411_v63  ;;  %4524 = vmatprep.mubr.msk.f32.mxu1 %vm5434_vm0, %v6411_v63 }
 0xdee   :  { %v2291_v32 = vpop.f32.mrb[16].mxu0 }
 0xdef   :  { %v2292_v36 = vadd.f32 %v2291_v32, %v5796_v24  ;;  %v2293_v43 = vpop.f32.mrb[17].mxu0  ;;  %v5059_v32 = vld [vmem:[#allocation5] ss:$0 sm:$0xff] }
 0xdf0   :  { %v2294_v52 = vadd.f32 %v2293_v43, %v5800_v25 }
 0xdf1   :  { %v2377_v61 = vmul.f32 0.17677669, %v2292_v36 }
 0xdf2   :  { %2387 = vrot.lane.b32.xlu0 %v2294_v52, %s5436_s23  ;;  %4488 = vmatpush3.xpose.msk.msra.mxu0 %vm568_vm1, %v2294_v52 }
 0xdf3   :  { %2380 = vrot.lane.b32.xlu1 %v2377_v61, %s5436_s23  ;;  %4492 = vmatprep.subr.mxu0 %v6411_v63 }
 0xdf5   :  { %4490 = vmatmul.mubr.msk.f32.vlgmr.msra.gmra.mrb[20].mxu0 %vm568_vm1, %v2377_v61 }
 0xdf6   :  { %2382 = vrot.lane.b32.xlu0 %v2377_v61, %s5435_s13  ;;  %4494 = vmatprep.mubr.msk.f32.mxu0 %vm5434_vm0, %v6411_v63 }
 0xdf7   :  { %2389 = vrot.lane.b32.xlu1 %v2294_v52, %s5435_s13 }
 0xdfa   :  { %2384 = vrot.lane.b32.xlu0 %v2377_v61, %s5437_s15 }
 0xdfb   :  { %2391 = vrot.lane.b32.xlu1 %v2294_v52, %s5437_s15 }
 0xe64   :  { %v2388_v18 = vpop.permute.xlu0 %2387 }
 0xe65   :  { %v2381_v33 = vpop.permute.xlu1 %2380  ;;  %4493 = vmatpush3.xpose.msk.msra.mxu0 %vm568_vm1, %v2388_v18 }
 0xe66   :  { %4497 = vmatprep.subr.mxu0 %v6411_v63 }
 0xe68   :  { %4495 = vmatmul.mubr.msk.f32.vlgmr.msra.gmra.mrb[22].mxu0 %vm568_vm1, %v2381_v33  ;;  %v2383_v10 = vpop.permute.xlu0 %2382 }
 0xe69   :  { %v2390_v5 = vpop.permute.xlu1 %2389  ;;  %4499 = vmatprep.mubr.msk.f32.mxu0 %vm5434_vm0, %v6411_v63 }
 0xe6a   :  { %4498 = vmatpush3.xpose.msk.msra.mxu0 %vm568_vm1, %v2390_v5 }
 0xe6b   :  { %4502 = vmatprep.subr.mxu0 %v6411_v63 }
 0xe6c   :  { %v2385_v41 = vpop.permute.xlu0 %2384 }
 0xe6d   :  { %v2392_v15 = vpop.permute.xlu1 %2391  ;;  %4500 = vmatmul.mubr.msk.f32.vlgmr.msra.gmra.mrb[24].mxu0 %vm568_vm1, %v2383_v10 }
 0xe6e   :  { %4503 = vmatpush3.xpose.msk.msra.mxu0 %vm568_vm1, %v2392_v15  ;;  %4504 = vmatprep.mubr.msk.f32.mxu0 %vm5434_vm0, %v6411_v63 }
 0xe6f   :  { %4507 = vmatprep.subr.mxu0 %v6411_v63 }
 0xe71   :  { %4505 = vmatmul.mubr.msk.f32.vlgmr.msra.gmra.mrb[26].mxu0 %vm568_vm1, %v2385_v41 }
 0xe72   :  { %4509 = vmatprep.mubr.msk.f32.mxu0 %vm5434_vm0, %v6411_v63 }
 0xe86   :  { %v2297_v50 = vpop.f32.mrb[18].mxu0  ;;  %v6190_v4 = vpop.f32.mrb[32].mxu1 }
 0xe87   :  { %v2299_v27 = vpop.f32.mrb[19].mxu0  ;;  %v2368_v6 = vpop.f32.mrb[33].mxu1  ;;  %v2298_v0 = vadd.f32 %v2297_v50, %v5796_v24 }
 0xe88   :  { %v2369_v8 = vadd.f32 %v2368_v6, %v5824_v46  ;;  %v2300_v24 = vadd.f32 %v2299_v27, %v5800_v25 }
 0xe89   :  { %v6201_v21 = vmul.f32 0.17677669, %v2298_v0 }
 0xe8a   :  { %4508 = vmatpush3.msra.mxu0 %v2369_v8 }
 0xe8b   :  { %4512 = vmatprep.subr.mxu0 %v6411_v63 }
 0xec8   :  { %v2473_v55 = vpop.f32.mrb[20].mxu0 }
 0xec9   :  { %v2474_v36 = vadd.f32 %v5059_v32, %v2473_v55  ;;  %v4491_v43 = vpop.f32.mrb[21].mxu0 }
 0xecb   :  { %v2699_v52 = vsel %vm865_vm2, %v2474_v36, -inf }
 0xecc   :  { %2700 = vmax.xlane.f32.xlu1 %v2699_v52 }
 0xedd   :  { %2397 = vrot.lane.b32.xlu1 %v2369_v8, %s5435_s13 }
 0xee1   :  { %2400 = vrot.lane.b32.xlu1 %v2369_v8, %s5437_s15 }
 0xf3b   :  { %v2547_v61 = vpop.f32.mrb[22].mxu0 }
 0xf3c   :  { %v2548_v18 = vadd.f32 %v5059_v32, %v2547_v61  ;;  %v4496_v33 = vpop.f32.mrb[23].mxu0 }
 0xf3e   :  { %v2702_v5 = vsel %vm865_vm2, %v2548_v18, -inf }
 0xf3f   :  { %2703 = vmax.xlane.f32.xlu0 %v2702_v5 }
 0xf40   :  { %v2621_v10 = vpop.f32.mrb[24].mxu0 }
 0xf41   :  { %v2622_v15 = vadd.f32 %v5059_v32, %v2621_v10  ;;  %v4501_v41 = vpop.f32.mrb[25].mxu0 }
 0xf43   :  { %v2705_v6 = vsel %vm865_vm2, %v2622_v15, -inf }
 0xf44   :  { %2706 = vmax.xlane.f32.xlu0 %v2705_v6  ;;  %v2695_v55 = vpop.f32.mrb[26].mxu0 }
 0xf45   :  { %v2696_v43 = vadd.f32 %v5059_v32, %v2695_v55  ;;  %v4506_v13 = vpop.f32.mrb[27].mxu0 }
 0xf47   :  { %v2708_v52 = vsel %vm865_vm2, %v2696_v43, -inf }
 0xf48   :  { %2709 = vmax.xlane.f32.xlu1 %v2708_v52 }
 0xf59   :  { %v2701_v61 = vpop.xlane.xlu1 %2700  ;;  %3051 = vrot.lane.b32.xlu1 %v6201_v21, %s5436_s23 }
 0xf5a   :  { %2394 = vrot.lane.b32.xlu0 %v2369_v8, %s5436_s23  ;;  %v2711_v10 = vsub.f32 %v2474_v36, %v2701_v61 }
 0xf5c   :  { %v2715_v13 = vmul.f32 1.442695, %v2711_v10 }
 0xf5d   :  { %v2398_v33 = vpop.permute.xlu1 %2397 }
 0xf5e   :  { %5019 = vpow2.f32 %v2715_v13 }
 0xf61   :  { %v2401_v5 = vpop.permute.xlu1 %2400 }
 0xf62   :  { %4523 = vmatpush3.msra.mxu1 %v2401_v5 }
 0xf63   :  { %4532 = vmatprep.subr.mxu1 %v6411_v63 }
 0xf68   :  { %v5020_v32 = vpop.eup %5019 }
 0xf69   :  { %v2723_v41 = vsel %vm865_vm2, %v5020_v32, 0.0 }
 0xf79   :  { %2724 = vadd.xlane.f32.xlu0 %v2723_v41 }
 0xf8f   :  { %3058 = vrot.lane.b32.xlu0 %v2300_v24, %s5436_s23 }
 0xfcc   :  { %v2704_v0 = vpop.xlane.xlu0 %2703 }
 0xfcd   :  { %v2712_v50 = vsub.f32 %v2548_v18, %v2704_v0 }
 0xfcf   :  { %v2717_v6 = vmul.f32 1.442695, %v2712_v50 }
 0xfd1   :  { %5021 = vpow2.f32 %v2717_v6  ;;  %v2707_v8 = vpop.xlane.xlu0 %2706 }
 0xfd2   :  { %v2713_v55 = vsub.f32 %v2622_v15, %v2707_v8 }
 0xfd4   :  { %v2719_v52 = vmul.f32 1.442695, %v2713_v55 }
 0xfd5   :  { %v2710_v25 = vpop.xlane.xlu1 %2709  ;;  %v2395_v15 = vpop.permute.xlu0 %2394 }
 0xfd6   :  { %5023 = vpow2.f32 %v2719_v52  ;;  %v2714_v27 = vsub.f32 %v2696_v43, %v2710_v25 }
 0xfd8   :  { %v2721_v18 = vmul.f32 1.442695, %v2714_v27 }
 0xfd9   :  { %v3052_v43 = vpop.permute.xlu1 %3051 }
 0xfda   :  { %5025 = vpow2.f32 %v2721_v18 }
 0xfdb   :  { %v5022_v36 = vpop.eup %5021 }
 0xfdc   :  { %v2726_v61 = vsel %vm865_vm2, %v5022_v36, 0.0 }
 0xfdd   :  { %2727 = vadd.xlane.f32.xlu1 %v2726_v61 }
 0xfe0   :  { %v5024_v5 = vpop.eup %5023 }
 0xfe1   :  { %v2729_v10 = vsel %vm865_vm2, %v5024_v5, 0.0 }
 0xfe2   :  { %2730 = vadd.xlane.f32.xlu0 %v2729_v10 }
 0xfe4   :  { %v5026_v41 = vpop.eup %5025 }
 0xfe5   :  { %v2732_v50 = vsel %vm865_vm2, %v5026_v41, 0.0 }
 0xfee   :  { %3062 = vrot.lane.b32.xlu1 %v2300_v24, %s5437_s15 }
 0xff8   :  { %3060 = vrot.lane.b32.xlu0 %v2300_v24, %s5435_s13 }
 0xffc   :  { %3053 = vrot.lane.b32.xlu0 %v6201_v21, %s5435_s13 }
0x1006   :  { %v2725_v13 = vpop.xlane.xlu0 %2724 }
0x1007   :  { %5027 = vrcp.f32 %v2725_v13 }
0x100a   :  { %v3059_v55 = vpop.permute.xlu0 %3058 }
0x1011   :  { %v5028_v0 = vpop.eup %5027 }
0x1012   :  { %v2736_v6 = vmul.f32 %v5028_v0, %v5020_v32  ;;  %2733 = vadd.xlane.f32.xlu1 %v2732_v50 }
0x1014   :  { %4510 = vmatmul.mubr.msk.f32.vlgmr.msra.gmra.mrb[28].mxu0 %vm865_vm2, %v2736_v6 }
0x1015   :  { %4513 = vmatpush3.msra.mxu0 %v2395_v15  ;;  %4514 = vmatprep.mubr.msk.f32.mxu0 %vm5434_vm0, %v6411_v63 }
0x1016   :  { %4517 = vmatprep.subr.mxu0 %v6411_v63 }
0x1023   :  { %3055 = vrot.lane.b32.xlu1 %v6201_v21, %s5437_s15 }
0x106a   :  { %v2728_v8 = vpop.xlane.xlu1 %2727 }
0x106b   :  { %5029 = vrcp.f32 %v2728_v8 }
0x106f   :  { %v2731_v52 = vpop.xlane.xlu0 %2730 }
0x1070   :  { %5031 = vrcp.f32 %v2731_v52 }
0x1073   :  { %v3061_v27 = vpop.permute.xlu0 %3060 }
0x1075   :  { %v5030_v61 = vpop.eup %5029 }
0x1076   :  { %v2738_v32 = vmul.f32 %v5030_v61, %v5022_v36 }
0x1077   :  { %v3054_v36 = vpop.permute.xlu0 %3053 }
0x1078   :  { %4515 = vmatmul.mubr.msk.f32.vlgmr.msra.gmra.mrb[30].mxu0 %vm865_vm2, %v2738_v32 }
0x1079   :  { %4518 = vmatpush3.msra.mxu0 %v2398_v33  ;;  %4519 = vmatprep.mubr.msk.f32.mxu0 %vm5434_vm0, %v6411_v63  ;;  %v6240_v33 = vadd.f32 %v6190_v4, %v5824_v46 }
0x107a   :  { %v5032_v10 = vpop.eup %5031  ;;  %4527 = vmatprep.subr.mxu0 %v6411_v63 }
0x107b   :  { %v2740_v25 = vmul.f32 %v5032_v10, %v5024_v5 }
0x107d   :  { %4520 = vmatmul.mubr.msk.f32.vlgmr.msra.gmra.mrb[32].mxu0 %vm865_vm2, %v2740_v25 }
0x107e   :  { %4529 = vmatprep.mubr.msk.f32.mxu0 %vm5434_vm0, %v6411_v63 }
0x1080   :  { %4528 = vmatpush3.xpose.msk.msra.mxu0 %vm568_vm1, %v2300_v24 }
0x1081   :  { %4537 = vmatprep.subr.mxu0 %v6411_v63 }
0x1083   :  { %4530 = vmatmul.mubr.msk.f32.vlgmr.msra.gmra.mrb[34].mxu0 %vm568_vm1, %v6201_v21  ;;  %v3063_v21 = vpop.permute.xlu1 %3062 }
0x1084   :  { %4538 = vmatpush3.xpose.msk.msra.mxu0 %vm568_vm1, %v3061_v27  ;;  %4539 = vmatprep.mubr.msk.f32.mxu0 %vm5434_vm0, %v6411_v63 }
0x1085   :  { %4547 = vmatprep.subr.mxu0 %v6411_v63 }
0x1087   :  { %4540 = vmatmul.mubr.msk.f32.vlgmr.msra.gmra.mrb[36].mxu0 %vm568_vm1, %v3054_v36 }
0x1088   :  { %4548 = vmatpush3.msra.mxu0 %v6240_v33  ;;  %4549 = vmatprep.mubr.msk.f32.mxu0 %vm5434_vm0, %v6411_v63 }
0x1089   :  { %4557 = vmatprep.subr.mxu0 %v6411_v63 }
0x109f   :  { %v2734_v24 = vpop.xlane.xlu1 %2733 }
0x10a0   :  { %5033 = vrcp.f32 %v2734_v24 }
0x10a3   :  { %v3056_v46 = vpop.permute.xlu1 %3055 }
0x10aa   :  { %v5034_v5 = vpop.eup %5033 }
0x10ab   :  { %v2742_v18 = vmul.f32 %v5034_v5, %v5026_v41 }
0x10ad   :  { %4525 = vmatmul.mubr.msk.f32.vlgmr.msra.gmra.mrb[34].mxu1 %vm865_vm2, %v2742_v18 }
0x10ae   :  { %4533 = vmatpush3.xpose.msk.msra.mxu1 %vm568_vm1, %v3059_v55  ;;  %4534 = vmatprep.mubr.msk.f32.mxu1 %vm5434_vm0, %v6411_v63 }
0x10af   :  { %4542 = vmatprep.subr.mxu1 %v6411_v63 }
0x10b1   :  { %4535 = vmatmul.mubr.msk.f32.vlgmr.msra.gmra.mrb[36].mxu1 %vm568_vm1, %v3052_v43  ;;  %v5060_v43 = vld [vmem:[#allocation5 + $0x1] ss:$0 sm:$0xff] }
0x10b2   :  { %4543 = vmatpush3.xpose.msk.msra.mxu1 %vm568_vm1, %v3063_v21  ;;  %4544 = vmatprep.mubr.msk.f32.mxu1 %vm5434_vm0, %v6411_v63 }
0x10b3   :  { %4552 = vmatprep.subr.mxu1 %v6411_v63 }
0x10b5   :  { %4545 = vmatmul.mubr.msk.f32.vlgmr.msra.gmra.mrb[38].mxu1 %vm568_vm1, %v3056_v46 }
0x10b6   :  { %4554 = vmatprep.mubr.msk.f32.mxu1 %vm5434_vm0, %v6411_v63 }
0x10e7   :  { %v6260_v4 = vpop.f32.mrb[28].mxu0 }
0x10e8   :  { %v4511_v15 = vpop.f32.mrb[29].mxu0 }
0x114b   :  { %v6262_v13 = vpop.f32.mrb[30].mxu0 }
0x114c   :  { %v4516_v41 = vpop.f32.mrb[31].mxu0 }
0x1150   :  { %v6264_v0 = vpop.f32.mrb[32].mxu0 }
0x1151   :  { %v4521_v50 = vpop.f32.mrb[33].mxu0 }
0x1156   :  { %v3144_v6 = vpop.f32.mrb[34].mxu0 }
0x1157   :  { %v3145_v8 = vadd.f32 %v5060_v43, %v3144_v6  ;;  %v4531_v55 = vpop.f32.mrb[35].mxu0 }
0x1159   :  { %v3370_v52 = vsel %vm865_vm2, %v3145_v8, -inf }
0x115a   :  { %3371 = vmax.xlane.f32.xlu0 %v3370_v52  ;;  %v3292_v61 = vpop.f32.mrb[36].mxu0 }
0x115b   :  { %v3293_v32 = vadd.f32 %v5060_v43, %v3292_v61  ;;  %v4541_v10 = vpop.f32.mrb[37].mxu0 }
0x115d   :  { %v3376_v25 = vsel %vm865_vm2, %v3293_v32, -inf }
0x115e   :  { %3377 = vmax.xlane.f32.xlu0 %v3376_v25 }
0x1180   :  { %v6268_v27 = vpop.f32.mrb[34].mxu1 }
0x1181   :  { %v4526_v36 = vpop.f32.mrb[35].mxu1 }
0x1184   :  { %v3218_v21 = vpop.f32.mrb[36].mxu1 }
0x1185   :  { %v3219_v24 = vadd.f32 %v5060_v43, %v3218_v21  ;;  %v4536_v5 = vpop.f32.mrb[37].mxu1 }
0x1187   :  { %v3373_v18 = vsel %vm865_vm2, %v3219_v24, -inf }
0x1188   :  { %3374 = vmax.xlane.f32.xlu1 %v3373_v18  ;;  %v3366_v46 = vpop.f32.mrb[38].mxu1 }
0x1189   :  { %v3367_v15 = vadd.f32 %v5060_v43, %v3366_v46  ;;  %v4546_v41 = vpop.f32.mrb[39].mxu1 }
0x118b   :  { %v3379_v50 = vsel %vm865_vm2, %v3367_v15, -inf }
0x118c   :  { %3380 = vmax.xlane.f32.xlu0 %v3379_v50 }
0x1199   :  { %3065 = vrot.lane.b32.xlu1 %v6240_v33, %s5436_s23 }
0x11e7   :  { %v3372_v6 = vpop.xlane.xlu0 %3371 }
0x11e8   :  { %v3382_v55 = vsub.f32 %v3145_v8, %v3372_v6 }
0x11ea   :  { %v3386_v52 = vmul.f32 1.442695, %v3382_v55 }
0x11eb   :  { %v3378_v61 = vpop.xlane.xlu0 %3377 }
0x11ec   :  { %5035 = vpow2.f32 %v3386_v52  ;;  %v3384_v10 = vsub.f32 %v3293_v32, %v3378_v61 }
0x11ee   :  { %v3390_v25 = vmul.f32 1.442695, %v3384_v10 }
0x11f0   :  { %5037 = vpow2.f32 %v3390_v25 }
0x11f6   :  { %v5036_v36 = vpop.eup %5035 }
0x11f7   :  { %v3394_v21 = vsel %vm865_vm2, %v5036_v36, 0.0 }
0x11f8   :  { %3395 = vadd.xlane.f32.xlu1 %v3394_v21 }
0x11fa   :  { %v5038_v43 = vpop.eup %5037 }
0x11fb   :  { %v3400_v5 = vsel %vm865_vm2, %v5038_v43, 0.0 }
0x11fc   :  { %3401 = vadd.xlane.f32.xlu1 %v3400_v5 }
0x120d   :  { %3071 = vrot.lane.b32.xlu1 %v6240_v33, %s5437_s15 }
0x1215   :  { %v3375_v18 = vpop.xlane.xlu1 %3374 }
0x1216   :  { %v3383_v46 = vsub.f32 %v3219_v24, %v3375_v18 }
0x1218   :  { %v3388_v8 = vmul.f32 1.442695, %v3383_v46 }
0x1219   :  { %v3066_v41 = vpop.permute.xlu1 %3065  ;;  %v3381_v50 = vpop.xlane.xlu0 %3380 }
0x121a   :  { %5039 = vpow2.f32 %v3388_v8  ;;  %v3385_v32 = vsub.f32 %v3367_v15, %v3381_v50  ;;  %4553 = vmatpush3.msra.mxu1 %v3066_v41 }
0x121b   :  { %4562 = vmatprep.subr.mxu1 %v6411_v63 }
0x121c   :  { %v3392_v6 = vmul.f32 1.442695, %v3385_v32 }
0x121e   :  { %5041 = vpow2.f32 %v3392_v6 }
0x1224   :  { %v5040_v55 = vpop.eup %5039 }
0x1225   :  { %v3397_v52 = vsel %vm865_vm2, %v5040_v55, 0.0 }
0x1226   :  { %3398 = vadd.xlane.f32.xlu0 %v3397_v52 }
0x1228   :  { %v5042_v61 = vpop.eup %5041 }
0x1229   :  { %v3403_v10 = vsel %vm865_vm2, %v5042_v61, 0.0 }
0x122a   :  { %3404 = vadd.xlane.f32.xlu0 %v3403_v10 }
0x1240   :  { %3068 = vrot.lane.b32.xlu0 %v6240_v33, %s5435_s13 }
0x1285   :  { %v3396_v24 = vpop.xlane.xlu1 %3395 }
0x1286   :  { %5043 = vrcp.f32 %v3396_v24 }
0x1289   :  { %v3402_v21 = vpop.xlane.xlu1 %3401 }
0x128a   :  { %5045 = vrcp.f32 %v3402_v21 }
0x128d   :  { %v3072_v50 = vpop.permute.xlu1 %3071 }
0x1290   :  { %v5044_v25 = vpop.eup %5043 }
0x1291   :  { %v3407_v15 = vmul.f32 %v5044_v25, %v5036_v36 }
0x1293   :  { %4550 = vmatmul.mubr.msk.f32.vlgmr.msra.gmra.mrb[38].mxu0 %vm865_vm2, %v3407_v15 }
0x1294   :  { %4559 = vmatprep.mubr.msk.f32.mxu0 %vm5434_vm0, %v6411_v63  ;;  %v5046_v46 = vpop.eup %5045 }
0x1295   :  { %v3411_v8 = vmul.f32 %v5046_v46, %v5038_v43  ;;  %v5062_v46 = vld [vmem:[#allocation13] ss:$0 sm:$0xff] }
0x12b3   :  { %v3399_v5 = vpop.xlane.xlu0 %3398 }
0x12b4   :  { %5047 = vrcp.f32 %v3399_v5 }
0x12b7   :  { %v3405_v18 = vpop.xlane.xlu0 %3404 }
0x12b8   :  { %5049 = vrcp.f32 %v3405_v18 }
0x12bb   :  { %v3069_v41 = vpop.permute.xlu0 %3068 }
0x12bc   :  { %4558 = vmatpush3.msra.mxu0 %v3069_v41 }
0x12bd   :  { %4560 = vmatmul.mubr.msk.f32.vlgmr.msra.gmra.mrb[40].mxu0 %vm865_vm2, %v3411_v8  ;;  %4827 = vmatprep.subr.bf16.mxu0 %v5929_v23 }
0x12be   :  { %v5048_v33 = vpop.eup %5047  ;;  %4829 = vmatpush3.bf16.msra.mxu0 %v5929_v23  ;;  %v6420_v23 = vld [vmem:[#allocation35_spill] sm:$0xff] }
0x12bf   :  { %v3409_v36 = vmul.f32 %v5048_v33, %v5040_v55  ;;  %4831 = vmatprep.subr.bf16.mxu0 %v5931_v17  ;;  %v5063_v33 = vld [vmem:[#allocation14] ss:$0 sm:$0xff] }
0x12c1   :  { %4555 = vmatmul.mubr.msk.f32.vlgmr.msra.gmra.mrb[40].mxu1 %vm865_vm2, %v3409_v36 }
0x12c2   :  { %v5050_v32 = vpop.eup %5049  ;;  %4563 = vmatpush3.msra.mxu1 %v3072_v50  ;;  %4564 = vmatprep.mubr.msk.f32.mxu1 %vm5434_vm0, %v6411_v63 }
0x12c3   :  { %v3413_v43 = vmul.f32 %v5050_v32, %v5042_v61  ;;  %4833 = vmatpush3.bf16.msra.mxu0 %v5931_v17  ;;  %4859 = vmatprep.subr.bf16.mxu1 %v5975_v37 }
0x12c4   :  { %4835 = vmatprep.subr.bf16.mxu0 %v5936_v29 }
0x12c5   :  { %4565 = vmatmul.mubr.msk.f32.vlgmr.msra.gmra.mrb[42].mxu1 %vm865_vm2, %v3413_v43 }
0x12c6   :  { %4861 = vmatpush1.bf16.msra.mxu1 %v5977_v49  ;;  %3888 = vmatprep.mubr.f32.mxu1 %v6411_v63 }
0x12c7   :  { %4837 = vmatpush3.bf16.msra.mxu0 %v5936_v29  ;;  %4863 = vmatprep.subr.bf16.mxu1 %v5979_v45 }
0x12c8   :  { %4839 = vmatprep.subr.bf16.mxu0 %v5940_v38 }
0x12ca   :  { %4865 = vmatpush1.bf16.msra.mxu1 %v5983_v26 }
0x12cb   :  { %4841 = vmatpush3.bf16.msra.mxu0 %v5940_v38  ;;  %4867 = vmatprep.subr.bf16.mxu1 %v5986_v2 }
0x12cc   :  { %4843 = vmatprep.subr.bf16.mxu0 %v5944_v40 }
0x12ce   :  { %4869 = vmatpush1.bf16.msra.mxu1 %v5989_v35 }
0x12cf   :  { %4845 = vmatpush3.bf16.msra.mxu0 %v5944_v40  ;;  %4871 = vmatprep.subr.bf16.mxu1 %v5994_v42 }
0x12d0   :  { %4847 = vmatprep.subr.bf16.mxu0 %v5949_v47 }
0x12d2   :  { %4873 = vmatpush1.bf16.msra.mxu1 %v5996_v56 }
0x12d3   :  { %4849 = vmatpush3.bf16.msra.mxu0 %v5949_v47  ;;  %4875 = vmatprep.subr.bf16.mxu1 %v6000_v12 }
0x12d4   :  { %4851 = vmatprep.subr.bf16.mxu0 %v5953_v54 }
0x12d6   :  { %4877 = vmatpush1.bf16.msra.mxu1 %v6002_v16 }
0x12d7   :  { %4853 = vmatpush3.bf16.msra.mxu0 %v5953_v54  ;;  %4879 = vmatprep.subr.bf16.mxu1 %v6006_v7 }
0x12d8   :  { %4855 = vmatprep.subr.bf16.mxu0 %v5957_v57 }
0x12da   :  { %4881 = vmatpush1.bf16.msra.mxu1 %v6008_v39 }
0x12db   :  { %4857 = vmatpush3.bf16.msra.mxu0 %v5957_v57  ;;  %4883 = vmatprep.subr.bf16.mxu1 %v6012_v48 }
0x12dc   :  { %4891 = vmatprep.subr.bf16.mxu0 %v6051_v14 }
0x12de   :  { %4885 = vmatpush1.bf16.msra.mxu1 %v6014_v22 }
0x12df   :  { %4887 = vmatprep.subr.bf16.mxu1 %v6420_v23 }
0x12e2   :  { %4889 = vmatpush1.bf16.msra.mxu1 %v6020_v28 }
0x1366   :  { %v3483_v17 = vpop.f32.mrb[38].mxu0 }
0x1367   :  { %v4551_v29 = vpop.f32.mrb[39].mxu0 }
0x1390   :  { %v3629_v38 = vpop.f32.mrb[40].mxu0 }
0x1391   :  { %v4969_v40 = vpack.i.bf16 %v3629_v38, %v6264_v0  ;;  %v4561_v47 = vpop.f32.mrb[41].mxu0 }
0x1393   :  { %4970 = vrot.lane.b32.xlu0 %v4969_v40, %s5435_s13 }
0x1394   :  { %v3556_v54 = vpop.f32.mrb[40].mxu1 }
0x1395   :  { %v4964_v57 = vpack.i.bf16 %v3556_v54, %v6262_v13  ;;  %v4556_v37 = vpop.f32.mrb[41].mxu1 }
0x1397   :  { %4965 = vrot.lane.b32.xlu1 %v4964_v57, %s5437_s15 }
0x1398   :  { %v3702_v49 = vpop.f32.mrb[42].mxu1 }
0x1399   :  { %v4974_v22 = vpack.i.bf16 %v3702_v49, %v6268_v27  ;;  %v4566_v45 = vpop.f32.mrb[43].mxu1 }
0x139b   :  { %4975 = vrot.lane.b32.xlu1 %v4974_v22, %s5436_s23 }
0x1405   :  { %v4971_v2 = vpop.permute.xlu0 %4970 }
0x1406   :  { %v4973_v16 = vunpack.i.h.bf16 %v4971_v2  ;;  %v4972_v7 = vunpack.i.l.bf16 %v4971_v2 }
0x1409   :  { %v4966_v26 = vpop.permute.xlu1 %4965 }
0x140a   :  { %v4968_v35 = vunpack.i.h.bf16 %v4966_v26  ;;  %v4967_v42 = vunpack.i.l.bf16 %v4966_v26 }
0x140c   :  { %v3718_v56 = vsel %vm568_vm1, %v3483_v17, %v4968_v35  ;;  %v3047_v12 = vsel %vm568_vm1, %v6260_v4, %v4967_v42  ;;  %v6424_v35 = vld [vmem:[#allocation39_spill] sm:$0xff] }
0x140d   :  { %v4976_v39 = vpop.permute.xlu1 %4975  ;;  %v3048_v14 = vsel %vm1215_vm3, %v3047_v12, %v4972_v7  ;;  %v3719_v13 = vsel %vm1215_vm3, %v3718_v56, %v4973_v16 }
0x140e   :  { %v4978_v48 = vunpack.i.h.bf16 %v4976_v39  ;;  %v4977_v28 = vunpack.i.l.bf16 %v4976_v39 }
0x1410   :  { %v3049_v0 = vsel %vm1217_vm4, %v3048_v14, %v4977_v28  ;;  %v3720_v27 = vsel %vm1217_vm4, %v3719_v13, %v4978_v48 }
0x1411   :  { %4599 = vmatprep.mubr.f32.mxu0 %v3049_v0 }
0x1412   :  { %4600 = vmatmul.mubr.f32.vlgmr.msra.gmra.mrb[42].mxu0 %v3720_v27 }
0x1413   :  { %4893 = vmatpush3.bf16.msra.mxu0 %v6054_v30  ;;  %v6421_v30 = vld [vmem:[#allocation36_spill] sm:$0xff] }
0x1414   :  { %4895 = vmatprep.subr.bf16.mxu0 %v6056_v34  ;;  %v6422_v34 = vld [vmem:[#allocation37_spill] sm:$0xff] }
0x1417   :  { %4897 = vmatpush3.bf16.msra.mxu0 %v6061_v53  ;;  %v6423_v53 = vld [vmem:[#allocation38_spill] sm:$0xff] }
0x1418   :  { %4899 = vmatprep.subr.bf16.mxu0 %v6064_v58 }
0x141b   :  { %4901 = vmatpush3.bf16.msra.mxu0 %v6069_v62  ;;  %v5061_v62 = vld [vmem:[#allocation11] ss:$0 sm:$0xff] }
0x141c   :  { %4903 = vmatprep.subr.bf16.mxu0 %v6072_v60 }
0x141f   :  { %4905 = vmatpush3.bf16.msra.mxu0 %v6075_v9 }
0x1420   :  { %4907 = vmatprep.subr.bf16.mxu0 %v6078_v3 }
0x1423   :  { %4909 = vmatpush3.bf16.msra.mxu0 %v6081_v44 }
0x1424   :  { %4911 = vmatprep.subr.bf16.mxu0 %v6084_v11 }
0x1427   :  { %4913 = vmatpush3.bf16.msra.mxu0 %v6087_v31 }
0x1428   :  { %4915 = vmatprep.subr.bf16.mxu0 %v6090_v1 }
0x142b   :  { %4917 = vmatpush3.bf16.msra.mxu0 %v6421_v30 }
0x142c   :  { %4919 = vmatprep.subr.bf16.mxu0 %v6422_v34 }
0x142f   :  { %4921 = vmatpush3.bf16.msra.mxu0 %v6423_v53 }
0x14e5   :  { %v4601_v58 = vpop.f32.mrb[42].mxu0 }
0x14e6   :  { %v3793_v60 = vadd.f32 %v5061_v62, %v4601_v58  ;;  %v3787_v9 = vpop.f32.mrb[43].mxu0 }
0x14e7   :  { %v3788_v4 = vadd.f32 %v5061_v62, %v3787_v9 }
0x14e8   :  { %v3797_v3 = vadd.f32 %v3793_v60, %v6154_v19 }
0x14e9   :  { %v3796_v44 = vadd.f32 %v3788_v4, %v6147_v20 }
0x14ea   :  { %3800 = vadd.xlane.f32.xlu1 %v3797_v3 }
0x14eb   :  { %3798 = vadd.xlane.f32.xlu0 %v3796_v44 }
0x1577   :  { %v3801_v11 = vpop.xlane.xlu1 %3800 }
0x1578   :  { %v3799_v31 = vpop.xlane.xlu0 %3798  ;;  %v3803_v1 = vmul.f32 0.0078125, %v3801_v11 }
0x1579   :  { %v3802_v6 = vmul.f32 0.0078125, %v3799_v31 }
0x157a   :  { %v3805_v52 = vsub.f32 %v3797_v3, %v3803_v1 }
0x157b   :  { %v3804_v55 = vsub.f32 %v3796_v44, %v3802_v6  ;;  %v6425_v44 = vld [vmem:[#allocation40_spill] sm:$0xff]  ;;  %v6426_v6 = vld [vmem:[#allocation41_spill] sm:$0xff] }
0x157c   :  { %v3807_v10 = vmul.f32 %v3805_v52, %v3805_v52 }
0x157d   :  { %v3806_v61 = vmul.f32 %v3804_v55, %v3804_v55 }
0x157f   :  { %3808 = vadd.xlane.f32.xlu0 %v3806_v61 }
0x1583   :  { %3810 = vadd.xlane.f32.xlu0 %v3807_v10 }
0x160c   :  { %v3809_v24 = vpop.xlane.xlu0 %3808 }
0x160d   :  { %v3812_v25 = vmul.f32 0.0078125, %v3809_v24 }
0x160f   :  { %v3814_v15 = vadd.f32 1e-05, %v3812_v25 }
0x1610   :  { %v3811_v21 = vpop.xlane.xlu0 %3810 }
0x1611   :  { %5051 = vrsqrt.f32 %v3814_v15  ;;  %v3813_v19 = vmul.f32 0.0078125, %v3811_v21 }
0x1613   :  { %v3815_v5 = vadd.f32 1e-05, %v3813_v19 }
0x1615   :  { %5053 = vrsqrt.f32 %v3815_v5 }
0x161b   :  { %v5052_v20 = vpop.eup %5051 }
0x161c   :  { %v3818_v18 = vmul.f32 %v5052_v20, %v3804_v55 }
0x161e   :  { %v3820_v8 = vmul.f32 %v5062_v46, %v3818_v18 }
0x161f   :  { %v5054_v41 = vpop.eup %5053 }
0x1620   :  { %v3822_v36 = vadd.f32 %v5063_v33, %v3820_v8  ;;  %v3819_v50 = vmul.f32 %v5054_v41, %v3805_v52 }
0x1622   :  { %3889 = vmatmul.mubr.f32.vlgmr.msra.gmra.mrb[44].mxu1 %v3822_v36  ;;  %v3821_v32 = vmul.f32 %v5062_v46, %v3819_v50 }
0x1623   :  { %3894 = vmatprep.mubr.f32.mxu1 %v6411_v63 }
0x1624   :  { %v3823_v43 = vadd.f32 %v5063_v33, %v3821_v32 }
0x1626   :  { %3895 = vmatmul.mubr.f32.gmra.mrb[46].mxu1 %v3823_v43 }
0x16f5   :  { %v3890_v23 = vpop.f32.mrb[44].mxu1 }
0x16f6   :  { %v3891_v17 = vadd.f32 %v3890_v23, %v6110_v59  ;;  %v3892_v29 = vpop.f32.mrb[45].mxu1 }
0x16f7   :  { %v3893_v38 = vadd.f32 %v3892_v29, %v6114_v51 }
0x16f8   :  { %v3901_v54 = vmax.f32 %v3891_v17, 0.0 }
0x16f9   :  { %v3902_v40 = vmax.f32 %v3893_v38, 0.0  ;;  %v3896_v47 = vpop.f32.mrb[46].mxu1 }
0x16fa   :  { %v3897_v57 = vadd.f32 %v3896_v47, %v6110_v59  ;;  %v3898_v37 = vpop.f32.mrb[47].mxu1 }
0x16fb   :  { %v3899_v49 = vadd.f32 %v3898_v37, %v6114_v51  ;;  %3969 = vmatprep.mubr.f32.mxu0 %v3902_v40 }
0x16fc   :  { %3970 = vmatmul.mubr.f32.vlgmr.msra.gmra.mrb[44].mxu0 %v3901_v54  ;;  %v3903_v63 = vmax.f32 %v3897_v57, 0.0 }
0x16fd   :  { %v3904_v22 = vmax.f32 %v3899_v49, 0.0 }
0x16ff   :  { %3974 = vmatprep.mubr.f32.mxu0 %v3904_v22 }
0x1700   :  { %3975 = vmatmul.mubr.f32.gmra.mrb[46].mxu0 %v3903_v63 }
0x17cf   :  { %v4296_v45 = vpop.f32.mrb[44].mxu0 }
0x17d0   :  { %v4297_v26 = vpop.f32.mrb[45].mxu0 }
0x17d1   :  { %v4298_v2 = vadd.f32 %v4297_v26, %v4296_v45 }
0x17d3   :  { %v3972_v42 = vadd.f32 %v4298_v2, %v6424_v35  ;;  %v4299_v56 = vpop.f32.mrb[46].mxu0 }
0x17d4   :  { %v4300_v12 = vpop.f32.mrb[47].mxu0 }
0x17d5   :  { %v4301_v16 = vadd.f32 %v4300_v12, %v4299_v56  ;;  %v3980_v7 = vadd.f32 %v3972_v42, %v3822_v36 }
0x17d7   :  { %v3977_v59 = vadd.f32 %v4301_v16, %v6424_v35  ;;  %3982 = vadd.xlane.f32.xlu1 %v3980_v7 }
0x17d9   :  { %v3981_v39 = vadd.f32 %v3977_v59, %v3823_v43 }
0x17db   :  { %3984 = vadd.xlane.f32.xlu0 %v3981_v39 }
0x1864   :  { %v3983_v51 = vpop.xlane.xlu1 %3982 }
0x1865   :  { %v3986_v48 = vmul.f32 0.0078125, %v3983_v51 }
0x1867   :  { %v3988_v28 = vsub.f32 %v3980_v7, %v3986_v48 }
0x1868   :  { %v3985_v14 = vpop.xlane.xlu0 %3984 }
0x1869   :  { %v3987_v13 = vmul.f32 0.0078125, %v3985_v14  ;;  %v3990_v0 = vmul.f32 %v3988_v28, %v3988_v28 }
0x186b   :  { %v3989_v27 = vsub.f32 %v3981_v39, %v3987_v13  ;;  %3992 = vadd.xlane.f32.xlu1 %v3990_v0 }
0x186d   :  { %v3991_v30 = vmul.f32 %v3989_v27, %v3989_v27 }
0x186f   :  { %3994 = vadd.xlane.f32.xlu0 %v3991_v30 }
0x18f8   :  { %v3993_v34 = vpop.xlane.xlu1 %3992 }
0x18f9   :  { %v3996_v53 = vmul.f32 0.0078125, %v3993_v34 }
0x18fb   :  { %v3998_v58 = vadd.f32 1e-05, %v3996_v53 }
0x18fc   :  { %v3995_v62 = vpop.xlane.xlu0 %3994 }
0x18fd   :  { %5055 = vrsqrt.f32 %v3998_v58  ;;  %v3997_v60 = vmul.f32 0.0078125, %v3995_v62 }
0x18ff   :  { %v3999_v9 = vadd.f32 1e-05, %v3997_v60 }
0x1901   :  { %5057 = vrsqrt.f32 %v3999_v9 }
0x1907   :  { %v5056_v4 = vpop.eup %5055 }
0x1908   :  { %v4002_v3 = vmul.f32 %v5056_v4, %v3988_v28 }
0x190a   :  { %v4004_v11 = vmul.f32 %v6425_v44, %v4002_v3 }
0x190b   :  { %v5058_v31 = vpop.eup %5057 }
0x190c   :  { %v4003_v1 = vmul.f32 %v5058_v31, %v3989_v27  ;;  %v4006_v55 = vadd.f32 %v6426_v6, %v4004_v11 }
0x190e   :  { %v4005_v52 = vmul.f32 %v6425_v44, %v4003_v1  ;;  %4008 = vst [vmem:[#allocation25] sm:$0xff] %v4006_v55 }
0x1910   :  { %v4007_v61 = vadd.f32 %v6426_v6, %v4005_v52 }
0x1912   :  { %4009 = vst [vmem:[#allocation25 + $0x8] sm:$0xff] %v4007_v61 }
0x1913   :  { %5383 = shalt.err (!%p5380_p4)
}
0x1914   :  { %s5384_s2 = scalar_lea.hbm %s6395_s14, 256 }
0x1915   :  { %p5385_p5 = scmp.ne.s32.totalorder %s6395_s14, %s5384_s2  ;;  %p5388_p6 = scmp.lt.u32.totalorder %s5384_s2, %s6395_s14 }
0x1917   :  { %p5390_p7 = pnand %p5388_p6, %p5385_p5 }
0x1919   :  { %5393 = shalt.err (!%p5390_p7)
}
0x191a   :  { %4021 = dma.vmem_to_hbm [thread:$0]  %s4016_s20, 256, %s6395_s14, [#allocation4], %s5421_s11, %s5421_s11, %s5422_s16  }
0x191b   :  { %5410 = dma.done.wait [#allocation4], 256  }
0x191c   :  { %5411 = vsyncadd [#allocation4], 4294967040 }
0x191d   :  { %4025 = vsyncpa [#allocation3], 1 }
0x191e   :  { %4026 = vsyncpa [#allocation6], 1 }
0x191f   :  { %4027 = vsyncpa [#allocation9], 1 }
0x1920   :  { %4028 = vsyncpa [#allocation12], 1 }
0x1921   :  { %4029 = vsyncpa [#allocation15], 1 }
0x1922   :  { %4030 = vsyncpa [#allocation18], 1 }
0x1923   :  { %4031 = vsyncpa [#allocation21], 1 }
0x1924   :  { %4032 = vsyncpa [#allocation24], 1 }
0x1925   :  { %4033 = vsyncpa [#allocation4], 1 }

</bundles_post_ra>
